<compile_context>
chip_gen: v7x
topology: tpu7x:2x2x1
jax: 0.10.0
libtpu: 0.0.40
codegen_flags: <defaults>
</compile_context>

<pallas_src>
import numpy as np
import jax
import jax.numpy as jnp
from jax.experimental import pallas as pl
from jax.experimental.pallas import tpu as pltpu


# ---------------------------------------------------------------------------
# Kernel 1: depthwise ConvTranspose2d (k=3, s=2, p=1, op=0) + folded 1x1 mixing
# ---------------------------------------------------------------------------
def _dw_tconv_mix_kernel(wg_smem, x_ref, wcat_ref, ew_ref, ow_ref, eht_ref, oht_ref, o_ref):
    """One batch element.

    x_ref   : (Cin, H, W)       input planes for this batch element
    wg_smem : (Cin, 9)          depthwise ConvTranspose2d taps (SMEM scalars)
    wcat    : (R, Cin)          [w_conv1; w_1x1@w_convexp@w_conv; w_1x1]
    ew/ow   : (W,Wo)/(W-1,Wo)   constant 0/1 column-scatter matrices (even/odd cols)
    eht/oht : (Ho,H)/(Ho,H-1)   constant 0/1 row-scatter matrices   (even/odd rows)
    o_ref   : (R, Ho, Wo)       channel-mixed output slab for this batch element
    """
    Cin, H, W = x_ref.shape
    R, Ho, Wo = o_ref.shape
    ew, ow = ew_ref[...], ow_ref[...]
    eht, oht = eht_ref[...], oht_ref[...]
    wcat = wcat_ref[...]
    xall = x_ref[...]

    racc = jnp.zeros((R, Ho, Wo), jnp.float32)
    for c in range(Cin):
        xc = xall[c]
        # all 9 taps loaded once per channel (cheap scalar SMEM reads)
        t = [wg_smem[c, k] for k in range(9)]
        # polyphase decomposition of the stride-2 transposed conv:
        #   out[2i  ,2j  ] = x[i,j]*w11
        #   out[2i  ,2j+1] = x[i,j+1]*w10 + x[i,j]*w12
        #   out[2i+1,2j  ] = x[i+1,j]*w01 + x[i,j]*w21
        #   out[2i+1,2j+1] = x[i+1,j+1]*w00 + x[i+1,j]*w02 + x[i,j+1]*w20 + x[i,j]*w22
        ee = xc * t[4]
        eo = xc[:, 1:] * t[3] + xc[:, :-1] * t[5]
        oe = xc[1:, :] * t[1] + xc[:-1, :] * t[7]
        oo = (xc[1:, 1:] * t[0] + xc[1:, :-1] * t[2]
              + xc[:-1, 1:] * t[6] + xc[:-1, :-1] * t[8])
        # scatter the four phases into the (Ho, Wo) plane with 0/1 matmuls (MXU)
        top = (jnp.dot(ee, ew, preferred_element_type=jnp.float32)
               + jnp.dot(eo, ow, preferred_element_type=jnp.float32))        # even out rows
        bot = (jnp.dot(oe, ew, preferred_element_type=jnp.float32)
               + jnp.dot(oo, ow, preferred_element_type=jnp.float32))        # odd out rows
        y_c = (jnp.dot(eht, top, preferred_element_type=jnp.float32)
               + jnp.dot(oht, bot, preferred_element_type=jnp.float32))      # (Ho, Wo)
        # fused channel mixing with the concatenated / folded 1x1 weights
        racc = racc + wcat[:, c:c + 1][:, :, None] * y_c[None, :, :]
    o_ref[...] = racc


# ---------------------------------------------------------------------------
# Kernel 2: SimpleSelfAttention (spatial part) + folded conv_1x1 + SEBlock
# ---------------------------------------------------------------------------
def _attn_se_kernel(gamma_smem, rall_ref, selv_ref, w1_ref, b1_ref, w2_ref, b2_ref, out_ref):
    """rall: (B, R, Ho, Wo) with R = 1 + 2*Cout
         rall[b, 0]          = conv1(x1)[b]
         rall[b, 1:1+Cout]   = (w_1x1 @ w_convexp @ w_conv) @ x1[b]
         rall[b, 1+Cout:]    = w_1x1 @ x1[b]
       selv: (B, B, Ho, Ho) 0/1 selections reproducing PyTorch's x_.view(H, -1)
       batch/height folding quirk, so xxT = sum_k (Sel_k . V) (Sel_k . V)^T.
    """
    B, R, Ho, Wo = rall_ref.shape
    Cout = w2_ref.shape[0]
    gamma = gamma_smem[0]
    selv = selv_ref[...]
    rb = [rall_ref[b] for b in range(B)]          # each (R, Ho, Wo), stays in VMEM

    # xxT of the quirky view (no transpose materialised: dot_general contracts axis 1)
    xxT = jnp.zeros((Ho, Ho), jnp.float32)
    for k in range(B):
        vk = jnp.zeros((Ho, Wo), jnp.float32)
        for b in range(B):
            vk = vk + jnp.dot(selv[k, b], rb[b][0], preferred_element_type=jnp.float32)
        xxT = xxT + jax.lax.dot_general(vk, vk, (((1,), (1,)), ((), ())),
                                        preferred_element_type=jnp.float32)

    w1, b1 = w1_ref[...], b1_ref[...]
    w2, b2 = w2_ref[...], b2_ref[...]
    xxT_b = jnp.broadcast_to(xxT[None], (Cout, Ho, Ho))
    for b in range(B):
        p_b = rb[b][1:1 + Cout]                   # (Cout, Ho, Wo)
        q_b = rb[b][1 + Cout:]                    # (Cout, Ho, Wo)
        # o = matmul(xxT, convx) with convexp & conv_1x1 folded in (batched MXU einsum)
        att = jnp.einsum('kij,kjw->kiw', xxT_b, p_b, preferred_element_type=jnp.float32)
        y = gamma * att + q_b                     # == conv_1x1(gamma*convexp(o) + x1)
        # SEBlock(Cout, reduction=2)
        s = jnp.mean(jnp.mean(y, axis=2), axis=1, keepdims=True)          # (Cout, 1)
        h = jnp.dot(w1, s, preferred_element_type=jnp.float32) + b1
        h = jnp.where(h >= 0, h, 0.1 * h)                                 # LeakyReLU(0.1)
        g = jax.nn.sigmoid(jnp.dot(w2, h, preferred_element_type=jnp.float32) + b2)
        out_ref[b] = y * g[:, :, None]


# ---------------------------------------------------------------------------
# Wrapper
# ---------------------------------------------------------------------------
def _scatter_constants(B, H, W, Ho, Wo):
    ew = np.zeros((W, Wo), np.float32)
    ew[np.arange(W), 2 * np.arange(W)] = 1.0
    ow = np.zeros((W - 1, Wo), np.float32)
    ow[np.arange(W - 1), 2 * np.arange(W - 1) + 1] = 1.0
    eht = np.zeros((Ho, H), np.float32)
    eht[2 * np.arange(H), np.arange(H)] = 1.0
    oht = np.zeros((Ho, H - 1), np.float32)
    oht[2 * np.arange(H - 1) + 1, np.arange(H - 1)] = 1.0
    selv = np.zeros((B, B, Ho, Ho), np.float32)
    for k in range(B):
        for i in range(Ho):
            b, h = divmod(B * i + k, Ho)
            selv[k, b, i, h] = 1.0
    return ew, ow, eht, oht, selv


@jax.jit
def dwtrans_forward(x, p):
    B, Cin, H, W = x.shape
    # polyphase path is specialised to the DwTrans defaults (k=3, s=2, p=1, op=0)
    K, stride, padding = 3, 2, 1
    assert p["wg"].shape == (Cin, K, K)
    Ho = (H - 1) * stride - 2 * padding + K
    Wo = (W - 1) * stride - 2 * padding + K
    Cout = p["w_1x1"].shape[0]
    R = 1 + 2 * Cout
    hiprec = jax.lax.Precision.HIGHEST

    # fold conv_1x1 into the attention epilogue and concatenate all 1x1 weights (tiny)
    w_p = jnp.dot(p["w_1x1"],
                  jnp.dot(p["w_convexp"], p["w_conv"], precision=hiprec),
                  precision=hiprec)                                   # (Cout, Cin)
    wcat = jnp.concatenate([p["w_conv1"], w_p, p["w_1x1"]], axis=0).astype(jnp.float32)

    ew, ow, eht, oht, selv = _scatter_constants(B, H, W, Ho, Wo)

    # -- kernel 1: depthwise transposed conv + channel mixing, grid over batch --
    rall = pl.pallas_call(
        _dw_tconv_mix_kernel,
        out_shape=jax.ShapeDtypeStruct((B, R, Ho, Wo), jnp.float32),
        grid=(B,),
        in_specs=[
            pl.BlockSpec(memory_space=pltpu.MemorySpace.SMEM),              # depthwise taps
            pl.BlockSpec((None, Cin, H, W), lambda b: (b, 0, 0, 0)),        # x
            pl.BlockSpec((R, Cin), lambda b: (0, 0)),                       # wcat
            pl.BlockSpec((W, Wo), lambda b: (0, 0)),                        # ew
            pl.BlockSpec((W - 1, Wo), lambda b: (0, 0)),                    # ow
            pl.BlockSpec((Ho, H), lambda b: (0, 0)),                        # eht
            pl.BlockSpec((Ho, H - 1), lambda b: (0, 0)),                    # oht
        ],
        out_specs=pl.BlockSpec((None, R, Ho, Wo), lambda b: (b, 0, 0, 0)),
        compiler_params=pltpu.CompilerParams(dimension_semantics=("parallel",)),
    )(p["wg"].reshape(Cin, K * K).astype(jnp.float32), x, wcat, ew, ow, eht, oht)

    # -- kernel 2: attention (spatial) + folded conv_1x1 + SEBlock, all in VMEM --
    out = pl.pallas_call(
        _attn_se_kernel,
        out_shape=jax.ShapeDtypeStruct((B, Cout, Ho, Wo), jnp.float32),
        in_specs=[
            pl.BlockSpec(memory_space=pltpu.MemorySpace.SMEM),              # gamma
            pl.BlockSpec(memory_space=pltpu.MemorySpace.VMEM),              # rall
            pl.BlockSpec(memory_space=pltpu.MemorySpace.VMEM),              # selv
            pl.BlockSpec(memory_space=pltpu.MemorySpace.VMEM),              # w_fc1
            pl.BlockSpec(memory_space=pltpu.MemorySpace.VMEM),              # b_fc1
            pl.BlockSpec(memory_space=pltpu.MemorySpace.VMEM),              # w_fc2
            pl.BlockSpec(memory_space=pltpu.MemorySpace.VMEM),              # b_fc2
        ],
    )(jnp.reshape(p["gamma"], (1,)).astype(jnp.float32),
      rall, selv,
      p["w_fc1"], p["b_fc1"].reshape(-1, 1),
      p["w_fc2"], p["b_fc2"].reshape(-1, 1))
    return out


# ---------------------------------------------------------------------------
# Pure-jnp reference mirroring the PyTorch module op-by-op (for validation)
# ---------------------------------------------------------------------------
def _reference_forward(x, p):
    hp = jax.lax.Precision.HIGHEST
    B, Cin, H, W = x.shape
    K, stride, padding = 3, 2, 1
    # depthwise ConvTranspose2d == zero-dilate + pad(K-1-p) + correlate(flipped kernel)
    Hd, Wd = (H - 1) * stride + 1, (W - 1) * stride + 1
    xd = jnp.zeros((B, Cin, Hd, Wd), jnp.float32).at[:, :, ::stride, ::stride].set(x)
    lo = K - 1 - padding
    xp = jnp.pad(xd, ((0, 0), (0, 0), (lo, lo), (lo, lo)))
    Ho, Wo = Hd + 2 * lo - K + 1, Wd + 2 * lo - K + 1
    wf = p["wg"][:, ::-1, ::-1]
    x1 = jnp.zeros((B, Cin, Ho, Wo), jnp.float32)
    for kh in range(K):
        for kw in range(K):
            x1 = x1 + xp[:, :, kh:kh + Ho, kw:kw + Wo] * wf[None, :, kh, kw, None, None]
    # SimpleSelfAttention (including the x_.view(size[2], -1) quirk)
    xf = jnp.einsum('oc,bchw->bohw', p["w_conv1"], x1, precision=hp)      # (B,1,Ho,Wo)
    xv = xf.reshape(Ho, B * Wo)
    convx = jnp.einsum('mc,bchw->bmhw', p["w_conv"], x1, precision=hp)
    xxT = jnp.dot(xv, xv.T, precision=hp)
    o = jnp.einsum('ij,bmjw->bmiw', xxT, convx, precision=hp)
    o = jnp.einsum('cm,bmhw->bchw', p["w_convexp"], o, precision=hp)
    att = p["gamma"] * o + x1
    y = jnp.einsum('oc,bchw->bohw', p["w_1x1"], att, precision=hp)        # conv_1x1
    # SEBlock(reduction=2)
    s = jnp.mean(y, axis=(2, 3))                                          # (B, Cout)
    h = jnp.dot(s, p["w_fc1"].T, precision=hp) + p["b_fc1"][None, :]
    h = jnp.where(h >= 0, h, 0.1 * h)
    g = jax.nn.sigmoid(jnp.dot(h, p["w_fc2"].T, precision=hp) + p["b_fc2"][None, :])
    return y * g[:, :, None, None]


if __name__ == "__main__":
    B, Cin, Cout, H, W = 2, 8, 8, 8, 8
    Cmid = Cin // 4            # SimpleSelfAttention midchannel
    Chid = Cout // 2           # SEBlock hidden (reduction=2)

    key = jax.random.PRNGKey(0)
    ks = jax.random.split(key, 10)
    params = {
        "wg":        jax.random.normal(ks[0], (Cin, 3, 3), jnp.float32) * 0.3,   # ConvTranspose2d (Cin,1,3,3)
        "w_conv1":   jax.random.normal(ks[1], (1, Cin), jnp.float32) * 0.3,      # Conv2d(Cin, 1, 1)
        "w_conv":    jax.random.normal(ks[2], (Cmid, Cin), jnp.float32) * 0.3,   # Conv2d(Cin, Cin//4, 1)
        "w_convexp": jax.random.normal(ks[3], (Cin, Cmid), jnp.float32) * 0.3,   # Conv2d(Cin//4, Cin, 1)
        "gamma":     jnp.float32(0.5),   # learnable scalar; PyTorch init is 0.0 (also checked below)
        "w_1x1":     jax.random.normal(ks[4], (Cout, Cin), jnp.float32) * 0.3,   # Conv2d(Cin, Cout, 1)
        "w_fc1":     jax.random.normal(ks[5], (Chid, Cout), jnp.float32) * 0.3,  # Linear(Cout, Cout//2)
        "b_fc1":     jax.random.normal(ks[6], (Chid,), jnp.float32) * 0.1,
        "w_fc2":     jax.random.normal(ks[7], (Cout, Chid), jnp.float32) * 0.3,  # Linear(Cout//2, Cout)
        "b_fc2":     jax.random.normal(ks[8], (Cout,), jnp.float32) * 0.1,
    }
    x = jax.random.normal(ks[9], (B, Cin, H, W), jnp.float32)

    out = jax.block_until_ready(dwtrans_forward(x, params))
    assert out.shape == (B, Cout, 2 * H - 1, 2 * W - 1) and out.dtype == jnp.float32

    # numerical check vs a pure-jnp reference of the PyTorch forward
    # (tolerance covers MXU f32-emulation differences between Mosaic and XLA)
    ref = jax.block_until_ready(_reference_forward(x, params))
    err = float(jnp.max(jnp.abs(out - ref)))
    assert err < 2e-2, f"mismatch vs reference: max abs err = {err}"

    # also check with the PyTorch init value gamma = 0.0
    params0 = dict(params, gamma=jnp.float32(0.0))
    out0 = jax.block_until_ready(dwtrans_forward(x, params0))
    ref0 = jax.block_until_ready(_reference_forward(x, params0))
    err0 = float(jnp.max(jnp.abs(out0 - ref0)))
    assert err0 < 2e-2, f"mismatch vs reference (gamma=0): max abs err = {err0}"

    print("KERNEL_OK")
</pallas_src>

<mosaic_0001>
module attributes {stable_mosaic.version = 11 : i64} {
  func.func @_attn_se_kernel(%arg0: memref<1xf32, #tpu.memory_space<smem>>, %arg1: memref<2x17x15x15xf32, #tpu.memory_space<vmem>>, %arg2: memref<2x2x15x15xf32, #tpu.memory_space<vmem>>, %arg3: memref<4x8xf32, #tpu.memory_space<vmem>>, %arg4: memref<4x1xf32, #tpu.memory_space<vmem>>, %arg5: memref<8x4xf32, #tpu.memory_space<vmem>>, %arg6: memref<8x1xf32, #tpu.memory_space<vmem>>, %arg7: memref<2x8x15x15xf32, #tpu.memory_space<vmem>>) attributes {dimension_semantics = [], scalar_prefetch = 0 : i64, scratch_operands = 0 : i64, tpu.core_type = #tpu.core_type<tc>} {
    %c0 = arith.constant 0 : index
    %0 = memref.load %arg0[%c0] : memref<1xf32, #tpu.memory_space<smem>>
    %c0_0 = arith.constant 0 : index
    %c0_1 = arith.constant 0 : index
    %c0_2 = arith.constant 0 : index
    %c0_3 = arith.constant 0 : index
    %1 = vector.load %arg2[%c0_0, %c0_1, %c0_2, %c0_3] : memref<2x2x15x15xf32, #tpu.memory_space<vmem>>, vector<2x2x15x15xf32>
    %c0_4 = arith.constant 0 : index
    %c0_5 = arith.constant 0 : index
    %c0_6 = arith.constant 0 : index
    %c0_7 = arith.constant 0 : index
    %2 = vector.load %arg1[%c0_4, %c0_5, %c0_6, %c0_7] : memref<2x17x15x15xf32, #tpu.memory_space<vmem>>, vector<1x17x15x15xf32>
    %3 = vector.shape_cast %2 : vector<1x17x15x15xf32> to vector<17x15x15xf32>
    %c1 = arith.constant 1 : index
    %c0_8 = arith.constant 0 : index
    %c0_9 = arith.constant 0 : index
    %c0_10 = arith.constant 0 : index
    %4 = vector.load %arg1[%c1, %c0_8, %c0_9, %c0_10] : memref<2x17x15x15xf32, #tpu.memory_space<vmem>>, vector<1x17x15x15xf32>
    %5 = vector.shape_cast %4 : vector<1x17x15x15xf32> to vector<17x15x15xf32>
    %cst = arith.constant 0.000000e+00 : f32
    %6 = vector.broadcast %cst : f32 to vector<15x15xf32>
    %cst_11 = arith.constant 0.000000e+00 : f32
    %7 = vector.broadcast %cst_11 : f32 to vector<15x15xf32>
    %8 = vector.extract_strided_slice %1 {offsets = [0, 0, 0, 0], sizes = [1, 1, 15, 15], strides = [1, 1, 1, 1]} : vector<2x2x15x15xf32> to vector<1x1x15x15xf32>
    %9 = vector.shape_cast %8 : vector<1x1x15x15xf32> to vector<15x15xf32>
    %10 = vector.extract_strided_slice %3 {offsets = [0, 0, 0], sizes = [1, 15, 15], strides = [1, 1, 1]} : vector<17x15x15xf32> to vector<1x15x15xf32>
    %11 = vector.shape_cast %10 : vector<1x15x15xf32> to vector<15x15xf32>
    %cst_12 = arith.constant dense<0.000000e+00> : vector<15x15xf32>
    %12 = tpu.matmul %9, %11, %cst_12 {dimension_numbers = #tpu.dot_dimension_numbers<[1], [0], [0], [1], [0, 0, 1, 1], [], []>} : vector<15x15xf32>, vector<15x15xf32>, vector<15x15xf32> -> vector<15x15xf32>
    %13 = arith.addf %7, %12 : vector<15x15xf32>
    %14 = vector.extract_strided_slice %1 {offsets = [0, 1, 0, 0], sizes = [1, 1, 15, 15], strides = [1, 1, 1, 1]} : vector<2x2x15x15xf32> to vector<1x1x15x15xf32>
    %15 = vector.shape_cast %14 : vector<1x1x15x15xf32> to vector<15x15xf32>
    %16 = vector.extract_strided_slice %5 {offsets = [0, 0, 0], sizes = [1, 15, 15], strides = [1, 1, 1]} : vector<17x15x15xf32> to vector<1x15x15xf32>
    %17 = vector.shape_cast %16 : vector<1x15x15xf32> to vector<15x15xf32>
    %cst_13 = arith.constant dense<0.000000e+00> : vector<15x15xf32>
    %18 = tpu.matmul %15, %17, %cst_13 {dimension_numbers = #tpu.dot_dimension_numbers<[1], [0], [0], [1], [0, 0, 1, 1], [], []>} : vector<15x15xf32>, vector<15x15xf32>, vector<15x15xf32> -> vector<15x15xf32>
    %19 = arith.addf %13, %18 : vector<15x15xf32>
    %cst_14 = arith.constant dense<0.000000e+00> : vector<15x15xf32>
    %20 = tpu.matmul %19, %19, %cst_14 {dimension_numbers = #tpu.dot_dimension_numbers<[1], [1], [0], [0], [0, 0, 1, 0], [], []>} : vector<15x15xf32>, vector<15x15xf32>, vector<15x15xf32> -> vector<15x15xf32>
    %21 = arith.addf %6, %20 : vector<15x15xf32>
    %cst_15 = arith.constant 0.000000e+00 : f32
    %22 = vector.broadcast %cst_15 : f32 to vector<15x15xf32>
    %23 = vector.extract_strided_slice %1 {offsets = [1, 0, 0, 0], sizes = [1, 1, 15, 15], strides = [1, 1, 1, 1]} : vector<2x2x15x15xf32> to vector<1x1x15x15xf32>
    %24 = vector.shape_cast %23 : vector<1x1x15x15xf32> to vector<15x15xf32>
    %25 = vector.extract_strided_slice %3 {offsets = [0, 0, 0], sizes = [1, 15, 15], strides = [1, 1, 1]} : vector<17x15x15xf32> to vector<1x15x15xf32>
    %26 = vector.shape_cast %25 : vector<1x15x15xf32> to vector<15x15xf32>
    %cst_16 = arith.constant dense<0.000000e+00> : vector<15x15xf32>
    %27 = tpu.matmul %24, %26, %cst_16 {dimension_numbers = #tpu.dot_dimension_numbers<[1], [0], [0], [1], [0, 0, 1, 1], [], []>} : vector<15x15xf32>, vector<15x15xf32>, vector<15x15xf32> -> vector<15x15xf32>
    %28 = arith.addf %22, %27 : vector<15x15xf32>
    %29 = vector.extract_strided_slice %1 {offsets = [1, 1, 0, 0], sizes = [1, 1, 15, 15], strides = [1, 1, 1, 1]} : vector<2x2x15x15xf32> to vector<1x1x15x15xf32>
    %30 = vector.shape_cast %29 : vector<1x1x15x15xf32> to vector<15x15xf32>
    %31 = vector.extract_strided_slice %5 {offsets = [0, 0, 0], sizes = [1, 15, 15], strides = [1, 1, 1]} : vector<17x15x15xf32> to vector<1x15x15xf32>
    %32 = vector.shape_cast %31 : vector<1x15x15xf32> to vector<15x15xf32>
    %cst_17 = arith.constant dense<0.000000e+00> : vector<15x15xf32>
    %33 = tpu.matmul %30, %32, %cst_17 {dimension_numbers = #tpu.dot_dimension_numbers<[1], [0], [0], [1], [0, 0, 1, 1], [], []>} : vector<15x15xf32>, vector<15x15xf32>, vector<15x15xf32> -> vector<15x15xf32>
    %34 = arith.addf %28, %33 : vector<15x15xf32>
    %cst_18 = arith.constant dense<0.000000e+00> : vector<15x15xf32>
    %35 = tpu.matmul %34, %34, %cst_18 {dimension_numbers = #tpu.dot_dimension_numbers<[1], [1], [0], [0], [0, 0, 1, 0], [], []>} : vector<15x15xf32>, vector<15x15xf32>, vector<15x15xf32> -> vector<15x15xf32>
    %36 = arith.addf %21, %35 : vector<15x15xf32>
    %c0_19 = arith.constant 0 : index
    %c0_20 = arith.constant 0 : index
    %37 = vector.load %arg3[%c0_19, %c0_20] : memref<4x8xf32, #tpu.memory_space<vmem>>, vector<4x8xf32>
    %c0_21 = arith.constant 0 : index
    %c0_22 = arith.constant 0 : index
    %38 = vector.load %arg4[%c0_21, %c0_22] : memref<4x1xf32, #tpu.memory_space<vmem>>, vector<4x1xf32>
    %c0_23 = arith.constant 0 : index
    %c0_24 = arith.constant 0 : index
    %39 = vector.load %arg5[%c0_23, %c0_24] : memref<8x4xf32, #tpu.memory_space<vmem>>, vector<8x4xf32>
    %c0_25 = arith.constant 0 : index
    %c0_26 = arith.constant 0 : index
    %40 = vector.load %arg6[%c0_25, %c0_26] : memref<8x1xf32, #tpu.memory_space<vmem>>, vector<8x1xf32>
    %41 = vector.shape_cast %36 : vector<15x15xf32> to vector<1x15x15xf32>
    %42 = vector.shape_cast %41 : vector<1x15x15xf32> to vector<1x15x15xf32>
    %43 = vector.broadcast %42 : vector<1x15x15xf32> to vector<8x15x15xf32>
    %44 = vector.extract_strided_slice %3 {offsets = [1, 0, 0], sizes = [8, 15, 15], strides = [1, 1, 1]} : vector<17x15x15xf32> to vector<8x15x15xf32>
    %45 = vector.extract_strided_slice %3 {offsets = [9, 0, 0], sizes = [8, 15, 15], strides = [1, 1, 1]} : vector<17x15x15xf32> to vector<8x15x15xf32>
    "tpu.trace_start"() <{level = 10 : i32, message = "kij,kjw->kiw"}> : () -> ()
    %cst_27 = arith.constant dense<0.000000e+00> : vector<8x15x15xf32>
    %46 = tpu.matmul %43, %44, %cst_27 {dimension_numbers = #tpu.dot_dimension_numbers<[2], [1], [1], [2], [0, 0, 0, 1, 1, 2], [0], [0]>} : vector<8x15x15xf32>, vector<8x15x15xf32>, vector<8x15x15xf32> -> vector<8x15x15xf32>
    "tpu.trace_stop"() : () -> ()
    %47 = vector.broadcast %0 : f32 to vector<8x15x15xf32>
    %48 = arith.mulf %47, %46 : vector<8x15x15xf32>
    %49 = arith.addf %48, %45 : vector<8x15x15xf32>
    %cst_28 = arith.constant dense<0.000000e+00> : vector<8x15xf32>
    %50 = vector.multi_reduction <add>, %49, %cst_28 [2] : vector<8x15x15xf32> to vector<8x15xf32>
    %cst_29 = arith.constant 1.500000e+01 : f32
    %51 = vector.broadcast %cst_29 : f32 to vector<8x15xf32>
    %52 = arith.divf %50, %51 : vector<8x15xf32>
    %cst_30 = arith.constant dense<0.000000e+00> : vector<8xf32>
    %53 = vector.multi_reduction <add>, %52, %cst_30 [1] : vector<8x15xf32> to vector<8xf32>
    %54 = vector.shape_cast %53 : vector<8xf32> to vector<8x1xf32>
    %cst_31 = arith.constant 1.500000e+01 : f32
    %55 = vector.broadcast %cst_31 : f32 to vector<8x1xf32>
    %56 = arith.divf %54, %55 : vector<8x1xf32>
    %cst_32 = arith.constant dense<0.000000e+00> : vector<4x1xf32>
    %57 = tpu.matmul %37, %56, %cst_32 {dimension_numbers = #tpu.dot_dimension_numbers<[1], [0], [0], [1], [0, 0, 1, 1], [], []>} : vector<4x8xf32>, vector<8x1xf32>, vector<4x1xf32> -> vector<4x1xf32>
    %58 = arith.addf %57, %38 : vector<4x1xf32>
    %cst_33 = arith.constant 0.000000e+00 : f32
    %59 = vector.broadcast %cst_33 : f32 to vector<4x1xf32>
    %60 = arith.cmpf oge, %58, %59 : vector<4x1xf32>
    %cst_34 = arith.constant 1.000000e-01 : f32
    %61 = vector.broadcast %cst_34 : f32 to vector<4x1xf32>
    %62 = arith.mulf %61, %58 : vector<4x1xf32>
    %63 = arith.select %60, %58, %62 : vector<4x1xi1>, vector<4x1xf32>
    %cst_35 = arith.constant dense<0.000000e+00> : vector<8x1xf32>
    %64 = tpu.matmul %39, %63, %cst_35 {dimension_numbers = #tpu.dot_dimension_numbers<[1], [0], [0], [1], [0, 0, 1, 1], [], []>} : vector<8x4xf32>, vector<4x1xf32>, vector<8x1xf32> -> vector<8x1xf32>
    %65 = arith.addf %64, %40 : vector<8x1xf32>
    %66 = arith.negf %65 : vector<8x1xf32>
    %67 = math.exp %66 : vector<8x1xf32>
    %cst_36 = arith.constant 1.000000e+00 : f32
    %68 = vector.broadcast %cst_36 : f32 to vector<8x1xf32>
    %69 = arith.addf %68, %67 : vector<8x1xf32>
    %70 = arith.divf %68, %69 : vector<8x1xf32>
    %71 = vector.shape_cast %70 : vector<8x1xf32> to vector<8x1x1xf32>
    %72 = vector.broadcast %71 : vector<8x1x1xf32> to vector<8x15x15xf32>
    %73 = arith.mulf %49, %72 : vector<8x15x15xf32>
    %c0_37 = arith.constant 0 : index
    %c0_38 = arith.constant 0 : index
    %c0_39 = arith.constant 0 : index
    %c0_40 = arith.constant 0 : index
    %74 = vector.load %arg7[%c0_37, %c0_38, %c0_39, %c0_40] : memref<2x8x15x15xf32, #tpu.memory_space<vmem>>, vector<1x8x15x15xf32>
    %75 = vector.shape_cast %74 : vector<1x8x15x15xf32> to vector<8x15x15xf32>
    %76 = vector.shape_cast %73 : vector<8x15x15xf32> to vector<1x8x15x15xf32>
    tpu.vector_store %arg7[%c0_37, %c0_38, %c0_39, %c0_40], %76 {strides = array<i32>} : memref<2x8x15x15xf32, #tpu.memory_space<vmem>>, vector<1x8x15x15xf32>,
    %77 = vector.extract_strided_slice %5 {offsets = [1, 0, 0], sizes = [8, 15, 15], strides = [1, 1, 1]} : vector<17x15x15xf32> to vector<8x15x15xf32>
    %78 = vector.extract_strided_slice %5 {offsets = [9, 0, 0], sizes = [8, 15, 15], strides = [1, 1, 1]} : vector<17x15x15xf32> to vector<8x15x15xf32>
    "tpu.trace_start"() <{level = 10 : i32, message = "kij,kjw->kiw"}> : () -> ()
    %cst_41 = arith.constant dense<0.000000e+00> : vector<8x15x15xf32>
    %79 = tpu.matmul %43, %77, %cst_41 {dimension_numbers = #tpu.dot_dimension_numbers<[2], [1], [1], [2], [0, 0, 0, 1, 1, 2], [0], [0]>} : vector<8x15x15xf32>, vector<8x15x15xf32>, vector<8x15x15xf32> -> vector<8x15x15xf32>
    "tpu.trace_stop"() : () -> ()
    %80 = vector.broadcast %0 : f32 to vector<8x15x15xf32>
    %81 = arith.mulf %80, %79 : vector<8x15x15xf32>
    %82 = arith.addf %81, %78 : vector<8x15x15xf32>
    %cst_42 = arith.constant dense<0.000000e+00> : vector<8x15xf32>
    %83 = vector.multi_reduction <add>, %82, %cst_42 [2] : vector<8x15x15xf32> to vector<8x15xf32>
    %cst_43 = arith.constant 1.500000e+01 : f32
    %84 = vector.broadcast %cst_43 : f32 to vector<8x15xf32>
    %85 = arith.divf %83, %84 : vector<8x15xf32>
    %cst_44 = arith.constant dense<0.000000e+00> : vector<8xf32>
    %86 = vector.multi_reduction <add>, %85, %cst_44 [1] : vector<8x15xf32> to vector<8xf32>
    %87 = vector.shape_cast %86 : vector<8xf32> to vector<8x1xf32>
    %cst_45 = arith.constant 1.500000e+01 : f32
    %88 = vector.broadcast %cst_45 : f32 to vector<8x1xf32>
    %89 = arith.divf %87, %88 : vector<8x1xf32>
    %cst_46 = arith.constant dense<0.000000e+00> : vector<4x1xf32>
    %90 = tpu.matmul %37, %89, %cst_46 {dimension_numbers = #tpu.dot_dimension_numbers<[1], [0], [0], [1], [0, 0, 1, 1], [], []>} : vector<4x8xf32>, vector<8x1xf32>, vector<4x1xf32> -> vector<4x1xf32>
    %91 = arith.addf %90, %38 : vector<4x1xf32>
    %cst_47 = arith.constant 0.000000e+00 : f32
    %92 = vector.broadcast %cst_47 : f32 to vector<4x1xf32>
    %93 = arith.cmpf oge, %91, %92 : vector<4x1xf32>
    %cst_48 = arith.constant 1.000000e-01 : f32
    %94 = vector.broadcast %cst_48 : f32 to vector<4x1xf32>
    %95 = arith.mulf %94, %91 : vector<4x1xf32>
    %96 = arith.select %93, %91, %95 : vector<4x1xi1>, vector<4x1xf32>
    %cst_49 = arith.constant dense<0.000000e+00> : vector<8x1xf32>
    %97 = tpu.matmul %39, %96, %cst_49 {dimension_numbers = #tpu.dot_dimension_numbers<[1], [0], [0], [1], [0, 0, 1, 1], [], []>} : vector<8x4xf32>, vector<4x1xf32>, vector<8x1xf32> -> vector<8x1xf32>
    %98 = arith.addf %97, %40 : vector<8x1xf32>
    %99 = arith.negf %98 : vector<8x1xf32>
    %100 = math.exp %99 : vector<8x1xf32>
    %cst_50 = arith.constant 1.000000e+00 : f32
    %101 = vector.broadcast %cst_50 : f32 to vector<8x1xf32>
    %102 = arith.addf %101, %100 : vector<8x1xf32>
    %103 = arith.divf %101, %102 : vector<8x1xf32>
    %104 = vector.shape_cast %103 : vector<8x1xf32> to vector<8x1x1xf32>
    %105 = vector.broadcast %104 : vector<8x1x1xf32> to vector<8x15x15xf32>
    %106 = arith.mulf %82, %105 : vector<8x15x15xf32>
    %c1_51 = arith.constant 1 : index
    %c0_52 = arith.constant 0 : index
    %c0_53 = arith.constant 0 : index
    %c0_54 = arith.constant 0 : index
    %107 = vector.load %arg7[%c1_51, %c0_52, %c0_53, %c0_54] : memref<2x8x15x15xf32, #tpu.memory_space<vmem>>, vector<1x8x15x15xf32>
    %108 = vector.shape_cast %107 : vector<1x8x15x15xf32> to vector<8x15x15xf32>
    %109 = vector.shape_cast %106 : vector<8x15x15xf32> to vector<1x8x15x15xf32>
    tpu.vector_store %arg7[%c1_51, %c0_52, %c0_53, %c0_54], %109 {strides = array<i32>} : memref<2x8x15x15xf32, #tpu.memory_space<vmem>>, vector<1x8x15x15xf32>,
    return
  }
}

module attributes {stable_mosaic.version = 11 : i64} {
  func.func @_dw_tconv_mix_kernel(%arg0: i32, %arg1: memref<8x9xf32, #tpu.memory_space<smem>>, %arg2: memref<1x8x8x8xf32, #tpu.memory_space<vmem>>, %arg3: memref<17x8xf32, #tpu.memory_space<vmem>>, %arg4: memref<8x15xf32, #tpu.memory_space<vmem>>, %arg5: memref<7x15xf32, #tpu.memory_space<vmem>>, %arg6: memref<15x8xf32, #tpu.memory_space<vmem>>, %arg7: memref<15x7xf32, #tpu.memory_space<vmem>>, %arg8: memref<1x17x15x15xf32, #tpu.memory_space<vmem>>) attributes {dimension_semantics = [#tpu.dimension_semantics<parallel>], iteration_bounds = array<i64: 2>, scalar_prefetch = 0 : i64, scratch_operands = 0 : i64, tpu.core_type = #tpu.core_type<tc>, window_params = [{transform_indices = @transform_0, window_bounds = array<i64: 8, 9>}, {transform_indices = @transform_1, window_bounds = array<i64: 1, 8, 8, 8>}, {pipeline_mode = #tpu.pipeline_mode<synchronous>, transform_indices = @transform_2, window_bounds = array<i64: 17, 8>}, {pipeline_mode = #tpu.pipeline_mode<synchronous>, transform_indices = @transform_3, window_bounds = array<i64: 8, 15>}, {pipeline_mode = #tpu.pipeline_mode<synchronous>, transform_indices = @transform_4, window_bounds = array<i64: 7, 15>}, {pipeline_mode = #tpu.pipeline_mode<synchronous>, transform_indices = @transform_5, window_bounds = array<i64: 15, 8>}, {pipeline_mode = #tpu.pipeline_mode<synchronous>, transform_indices = @transform_6, window_bounds = array<i64: 15, 7>}, {transform_indices = @transform_7, window_bounds = array<i64: 1, 17, 15, 15>}]} {
    %c0 = arith.constant 0 : index
    %c0_0 = arith.constant 0 : index
    %0 = vector.load %arg4[%c0, %c0_0] : memref<8x15xf32, #tpu.memory_space<vmem>>, vector<8x15xf32>
    %c0_1 = arith.constant 0 : index
    %c0_2 = arith.constant 0 : index
    %1 = vector.load %arg5[%c0_1, %c0_2] : memref<7x15xf32, #tpu.memory_space<vmem>>, vector<7x15xf32>
    %c0_3 = arith.constant 0 : index
    %c0_4 = arith.constant 0 : index
    %2 = vector.load %arg6[%c0_3, %c0_4] : memref<15x8xf32, #tpu.memory_space<vmem>>, vector<15x8xf32>
    %c0_5 = arith.constant 0 : index
    %c0_6 = arith.constant 0 : index
    %3 = vector.load %arg7[%c0_5, %c0_6] : memref<15x7xf32, #tpu.memory_space<vmem>>, vector<15x7xf32>
    %c0_7 = arith.constant 0 : index
    %c0_8 = arith.constant 0 : index
    %4 = vector.load %arg3[%c0_7, %c0_8] : memref<17x8xf32, #tpu.memory_space<vmem>>, vector<17x8xf32>
    %c0_9 = arith.constant 0 : index
    %c0_10 = arith.constant 0 : index
    %c0_11 = arith.constant 0 : index
    %c0_12 = arith.constant 0 : index
    %5 = vector.load %arg2[%c0_9, %c0_10, %c0_11, %c0_12] : memref<1x8x8x8xf32, #tpu.memory_space<vmem>>, vector<1x8x8x8xf32>
    %6 = vector.shape_cast %5 : vector<1x8x8x8xf32> to vector<8x8x8xf32>
    %cst = arith.constant 0.000000e+00 : f32
    %7 = vector.broadcast %cst : f32 to vector<17x15x15xf32>
    %8 = vector.extract_strided_slice %6 {offsets = [0, 0, 0], sizes = [1, 8, 8], strides = [1, 1, 1]} : vector<8x8x8xf32> to vector<1x8x8xf32>
    %9 = vector.shape_cast %8 : vector<1x8x8xf32> to vector<8x8xf32>
    %c0_13 = arith.constant 0 : index
    %c0_14 = arith.constant 0 : index
    %10 = memref.load %arg1[%c0_13, %c0_14] : memref<8x9xf32, #tpu.memory_space<smem>>
    %c0_15 = arith.constant 0 : index
    %c1 = arith.constant 1 : index
    %11 = memref.load %arg1[%c0_15, %c1] : memref<8x9xf32, #tpu.memory_space<smem>>
    %c0_16 = arith.constant 0 : index
    %c2 = arith.constant 2 : index
    %12 = memref.load %arg1[%c0_16, %c2] : memref<8x9xf32, #tpu.memory_space<smem>>
    %c0_17 = arith.constant 0 : index
    %c3 = arith.constant 3 : index
    %13 = memref.load %arg1[%c0_17, %c3] : memref<8x9xf32, #tpu.memory_space<smem>>
    %c0_18 = arith.constant 0 : index
    %c4 = arith.constant 4 : index
    %14 = memref.load %arg1[%c0_18, %c4] : memref<8x9xf32, #tpu.memory_space<smem>>
    %c0_19 = arith.constant 0 : index
    %c5 = arith.constant 5 : index
    %15 = memref.load %arg1[%c0_19, %c5] : memref<8x9xf32, #tpu.memory_space<smem>>
    %c0_20 = arith.constant 0 : index
    %c6 = arith.constant 6 : index
    %16 = memref.load %arg1[%c0_20, %c6] : memref<8x9xf32, #tpu.memory_space<smem>>
    %c0_21 = arith.constant 0 : index
    %c7 = arith.constant 7 : index
    %17 = memref.load %arg1[%c0_21, %c7] : memref<8x9xf32, #tpu.memory_space<smem>>
    %c0_22 = arith.constant 0 : index
    %c8 = arith.constant 8 : index
    %18 = memref.load %arg1[%c0_22, %c8] : memref<8x9xf32, #tpu.memory_space<smem>>
    %19 = vector.broadcast %14 : f32 to vector<8x8xf32>
    %20 = arith.mulf %9, %19 : vector<8x8xf32>
    %21 = vector.extract_strided_slice %9 {offsets = [0, 1], sizes = [8, 7], strides = [1, 1]} : vector<8x8xf32> to vector<8x7xf32>
    %22 = vector.broadcast %13 : f32 to vector<8x7xf32>
    %23 = arith.mulf %21, %22 : vector<8x7xf32>
    %24 = vector.extract_strided_slice %9 {offsets = [0, 0], sizes = [8, 7], strides = [1, 1]} : vector<8x8xf32> to vector<8x7xf32>
    %25 = vector.broadcast %15 : f32 to vector<8x7xf32>
    %26 = arith.mulf %24, %25 : vector<8x7xf32>
    %27 = arith.addf %23, %26 : vector<8x7xf32>
    %28 = vector.extract_strided_slice %9 {offsets = [1, 0], sizes = [7, 8], strides = [1, 1]} : vector<8x8xf32> to vector<7x8xf32>
    %29 = vector.broadcast %11 : f32 to vector<7x8xf32>
    %30 = arith.mulf %28, %29 : vector<7x8xf32>
    %31 = vector.extract_strided_slice %9 {offsets = [0, 0], sizes = [7, 8], strides = [1, 1]} : vector<8x8xf32> to vector<7x8xf32>
    %32 = vector.broadcast %17 : f32 to vector<7x8xf32>
    %33 = arith.mulf %31, %32 : vector<7x8xf32>
    %34 = arith.addf %30, %33 : vector<7x8xf32>
    %35 = vector.extract_strided_slice %9 {offsets = [1, 1], sizes = [7, 7], strides = [1, 1]} : vector<8x8xf32> to vector<7x7xf32>
    %36 = vector.broadcast %10 : f32 to vector<7x7xf32>
    %37 = arith.mulf %35, %36 : vector<7x7xf32>
    %38 = vector.extract_strided_slice %9 {offsets = [1, 0], sizes = [7, 7], strides = [1, 1]} : vector<8x8xf32> to vector<7x7xf32>
    %39 = vector.broadcast %12 : f32 to vector<7x7xf32>
    %40 = arith.mulf %38, %39 : vector<7x7xf32>
    %41 = arith.addf %37, %40 : vector<7x7xf32>
    %42 = vector.extract_strided_slice %9 {offsets = [0, 1], sizes = [7, 7], strides = [1, 1]} : vector<8x8xf32> to vector<7x7xf32>
    %43 = vector.broadcast %16 : f32 to vector<7x7xf32>
    %44 = arith.mulf %42, %43 : vector<7x7xf32>
    %45 = arith.addf %41, %44 : vector<7x7xf32>
    %46 = vector.extract_strided_slice %9 {offsets = [0, 0], sizes = [7, 7], strides = [1, 1]} : vector<8x8xf32> to vector<7x7xf32>
    %47 = vector.broadcast %18 : f32 to vector<7x7xf32>
    %48 = arith.mulf %46, %47 : vector<7x7xf32>
    %49 = arith.addf %45, %48 : vector<7x7xf32>
    %cst_23 = arith.constant dense<0.000000e+00> : vector<8x15xf32>
    %50 = tpu.matmul %20, %0, %cst_23 {dimension_numbers = #tpu.dot_dimension_numbers<[1], [0], [0], [1], [0, 0, 1, 1], [], []>} : vector<8x8xf32>, vector<8x15xf32>, vector<8x15xf32> -> vector<8x15xf32>
    %cst_24 = arith.constant dense<0.000000e+00> : vector<8x15xf32>
    %51 = tpu.matmul %27, %1, %cst_24 {dimension_numbers = #tpu.dot_dimension_numbers<[1], [0], [0], [1], [0, 0, 1, 1], [], []>} : vector<8x7xf32>, vector<7x15xf32>, vector<8x15xf32> -> vector<8x15xf32>
    %52 = arith.addf %50, %51 : vector<8x15xf32>
    %cst_25 = arith.constant dense<0.000000e+00> : vector<7x15xf32>
    %53 = tpu.matmul %34, %0, %cst_25 {dimension_numbers = #tpu.dot_dimension_numbers<[1], [0], [0], [1], [0, 0, 1, 1], [], []>} : vector<7x8xf32>, vector<8x15xf32>, vector<7x15xf32> -> vector<7x15xf32>
    %cst_26 = arith.constant dense<0.000000e+00> : vector<7x15xf32>
    %54 = tpu.matmul %49, %1, %cst_26 {dimension_numbers = #tpu.dot_dimension_numbers<[1], [0], [0], [1], [0, 0, 1, 1], [], []>} : vector<7x7xf32>, vector<7x15xf32>, vector<7x15xf32> -> vector<7x15xf32>
    %55 = arith.addf %53, %54 : vector<7x15xf32>
    %cst_27 = arith.constant dense<0.000000e+00> : vector<15x15xf32>
    %56 = tpu.matmul %2, %52, %cst_27 {dimension_numbers = #tpu.dot_dimension_numbers<[1], [0], [0], [1], [0, 0, 1, 1], [], []>} : vector<15x8xf32>, vector<8x15xf32>, vector<15x15xf32> -> vector<15x15xf32>
    %cst_28 = arith.constant dense<0.000000e+00> : vector<15x15xf32>
    %57 = tpu.matmul %3, %55, %cst_28 {dimension_numbers = #tpu.dot_dimension_numbers<[1], [0], [0], [1], [0, 0, 1, 1], [], []>} : vector<15x7xf32>, vector<7x15xf32>, vector<15x15xf32> -> vector<15x15xf32>
    %58 = arith.addf %56, %57 : vector<15x15xf32>
    %59 = vector.extract_strided_slice %4 {offsets = [0, 0], sizes = [17, 1], strides = [1, 1]} : vector<17x8xf32> to vector<17x1xf32>
    %60 = vector.shape_cast %59 : vector<17x1xf32> to vector<17x1x1xf32>
    %61 = vector.shape_cast %58 : vector<15x15xf32> to vector<1x15x15xf32>
    %62 = vector.broadcast %60 : vector<17x1x1xf32> to vector<17x15x15xf32>
    %63 = vector.broadcast %61 : vector<1x15x15xf32> to vector<17x15x15xf32>
    %64 = arith.mulf %62, %63 : vector<17x15x15xf32>
    %65 = arith.addf %7, %64 : vector<17x15x15xf32>
    %66 = vector.extract_strided_slice %6 {offsets = [1, 0, 0], sizes = [1, 8, 8], strides = [1, 1, 1]} : vector<8x8x8xf32> to vector<1x8x8xf32>
    %67 = vector.shape_cast %66 : vector<1x8x8xf32> to vector<8x8xf32>
    %c1_29 = arith.constant 1 : index
    %c0_30 = arith.constant 0 : index
    %68 = memref.load %arg1[%c1_29, %c0_30] : memref<8x9xf32, #tpu.memory_space<smem>>
    %c1_31 = arith.constant 1 : index
    %c1_32 = arith.constant 1 : index
    %69 = memref.load %arg1[%c1_31, %c1_32] : memref<8x9xf32, #tpu.memory_space<smem>>
    %c1_33 = arith.constant 1 : index
    %c2_34 = arith.constant 2 : index
    %70 = memref.load %arg1[%c1_33, %c2_34] : memref<8x9xf32, #tpu.memory_space<smem>>
    %c1_35 = arith.constant 1 : index
    %c3_36 = arith.constant 3 : index
    %71 = memref.load %arg1[%c1_35, %c3_36] : memref<8x9xf32, #tpu.memory_space<smem>>
    %c1_37 = arith.constant 1 : index
    %c4_38 = arith.constant 4 : index
    %72 = memref.load %arg1[%c1_37, %c4_38] : memref<8x9xf32, #tpu.memory_space<smem>>
    %c1_39 = arith.constant 1 : index
    %c5_40 = arith.constant 5 : index
    %73 = memref.load %arg1[%c1_39, %c5_40] : memref<8x9xf32, #tpu.memory_space<smem>>
    %c1_41 = arith.constant 1 : index
    %c6_42 = arith.constant 6 : index
    %74 = memref.load %arg1[%c1_41, %c6_42] : memref<8x9xf32, #tpu.memory_space<smem>>
    %c1_43 = arith.constant 1 : index
    %c7_44 = arith.constant 7 : index
    %75 = memref.load %arg1[%c1_43, %c7_44] : memref<8x9xf32, #tpu.memory_space<smem>>
    %c1_45 = arith.constant 1 : index
    %c8_46 = arith.constant 8 : index
    %76 = memref.load %arg1[%c1_45, %c8_46] : memref<8x9xf32, #tpu.memory_space<smem>>
    %77 = vector.broadcast %72 : f32 to vector<8x8xf32>
    %78 = arith.mulf %67, %77 : vector<8x8xf32>
    %79 = vector.extract_strided_slice %67 {offsets = [0, 1], sizes = [8, 7], strides = [1, 1]} : vector<8x8xf32> to vector<8x7xf32>
    %80 = vector.broadcast %71 : f32 to vector<8x7xf32>
    %81 = arith.mulf %79, %80 : vector<8x7xf32>
    %82 = vector.extract_strided_slice %67 {offsets = [0, 0], sizes = [8, 7], strides = [1, 1]} : vector<8x8xf32> to vector<8x7xf32>
    %83 = vector.broadcast %73 : f32 to vector<8x7xf32>
    %84 = arith.mulf %82, %83 : vector<8x7xf32>
    %85 = arith.addf %81, %84 : vector<8x7xf32>
    %86 = vector.extract_strided_slice %67 {offsets = [1, 0], sizes = [7, 8], strides = [1, 1]} : vector<8x8xf32> to vector<7x8xf32>
    %87 = vector.broadcast %69 : f32 to vector<7x8xf32>
    %88 = arith.mulf %86, %87 : vector<7x8xf32>
    %89 = vector.extract_strided_slice %67 {offsets = [0, 0], sizes = [7, 8], strides = [1, 1]} : vector<8x8xf32> to vector<7x8xf32>
    %90 = vector.broadcast %75 : f32 to vector<7x8xf32>
    %91 = arith.mulf %89, %90 : vector<7x8xf32>
    %92 = arith.addf %88, %91 : vector<7x8xf32>
    %93 = vector.extract_strided_slice %67 {offsets = [1, 1], sizes = [7, 7], strides = [1, 1]} : vector<8x8xf32> to vector<7x7xf32>
    %94 = vector.broadcast %68 : f32 to vector<7x7xf32>
    %95 = arith.mulf %93, %94 : vector<7x7xf32>
    %96 = vector.extract_strided_slice %67 {offsets = [1, 0], sizes = [7, 7], strides = [1, 1]} : vector<8x8xf32> to vector<7x7xf32>
    %97 = vector.broadcast %70 : f32 to vector<7x7xf32>
    %98 = arith.mulf %96, %97 : vector<7x7xf32>
    %99 = arith.addf %95, %98 : vector<7x7xf32>
    %100 = vector.extract_strided_slice %67 {offsets = [0, 1], sizes = [7, 7], strides = [1, 1]} : vector<8x8xf32> to vector<7x7xf32>
    %101 = vector.broadcast %74 : f32 to vector<7x7xf32>
    %102 = arith.mulf %100, %101 : vector<7x7xf32>
    %103 = arith.addf %99, %102 : vector<7x7xf32>
    %104 = vector.extract_strided_slice %67 {offsets = [0, 0], sizes = [7, 7], strides = [1, 1]} : vector<8x8xf32> to vector<7x7xf32>
    %105 = vector.broadcast %76 : f32 to vector<7x7xf32>
    %106 = arith.mulf %104, %105 : vector<7x7xf32>
    %107 = arith.addf %103, %106 : vector<7x7xf32>
    %cst_47 = arith.constant dense<0.000000e+00> : vector<8x15xf32>
    %108 = tpu.matmul %78, %0, %cst_47 {dimension_numbers = #tpu.dot_dimension_numbers<[1], [0], [0], [1], [0, 0, 1, 1], [], []>} : vector<8x8xf32>, vector<8x15xf32>, vector<8x15xf32> -> vector<8x15xf32>
    %cst_48 = arith.constant dense<0.000000e+00> : vector<8x15xf32>
    %109 = tpu.matmul %85, %1, %cst_48 {dimension_numbers = #tpu.dot_dimension_numbers<[1], [0], [0], [1], [0, 0, 1, 1], [], []>} : vector<8x7xf32>, vector<7x15xf32>, vector<8x15xf32> -> vector<8x15xf32>
    %110 = arith.addf %108, %109 : vector<8x15xf32>
    %cst_49 = arith.constant dense<0.000000e+00> : vector<7x15xf32>
    %111 = tpu.matmul %92, %0, %cst_49 {dimension_numbers = #tpu.dot_dimension_numbers<[1], [0], [0], [1], [0, 0, 1, 1], [], []>} : vector<7x8xf32>, vector<8x15xf32>, vector<7x15xf32> -> vector<7x15xf32>
    %cst_50 = arith.constant dense<0.000000e+00> : vector<7x15xf32>
    %112 = tpu.matmul %107, %1, %cst_50 {dimension_numbers = #tpu.dot_dimension_numbers<[1], [0], [0], [1], [0, 0, 1, 1], [], []>} : vector<7x7xf32>, vector<7x15xf32>, vector<7x15xf32> -> vector<7x15xf32>
    %113 = arith.addf %111, %112 : vector<7x15xf32>
    %cst_51 = arith.constant dense<0.000000e+00> : vector<15x15xf32>
    %114 = tpu.matmul %2, %110, %cst_51 {dimension_numbers = #tpu.dot_dimension_numbers<[1], [0], [0], [1], [0, 0, 1, 1], [], []>} : vector<15x8xf32>, vector<8x15xf32>, vector<15x15xf32> -> vector<15x15xf32>
    %cst_52 = arith.constant dense<0.000000e+00> : vector<15x15xf32>
    %115 = tpu.matmul %3, %113, %cst_52 {dimension_numbers = #tpu.dot_dimension_numbers<[1], [0], [0], [1], [0, 0, 1, 1], [], []>} : vector<15x7xf32>, vector<7x15xf32>, vector<15x15xf32> -> vector<15x15xf32>
    %116 = arith.addf %114, %115 : vector<15x15xf32>
    %117 = vector.extract_strided_slice %4 {offsets = [0, 1], sizes = [17, 1], strides = [1, 1]} : vector<17x8xf32> to vector<17x1xf32>
    %118 = vector.shape_cast %117 : vector<17x1xf32> to vector<17x1x1xf32>
    %119 = vector.shape_cast %116 : vector<15x15xf32> to vector<1x15x15xf32>
    %120 = vector.broadcast %118 : vector<17x1x1xf32> to vector<17x15x15xf32>
    %121 = vector.broadcast %119 : vector<1x15x15xf32> to vector<17x15x15xf32>
    %122 = arith.mulf %120, %121 : vector<17x15x15xf32>
    %123 = arith.addf %65, %122 : vector<17x15x15xf32>
    %124 = vector.extract_strided_slice %6 {offsets = [2, 0, 0], sizes = [1, 8, 8], strides = [1, 1, 1]} : vector<8x8x8xf32> to vector<1x8x8xf32>
    %125 = vector.shape_cast %124 : vector<1x8x8xf32> to vector<8x8xf32>
    %c2_53 = arith.constant 2 : index
    %c0_54 = arith.constant 0 : index
    %126 = memref.load %arg1[%c2_53, %c0_54] : memref<8x9xf32, #tpu.memory_space<smem>>
    %c2_55 = arith.constant 2 : index
    %c1_56 = arith.constant 1 : index
    %127 = memref.load %arg1[%c2_55, %c1_56] : memref<8x9xf32, #tpu.memory_space<smem>>
    %c2_57 = arith.constant 2 : index
    %c2_58 = arith.constant 2 : index
    %128 = memref.load %arg1[%c2_57, %c2_58] : memref<8x9xf32, #tpu.memory_space<smem>>
    %c2_59 = arith.constant 2 : index
    %c3_60 = arith.constant 3 : index
    %129 = memref.load %arg1[%c2_59, %c3_60] : memref<8x9xf32, #tpu.memory_space<smem>>
    %c2_61 = arith.constant 2 : index
    %c4_62 = arith.constant 4 : index
    %130 = memref.load %arg1[%c2_61, %c4_62] : memref<8x9xf32, #tpu.memory_space<smem>>
    %c2_63 = arith.constant 2 : index
    %c5_64 = arith.constant 5 : index
    %131 = memref.load %arg1[%c2_63, %c5_64] : memref<8x9xf32, #tpu.memory_space<smem>>
    %c2_65 = arith.constant 2 : index
    %c6_66 = arith.constant 6 : index
    %132 = memref.load %arg1[%c2_65, %c6_66] : memref<8x9xf32, #tpu.memory_space<smem>>
    %c2_67 = arith.constant 2 : index
    %c7_68 = arith.constant 7 : index
    %133 = memref.load %arg1[%c2_67, %c7_68] : memref<8x9xf32, #tpu.memory_space<smem>>
    %c2_69 = arith.constant 2 : index
    %c8_70 = arith.constant 8 : index
    %134 = memref.load %arg1[%c2_69, %c8_70] : memref<8x9xf32, #tpu.memory_space<smem>>
    %135 = vector.broadcast %130 : f32 to vector<8x8xf32>
    %136 = arith.mulf %125, %135 : vector<8x8xf32>
    %137 = vector.extract_strided_slice %125 {offsets = [0, 1], sizes = [8, 7], strides = [1, 1]} : vector<8x8xf32> to vector<8x7xf32>
    %138 = vector.broadcast %129 : f32 to vector<8x7xf32>
    %139 = arith.mulf %137, %138 : vector<8x7xf32>
    %140 = vector.extract_strided_slice %125 {offsets = [0, 0], sizes = [8, 7], strides = [1, 1]} : vector<8x8xf32> to vector<8x7xf32>
    %141 = vector.broadcast %131 : f32 to vector<8x7xf32>
    %142 = arith.mulf %140, %141 : vector<8x7xf32>
    %143 = arith.addf %139, %142 : vector<8x7xf32>
    %144 = vector.extract_strided_slice %125 {offsets = [1, 0], sizes = [7, 8], strides = [1, 1]} : vector<8x8xf32> to vector<7x8xf32>
    %145 = vector.broadcast %127 : f32 to vector<7x8xf32>
    %146 = arith.mulf %144, %145 : vector<7x8xf32>
    %147 = vector.extract_strided_slice %125 {offsets = [0, 0], sizes = [7, 8], strides = [1, 1]} : vector<8x8xf32> to vector<7x8xf32>
    %148 = vector.broadcast %133 : f32 to vector<7x8xf32>
    %149 = arith.mulf %147, %148 : vector<7x8xf32>
    %150 = arith.addf %146, %149 : vector<7x8xf32>
    %151 = vector.extract_strided_slice %125 {offsets = [1, 1], sizes = [7, 7], strides = [1, 1]} : vector<8x8xf32> to vector<7x7xf32>
    %152 = vector.broadcast %126 : f32 to vector<7x7xf32>
    %153 = arith.mulf %151, %152 : vector<7x7xf32>
    %154 = vector.extract_strided_slice %125 {offsets = [1, 0], sizes = [7, 7], strides = [1, 1]} : vector<8x8xf32> to vector<7x7xf32>
    %155 = vector.broadcast %128 : f32 to vector<7x7xf32>
    %156 = arith.mulf %154, %155 : vector<7x7xf32>
    %157 = arith.addf %153, %156 : vector<7x7xf32>
    %158 = vector.extract_strided_slice %125 {offsets = [0, 1], sizes = [7, 7], strides = [1, 1]} : vector<8x8xf32> to vector<7x7xf32>
    %159 = vector.broadcast %132 : f32 to vector<7x7xf32>
    %160 = arith.mulf %158, %159 : vector<7x7xf32>
    %161 = arith.addf %157, %160 : vector<7x7xf32>
    %162 = vector.extract_strided_slice %125 {offsets = [0, 0], sizes = [7, 7], strides = [1, 1]} : vector<8x8xf32> to vector<7x7xf32>
    %163 = vector.broadcast %134 : f32 to vector<7x7xf32>
    %164 = arith.mulf %162, %163 : vector<7x7xf32>
    %165 = arith.addf %161, %164 : vector<7x7xf32>
    %cst_71 = arith.constant dense<0.000000e+00> : vector<8x15xf32>
    %166 = tpu.matmul %136, %0, %cst_71 {dimension_numbers = #tpu.dot_dimension_numbers<[1], [0], [0], [1], [0, 0, 1, 1], [], []>} : vector<8x8xf32>, vector<8x15xf32>, vector<8x15xf32> -> vector<8x15xf32>
    %cst_72 = arith.constant dense<0.000000e+00> : vector<8x15xf32>
    %167 = tpu.matmul %143, %1, %cst_72 {dimension_numbers = #tpu.dot_dimension_numbers<[1], [0], [0], [1], [0, 0, 1, 1], [], []>} : vector<8x7xf32>, vector<7x15xf32>, vector<8x15xf32> -> vector<8x15xf32>
    %168 = arith.addf %166, %167 : vector<8x15xf32>
    %cst_73 = arith.constant dense<0.000000e+00> : vector<7x15xf32>
    %169 = tpu.matmul %150, %0, %cst_73 {dimension_numbers = #tpu.dot_dimension_numbers<[1], [0], [0], [1], [0, 0, 1, 1], [], []>} : vector<7x8xf32>, vector<8x15xf32>, vector<7x15xf32> -> vector<7x15xf32>
    %cst_74 = arith.constant dense<0.000000e+00> : vector<7x15xf32>
    %170 = tpu.matmul %165, %1, %cst_74 {dimension_numbers = #tpu.dot_dimension_numbers<[1], [0], [0], [1], [0, 0, 1, 1], [], []>} : vector<7x7xf32>, vector<7x15xf32>, vector<7x15xf32> -> vector<7x15xf32>
    %171 = arith.addf %169, %170 : vector<7x15xf32>
    %cst_75 = arith.constant dense<0.000000e+00> : vector<15x15xf32>
    %172 = tpu.matmul %2, %168, %cst_75 {dimension_numbers = #tpu.dot_dimension_numbers<[1], [0], [0], [1], [0, 0, 1, 1], [], []>} : vector<15x8xf32>, vector<8x15xf32>, vector<15x15xf32> -> vector<15x15xf32>
    %cst_76 = arith.constant dense<0.000000e+00> : vector<15x15xf32>
    %173 = tpu.matmul %3, %171, %cst_76 {dimension_numbers = #tpu.dot_dimension_numbers<[1], [0], [0], [1], [0, 0, 1, 1], [], []>} : vector<15x7xf32>, vector<7x15xf32>, vector<15x15xf32> -> vector<15x15xf32>
    %174 = arith.addf %172, %173 : vector<15x15xf32>
    %175 = vector.extract_strided_slice %4 {offsets = [0, 2], sizes = [17, 1], strides = [1, 1]} : vector<17x8xf32> to vector<17x1xf32>
    %176 = vector.shape_cast %175 : vector<17x1xf32> to vector<17x1x1xf32>
    %177 = vector.shape_cast %174 : vector<15x15xf32> to vector<1x15x15xf32>
    %178 = vector.broadcast %176 : vector<17x1x1xf32> to vector<17x15x15xf32>
    %179 = vector.broadcast %177 : vector<1x15x15xf32> to vector<17x15x15xf32>
    %180 = arith.mulf %178, %179 : vector<17x15x15xf32>
    %181 = arith.addf %123, %180 : vector<17x15x15xf32>
    %182 = vector.extract_strided_slice %6 {offsets = [3, 0, 0], sizes = [1, 8, 8], strides = [1, 1, 1]} : vector<8x8x8xf32> to vector<1x8x8xf32>
    %183 = vector.shape_cast %182 : vector<1x8x8xf32> to vector<8x8xf32>
    %c3_77 = arith.constant 3 : index
    %c0_78 = arith.constant 0 : index
    %184 = memref.load %arg1[%c3_77, %c0_78] : memref<8x9xf32, #tpu.memory_space<smem>>
    %c3_79 = arith.constant 3 : index
    %c1_80 = arith.constant 1 : index
    %185 = memref.load %arg1[%c3_79, %c1_80] : memref<8x9xf32, #tpu.memory_space<smem>>
    %c3_81 = arith.constant 3 : index
    %c2_82 = arith.constant 2 : index
    %186 = memref.load %arg1[%c3_81, %c2_82] : memref<8x9xf32, #tpu.memory_space<smem>>
    %c3_83 = arith.constant 3 : index
    %c3_84 = arith.constant 3 : index
    %187 = memref.load %arg1[%c3_83, %c3_84] : memref<8x9xf32, #tpu.memory_space<smem>>
    %c3_85 = arith.constant 3 : index
    %c4_86 = arith.constant 4 : index
    %188 = memref.load %arg1[%c3_85, %c4_86] : memref<8x9xf32, #tpu.memory_space<smem>>
    %c3_87 = arith.constant 3 : index
    %c5_88 = arith.constant 5 : index
    %189 = memref.load %arg1[%c3_87, %c5_88] : memref<8x9xf32, #tpu.memory_space<smem>>
    %c3_89 = arith.constant 3 : index
    %c6_90 = arith.constant 6 : index
    %190 = memref.load %arg1[%c3_89, %c6_90] : memref<8x9xf32, #tpu.memory_space<smem>>
    %c3_91 = arith.constant 3 : index
    %c7_92 = arith.constant 7 : index
    %191 = memref.load %arg1[%c3_91, %c7_92] : memref<8x9xf32, #tpu.memory_space<smem>>
    %c3_93 = arith.constant 3 : index
    %c8_94 = arith.constant 8 : index
    %192 = memref.load %arg1[%c3_93, %c8_94] : memref<8x9xf32, #tpu.memory_space<smem>>
    %193 = vector.broadcast %188 : f32 to vector<8x8xf32>
    %194 = arith.mulf %183, %193 : vector<8x8xf32>
    %195 = vector.extract_strided_slice %183 {offsets = [0, 1], sizes = [8, 7], strides = [1, 1]} : vector<8x8xf32> to vector<8x7xf32>
    %196 = vector.broadcast %187 : f32 to vector<8x7xf32>
    %197 = arith.mulf %195, %196 : vector<8x7xf32>
    %198 = vector.extract_strided_slice %183 {offsets = [0, 0], sizes = [8, 7], strides = [1, 1]} : vector<8x8xf32> to vector<8x7xf32>
    %199 = vector.broadcast %189 : f32 to vector<8x7xf32>
    %200 = arith.mulf %198, %199 : vector<8x7xf32>
    %201 = arith.addf %197, %200 : vector<8x7xf32>
    %202 = vector.extract_strided_slice %183 {offsets = [1, 0], sizes = [7, 8], strides = [1, 1]} : vector<8x8xf32> to vector<7x8xf32>
    %203 = vector.broadcast %185 : f32 to vector<7x8xf32>
    %204 = arith.mulf %202, %203 : vector<7x8xf32>
    %205 = vector.extract_strided_slice %183 {offsets = [0, 0], sizes = [7, 8], strides = [1, 1]} : vector<8x8xf32> to vector<7x8xf32>
    %206 = vector.broadcast %191 : f32 to vector<7x8xf32>
    %207 = arith.mulf %205, %206 : vector<7x8xf32>
    %208 = arith.addf %204, %207 : vector<7x8xf32>
    %209 = vector.extract_strided_slice %183 {offsets = [1, 1], sizes = [7, 7], strides = [1, 1]} : vector<8x8xf32> to vector<7x7xf32>
    %210 = vector.broadcast %184 : f32 to vector<7x7xf32>
    %211 = arith.mulf %209, %210 : vector<7x7xf32>
    %212 = vector.extract_strided_slice %183 {offsets = [1, 0], sizes = [7, 7], strides = [1, 1]} : vector<8x8xf32> to vector<7x7xf32>
    %213 = vector.broadcast %186 : f32 to vector<7x7xf32>
    %214 = arith.mulf %212, %213 : vector<7x7xf32>
    %215 = arith.addf %211, %214 : vector<7x7xf32>
    %216 = vector.extract_strided_slice %183 {offsets = [0, 1], sizes = [7, 7], strides = [1, 1]} : vector<8x8xf32> to vector<7x7xf32>
    %217 = vector.broadcast %190 : f32 to vector<7x7xf32>
    %218 = arith.mulf %216, %217 : vector<7x7xf32>
    %219 = arith.addf %215, %218 : vector<7x7xf32>
    %220 = vector.extract_strided_slice %183 {offsets = [0, 0], sizes = [7, 7], strides = [1, 1]} : vector<8x8xf32> to vector<7x7xf32>
    %221 = vector.broadcast %192 : f32 to vector<7x7xf32>
    %222 = arith.mulf %220, %221 : vector<7x7xf32>
    %223 = arith.addf %219, %222 : vector<7x7xf32>
    %cst_95 = arith.constant dense<0.000000e+00> : vector<8x15xf32>
    %224 = tpu.matmul %194, %0, %cst_95 {dimension_numbers = #tpu.dot_dimension_numbers<[1], [0], [0], [1], [0, 0, 1, 1], [], []>} : vector<8x8xf32>, vector<8x15xf32>, vector<8x15xf32> -> vector<8x15xf32>
    %cst_96 = arith.constant dense<0.000000e+00> : vector<8x15xf32>
    %225 = tpu.matmul %201, %1, %cst_96 {dimension_numbers = #tpu.dot_dimension_numbers<[1], [0], [0], [1], [0, 0, 1, 1], [], []>} : vector<8x7xf32>, vector<7x15xf32>, vector<8x15xf32> -> vector<8x15xf32>
    %226 = arith.addf %224, %225 : vector<8x15xf32>
    %cst_97 = arith.constant dense<0.000000e+00> : vector<7x15xf32>
    %227 = tpu.matmul %208, %0, %cst_97 {dimension_numbers = #tpu.dot_dimension_numbers<[1], [0], [0], [1], [0, 0, 1, 1], [], []>} : vector<7x8xf32>, vector<8x15xf32>, vector<7x15xf32> -> vector<7x15xf32>
    %cst_98 = arith.constant dense<0.000000e+00> : vector<7x15xf32>
    %228 = tpu.matmul %223, %1, %cst_98 {dimension_numbers = #tpu.dot_dimension_numbers<[1], [0], [0], [1], [0, 0, 1, 1], [], []>} : vector<7x7xf32>, vector<7x15xf32>, vector<7x15xf32> -> vector<7x15xf32>
    %229 = arith.addf %227, %228 : vector<7x15xf32>
    %cst_99 = arith.constant dense<0.000000e+00> : vector<15x15xf32>
    %230 = tpu.matmul %2, %226, %cst_99 {dimension_numbers = #tpu.dot_dimension_numbers<[1], [0], [0], [1], [0, 0, 1, 1], [], []>} : vector<15x8xf32>, vector<8x15xf32>, vector<15x15xf32> -> vector<15x15xf32>
    %cst_100 = arith.constant dense<0.000000e+00> : vector<15x15xf32>
    %231 = tpu.matmul %3, %229, %cst_100 {dimension_numbers = #tpu.dot_dimension_numbers<[1], [0], [0], [1], [0, 0, 1, 1], [], []>} : vector<15x7xf32>, vector<7x15xf32>, vector<15x15xf32> -> vector<15x15xf32>
    %232 = arith.addf %230, %231 : vector<15x15xf32>
    %233 = vector.extract_strided_slice %4 {offsets = [0, 3], sizes = [17, 1], strides = [1, 1]} : vector<17x8xf32> to vector<17x1xf32>
    %234 = vector.shape_cast %233 : vector<17x1xf32> to vector<17x1x1xf32>
    %235 = vector.shape_cast %232 : vector<15x15xf32> to vector<1x15x15xf32>
    %236 = vector.broadcast %234 : vector<17x1x1xf32> to vector<17x15x15xf32>
    %237 = vector.broadcast %235 : vector<1x15x15xf32> to vector<17x15x15xf32>
    %238 = arith.mulf %236, %237 : vector<17x15x15xf32>
    %239 = arith.addf %181, %238 : vector<17x15x15xf32>
    %240 = vector.extract_strided_slice %6 {offsets = [4, 0, 0], sizes = [1, 8, 8], strides = [1, 1, 1]} : vector<8x8x8xf32> to vector<1x8x8xf32>
    %241 = vector.shape_cast %240 : vector<1x8x8xf32> to vector<8x8xf32>
    %c4_101 = arith.constant 4 : index
    %c0_102 = arith.constant 0 : index
    %242 = memref.load %arg1[%c4_101, %c0_102] : memref<8x9xf32, #tpu.memory_space<smem>>
    %c4_103 = arith.constant 4 : index
    %c1_104 = arith.constant 1 : index
    %243 = memref.load %arg1[%c4_103, %c1_104] : memref<8x9xf32, #tpu.memory_space<smem>>
    %c4_105 = arith.constant 4 : index
    %c2_106 = arith.constant 2 : index
    %244 = memref.load %arg1[%c4_105, %c2_106] : memref<8x9xf32, #tpu.memory_space<smem>>
    %c4_107 = arith.constant 4 : index
    %c3_108 = arith.constant 3 : index
    %245 = memref.load %arg1[%c4_107, %c3_108] : memref<8x9xf32, #tpu.memory_space<smem>>
    %c4_109 = arith.constant 4 : index
    %c4_110 = arith.constant 4 : index
    %246 = memref.load %arg1[%c4_109, %c4_110] : memref<8x9xf32, #tpu.memory_space<smem>>
    %c4_111 = arith.constant 4 : index
    %c5_112 = arith.constant 5 : index
    %247 = memref.load %arg1[%c4_111, %c5_112] : memref<8x9xf32, #tpu.memory_space<smem>>
    %c4_113 = arith.constant 4 : index
    %c6_114 = arith.constant 6 : index
    %248 = memref.load %arg1[%c4_113, %c6_114] : memref<8x9xf32, #tpu.memory_space<smem>>
    %c4_115 = arith.constant 4 : index
    %c7_116 = arith.constant 7 : index
    %249 = memref.load %arg1[%c4_115, %c7_116] : memref<8x9xf32, #tpu.memory_space<smem>>
    %c4_117 = arith.constant 4 : index
    %c8_118 = arith.constant 8 : index
    %250 = memref.load %arg1[%c4_117, %c8_118] : memref<8x9xf32, #tpu.memory_space<smem>>
    %251 = vector.broadcast %246 : f32 to vector<8x8xf32>
    %252 = arith.mulf %241, %251 : vector<8x8xf32>
    %253 = vector.extract_strided_slice %241 {offsets = [0, 1], sizes = [8, 7], strides = [1, 1]} : vector<8x8xf32> to vector<8x7xf32>
    %254 = vector.broadcast %245 : f32 to vector<8x7xf32>
    %255 = arith.mulf %253, %254 : vector<8x7xf32>
    %256 = vector.extract_strided_slice %241 {offsets = [0, 0], sizes = [8, 7], strides = [1, 1]} : vector<8x8xf32> to vector<8x7xf32>
    %257 = vector.broadcast %247 : f32 to vector<8x7xf32>
    %258 = arith.mulf %256, %257 : vector<8x7xf32>
    %259 = arith.addf %255, %258 : vector<8x7xf32>
    %260 = vector.extract_strided_slice %241 {offsets = [1, 0], sizes = [7, 8], strides = [1, 1]} : vector<8x8xf32> to vector<7x8xf32>
    %261 = vector.broadcast %243 : f32 to vector<7x8xf32>
    %262 = arith.mulf %260, %261 : vector<7x8xf32>
    %263 = vector.extract_strided_slice %241 {offsets = [0, 0], sizes = [7, 8], strides = [1, 1]} : vector<8x8xf32> to vector<7x8xf32>
    %264 = vector.broadcast %249 : f32 to vector<7x8xf32>
    %265 = arith.mulf %263, %264 : vector<7x8xf32>
    %266 = arith.addf %262, %265 : vector<7x8xf32>
    %267 = vector.extract_strided_slice %241 {offsets = [1, 1], sizes = [7, 7], strides = [1, 1]} : vector<8x8xf32> to vector<7x7xf32>
    %268 = vector.broadcast %242 : f32 to vector<7x7xf32>
    %269 = arith.mulf %267, %268 : vector<7x7xf32>
    %270 = vector.extract_strided_slice %241 {offsets = [1, 0], sizes = [7, 7], strides = [1, 1]} : vector<8x8xf32> to vector<7x7xf32>
    %271 = vector.broadcast %244 : f32 to vector<7x7xf32>
    %272 = arith.mulf %270, %271 : vector<7x7xf32>
    %273 = arith.addf %269, %272 : vector<7x7xf32>
    %274 = vector.extract_strided_slice %241 {offsets = [0, 1], sizes = [7, 7], strides = [1, 1]} : vector<8x8xf32> to vector<7x7xf32>
    %275 = vector.broadcast %248 : f32 to vector<7x7xf32>
    %276 = arith.mulf %274, %275 : vector<7x7xf32>
    %277 = arith.addf %273, %276 : vector<7x7xf32>
    %278 = vector.extract_strided_slice %241 {offsets = [0, 0], sizes = [7, 7], strides = [1, 1]} : vector<8x8xf32> to vector<7x7xf32>
    %279 = vector.broadcast %250 : f32 to vector<7x7xf32>
    %280 = arith.mulf %278, %279 : vector<7x7xf32>
    %281 = arith.addf %277, %280 : vector<7x7xf32>
    %cst_119 = arith.constant dense<0.000000e+00> : vector<8x15xf32>
    %282 = tpu.matmul %252, %0, %cst_119 {dimension_numbers = #tpu.dot_dimension_numbers<[1], [0], [0], [1], [0, 0, 1, 1], [], []>} : vector<8x8xf32>, vector<8x15xf32>, vector<8x15xf32> -> vector<8x15xf32>
    %cst_120 = arith.constant dense<0.000000e+00> : vector<8x15xf32>
    %283 = tpu.matmul %259, %1, %cst_120 {dimension_numbers = #tpu.dot_dimension_numbers<[1], [0], [0], [1], [0, 0, 1, 1], [], []>} : vector<8x7xf32>, vector<7x15xf32>, vector<8x15xf32> -> vector<8x15xf32>
    %284 = arith.addf %282, %283 : vector<8x15xf32>
    %cst_121 = arith.constant dense<0.000000e+00> : vector<7x15xf32>
    %285 = tpu.matmul %266, %0, %cst_121 {dimension_numbers = #tpu.dot_dimension_numbers<[1], [0], [0], [1], [0, 0, 1, 1], [], []>} : vector<7x8xf32>, vector<8x15xf32>, vector<7x15xf32> -> vector<7x15xf32>
    %cst_122 = arith.constant dense<0.000000e+00> : vector<7x15xf32>
    %286 = tpu.matmul %281, %1, %cst_122 {dimension_numbers = #tpu.dot_dimension_numbers<[1], [0], [0], [1], [0, 0, 1, 1], [], []>} : vector<7x7xf32>, vector<7x15xf32>, vector<7x15xf32> -> vector<7x15xf32>
    %287 = arith.addf %285, %286 : vector<7x15xf32>
    %cst_123 = arith.constant dense<0.000000e+00> : vector<15x15xf32>
    %288 = tpu.matmul %2, %284, %cst_123 {dimension_numbers = #tpu.dot_dimension_numbers<[1], [0], [0], [1], [0, 0, 1, 1], [], []>} : vector<15x8xf32>, vector<8x15xf32>, vector<15x15xf32> -> vector<15x15xf32>
    %cst_124 = arith.constant dense<0.000000e+00> : vector<15x15xf32>
    %289 = tpu.matmul %3, %287, %cst_124 {dimension_numbers = #tpu.dot_dimension_numbers<[1], [0], [0], [1], [0, 0, 1, 1], [], []>} : vector<15x7xf32>, vector<7x15xf32>, vector<15x15xf32> -> vector<15x15xf32>
    %290 = arith.addf %288, %289 : vector<15x15xf32>
    %291 = vector.extract_strided_slice %4 {offsets = [0, 4], sizes = [17, 1], strides = [1, 1]} : vector<17x8xf32> to vector<17x1xf32>
    %292 = vector.shape_cast %291 : vector<17x1xf32> to vector<17x1x1xf32>
    %293 = vector.shape_cast %290 : vector<15x15xf32> to vector<1x15x15xf32>
    %294 = vector.broadcast %292 : vector<17x1x1xf32> to vector<17x15x15xf32>
    %295 = vector.broadcast %293 : vector<1x15x15xf32> to vector<17x15x15xf32>
    %296 = arith.mulf %294, %295 : vector<17x15x15xf32>
    %297 = arith.addf %239, %296 : vector<17x15x15xf32>
    %298 = vector.extract_strided_slice %6 {offsets = [5, 0, 0], sizes = [1, 8, 8], strides = [1, 1, 1]} : vector<8x8x8xf32> to vector<1x8x8xf32>
    %299 = vector.shape_cast %298 : vector<1x8x8xf32> to vector<8x8xf32>
    %c5_125 = arith.constant 5 : index
    %c0_126 = arith.constant 0 : index
    %300 = memref.load %arg1[%c5_125, %c0_126] : memref<8x9xf32, #tpu.memory_space<smem>>
    %c5_127 = arith.constant 5 : index
    %c1_128 = arith.constant 1 : index
    %301 = memref.load %arg1[%c5_127, %c1_128] : memref<8x9xf32, #tpu.memory_space<smem>>
    %c5_129 = arith.constant 5 : index
    %c2_130 = arith.constant 2 : index
    %302 = memref.load %arg1[%c5_129, %c2_130] : memref<8x9xf32, #tpu.memory_space<smem>>
    %c5_131 = arith.constant 5 : index
    %c3_132 = arith.constant 3 : index
    %303 = memref.load %arg1[%c5_131, %c3_132] : memref<8x9xf32, #tpu.memory_space<smem>>
    %c5_133 = arith.constant 5 : index
    %c4_134 = arith.constant 4 : index
    %304 = memref.load %arg1[%c5_133, %c4_134] : memref<8x9xf32, #tpu.memory_space<smem>>
    %c5_135 = arith.constant 5 : index
    %c5_136 = arith.constant 5 : index
    %305 = memref.load %arg1[%c5_135, %c5_136] : memref<8x9xf32, #tpu.memory_space<smem>>
    %c5_137 = arith.constant 5 : index
    %c6_138 = arith.constant 6 : index
    %306 = memref.load %arg1[%c5_137, %c6_138] : memref<8x9xf32, #tpu.memory_space<smem>>
    %c5_139 = arith.constant 5 : index
    %c7_140 = arith.constant 7 : index
    %307 = memref.load %arg1[%c5_139, %c7_140] : memref<8x9xf32, #tpu.memory_space<smem>>
    %c5_141 = arith.constant 5 : index
    %c8_142 = arith.constant 8 : index
    %308 = memref.load %arg1[%c5_141, %c8_142] : memref<8x9xf32, #tpu.memory_space<smem>>
    %309 = vector.broadcast %304 : f32 to vector<8x8xf32>
    %310 = arith.mulf %299, %309 : vector<8x8xf32>
    %311 = vector.extract_strided_slice %299 {offsets = [0, 1], sizes = [8, 7], strides = [1, 1]} : vector<8x8xf32> to vector<8x7xf32>
    %312 = vector.broadcast %303 : f32 to vector<8x7xf32>
    %313 = arith.mulf %311, %312 : vector<8x7xf32>
    %314 = vector.extract_strided_slice %299 {offsets = [0, 0], sizes = [8, 7], strides = [1, 1]} : vector<8x8xf32> to vector<8x7xf32>
    %315 = vector.broadcast %305 : f32 to vector<8x7xf32>
    %316 = arith.mulf %314, %315 : vector<8x7xf32>
    %317 = arith.addf %313, %316 : vector<8x7xf32>
    %318 = vector.extract_strided_slice %299 {offsets = [1, 0], sizes = [7, 8], strides = [1, 1]} : vector<8x8xf32> to vector<7x8xf32>
    %319 = vector.broadcast %301 : f32 to vector<7x8xf32>
    %320 = arith.mulf %318, %319 : vector<7x8xf32>
    %321 = vector.extract_strided_slice %299 {offsets = [0, 0], sizes = [7, 8], strides = [1, 1]} : vector<8x8xf32> to vector<7x8xf32>
    %322 = vector.broadcast %307 : f32 to vector<7x8xf32>
    %323 = arith.mulf %321, %322 : vector<7x8xf32>
    %324 = arith.addf %320, %323 : vector<7x8xf32>
    %325 = vector.extract_strided_slice %299 {offsets = [1, 1], sizes = [7, 7], strides = [1, 1]} : vector<8x8xf32> to vector<7x7xf32>
    %326 = vector.broadcast %300 : f32 to vector<7x7xf32>
    %327 = arith.mulf %325, %326 : vector<7x7xf32>
    %328 = vector.extract_strided_slice %299 {offsets = [1, 0], sizes = [7, 7], strides = [1, 1]} : vector<8x8xf32> to vector<7x7xf32>
    %329 = vector.broadcast %302 : f32 to vector<7x7xf32>
    %330 = arith.mulf %328, %329 : vector<7x7xf32>
    %331 = arith.addf %327, %330 : vector<7x7xf32>
    %332 = vector.extract_strided_slice %299 {offsets = [0, 1], sizes = [7, 7], strides = [1, 1]} : vector<8x8xf32> to vector<7x7xf32>
    %333 = vector.broadcast %306 : f32 to vector<7x7xf32>
    %334 = arith.mulf %332, %333 : vector<7x7xf32>
    %335 = arith.addf %331, %334 : vector<7x7xf32>
    %336 = vector.extract_strided_slice %299 {offsets = [0, 0], sizes = [7, 7], strides = [1, 1]} : vector<8x8xf32> to vector<7x7xf32>
    %337 = vector.broadcast %308 : f32 to vector<7x7xf32>
    %338 = arith.mulf %336, %337 : vector<7x7xf32>
    %339 = arith.addf %335, %338 : vector<7x7xf32>
    %cst_143 = arith.constant dense<0.000000e+00> : vector<8x15xf32>
    %340 = tpu.matmul %310, %0, %cst_143 {dimension_numbers = #tpu.dot_dimension_numbers<[1], [0], [0], [1], [0, 0, 1, 1], [], []>} : vector<8x8xf32>, vector<8x15xf32>, vector<8x15xf32> -> vector<8x15xf32>
    %cst_144 = arith.constant dense<0.000000e+00> : vector<8x15xf32>
    %341 = tpu.matmul %317, %1, %cst_144 {dimension_numbers = #tpu.dot_dimension_numbers<[1], [0], [0], [1], [0, 0, 1, 1], [], []>} : vector<8x7xf32>, vector<7x15xf32>, vector<8x15xf32> -> vector<8x15xf32>
    %342 = arith.addf %340, %341 : vector<8x15xf32>
    %cst_145 = arith.constant dense<0.000000e+00> : vector<7x15xf32>
    %343 = tpu.matmul %324, %0, %cst_145 {dimension_numbers = #tpu.dot_dimension_numbers<[1], [0], [0], [1], [0, 0, 1, 1], [], []>} : vector<7x8xf32>, vector<8x15xf32>, vector<7x15xf32> -> vector<7x15xf32>
    %cst_146 = arith.constant dense<0.000000e+00> : vector<7x15xf32>
    %344 = tpu.matmul %339, %1, %cst_146 {dimension_numbers = #tpu.dot_dimension_numbers<[1], [0], [0], [1], [0, 0, 1, 1], [], []>} : vector<7x7xf32>, vector<7x15xf32>, vector<7x15xf32> -> vector<7x15xf32>
    %345 = arith.addf %343, %344 : vector<7x15xf32>
    %cst_147 = arith.constant dense<0.000000e+00> : vector<15x15xf32>
    %346 = tpu.matmul %2, %342, %cst_147 {dimension_numbers = #tpu.dot_dimension_numbers<[1], [0], [0], [1], [0, 0, 1, 1], [], []>} : vector<15x8xf32>, vector<8x15xf32>, vector<15x15xf32> -> vector<15x15xf32>
    %cst_148 = arith.constant dense<0.000000e+00> : vector<15x15xf32>
    %347 = tpu.matmul %3, %345, %cst_148 {dimension_numbers = #tpu.dot_dimension_numbers<[1], [0], [0], [1], [0, 0, 1, 1], [], []>} : vector<15x7xf32>, vector<7x15xf32>, vector<15x15xf32> -> vector<15x15xf32>
    %348 = arith.addf %346, %347 : vector<15x15xf32>
    %349 = vector.extract_strided_slice %4 {offsets = [0, 5], sizes = [17, 1], strides = [1, 1]} : vector<17x8xf32> to vector<17x1xf32>
    %350 = vector.shape_cast %349 : vector<17x1xf32> to vector<17x1x1xf32>
    %351 = vector.shape_cast %348 : vector<15x15xf32> to vector<1x15x15xf32>
    %352 = vector.broadcast %350 : vector<17x1x1xf32> to vector<17x15x15xf32>
    %353 = vector.broadcast %351 : vector<1x15x15xf32> to vector<17x15x15xf32>
    %354 = arith.mulf %352, %353 : vector<17x15x15xf32>
    %355 = arith.addf %297, %354 : vector<17x15x15xf32>
    %356 = vector.extract_strided_slice %6 {offsets = [6, 0, 0], sizes = [1, 8, 8], strides = [1, 1, 1]} : vector<8x8x8xf32> to vector<1x8x8xf32>
    %357 = vector.shape_cast %356 : vector<1x8x8xf32> to vector<8x8xf32>
    %c6_149 = arith.constant 6 : index
    %c0_150 = arith.constant 0 : index
    %358 = memref.load %arg1[%c6_149, %c0_150] : memref<8x9xf32, #tpu.memory_space<smem>>
    %c6_151 = arith.constant 6 : index
    %c1_152 = arith.constant 1 : index
    %359 = memref.load %arg1[%c6_151, %c1_152] : memref<8x9xf32, #tpu.memory_space<smem>>
    %c6_153 = arith.constant 6 : index
    %c2_154 = arith.constant 2 : index
    %360 = memref.load %arg1[%c6_153, %c2_154] : memref<8x9xf32, #tpu.memory_space<smem>>
    %c6_155 = arith.constant 6 : index
    %c3_156 = arith.constant 3 : index
    %361 = memref.load %arg1[%c6_155, %c3_156] : memref<8x9xf32, #tpu.memory_space<smem>>
    %c6_157 = arith.constant 6 : index
    %c4_158 = arith.constant 4 : index
    %362 = memref.load %arg1[%c6_157, %c4_158] : memref<8x9xf32, #tpu.memory_space<smem>>
    %c6_159 = arith.constant 6 : index
    %c5_160 = arith.constant 5 : index
    %363 = memref.load %arg1[%c6_159, %c5_160] : memref<8x9xf32, #tpu.memory_space<smem>>
    %c6_161 = arith.constant 6 : index
    %c6_162 = arith.constant 6 : index
    %364 = memref.load %arg1[%c6_161, %c6_162] : memref<8x9xf32, #tpu.memory_space<smem>>
    %c6_163 = arith.constant 6 : index
    %c7_164 = arith.constant 7 : index
    %365 = memref.load %arg1[%c6_163, %c7_164] : memref<8x9xf32, #tpu.memory_space<smem>>
    %c6_165 = arith.constant 6 : index
    %c8_166 = arith.constant 8 : index
    %366 = memref.load %arg1[%c6_165, %c8_166] : memref<8x9xf32, #tpu.memory_space<smem>>
    %367 = vector.broadcast %362 : f32 to vector<8x8xf32>
    %368 = arith.mulf %357, %367 : vector<8x8xf32>
    %369 = vector.extract_strided_slice %357 {offsets = [0, 1], sizes = [8, 7], strides = [1, 1]} : vector<8x8xf32> to vector<8x7xf32>
    %370 = vector.broadcast %361 : f32 to vector<8x7xf32>
    %371 = arith.mulf %369, %370 : vector<8x7xf32>
    %372 = vector.extract_strided_slice %357 {offsets = [0, 0], sizes = [8, 7], strides = [1, 1]} : vector<8x8xf32> to vector<8x7xf32>
    %373 = vector.broadcast %363 : f32 to vector<8x7xf32>
    %374 = arith.mulf %372, %373 : vector<8x7xf32>
    %375 = arith.addf %371, %374 : vector<8x7xf32>
    %376 = vector.extract_strided_slice %357 {offsets = [1, 0], sizes = [7, 8], strides = [1, 1]} : vector<8x8xf32> to vector<7x8xf32>
    %377 = vector.broadcast %359 : f32 to vector<7x8xf32>
    %378 = arith.mulf %376, %377 : vector<7x8xf32>
    %379 = vector.extract_strided_slice %357 {offsets = [0, 0], sizes = [7, 8], strides = [1, 1]} : vector<8x8xf32> to vector<7x8xf32>
    %380 = vector.broadcast %365 : f32 to vector<7x8xf32>
    %381 = arith.mulf %379, %380 : vector<7x8xf32>
    %382 = arith.addf %378, %381 : vector<7x8xf32>
    %383 = vector.extract_strided_slice %357 {offsets = [1, 1], sizes = [7, 7], strides = [1, 1]} : vector<8x8xf32> to vector<7x7xf32>
    %384 = vector.broadcast %358 : f32 to vector<7x7xf32>
    %385 = arith.mulf %383, %384 : vector<7x7xf32>
    %386 = vector.extract_strided_slice %357 {offsets = [1, 0], sizes = [7, 7], strides = [1, 1]} : vector<8x8xf32> to vector<7x7xf32>
    %387 = vector.broadcast %360 : f32 to vector<7x7xf32>
    %388 = arith.mulf %386, %387 : vector<7x7xf32>
    %389 = arith.addf %385, %388 : vector<7x7xf32>
    %390 = vector.extract_strided_slice %357 {offsets = [0, 1], sizes = [7, 7], strides = [1, 1]} : vector<8x8xf32> to vector<7x7xf32>
    %391 = vector.broadcast %364 : f32 to vector<7x7xf32>
    %392 = arith.mulf %390, %391 : vector<7x7xf32>
    %393 = arith.addf %389, %392 : vector<7x7xf32>
    %394 = vector.extract_strided_slice %357 {offsets = [0, 0], sizes = [7, 7], strides = [1, 1]} : vector<8x8xf32> to vector<7x7xf32>
    %395 = vector.broadcast %366 : f32 to vector<7x7xf32>
    %396 = arith.mulf %394, %395 : vector<7x7xf32>
    %397 = arith.addf %393, %396 : vector<7x7xf32>
    %cst_167 = arith.constant dense<0.000000e+00> : vector<8x15xf32>
    %398 = tpu.matmul %368, %0, %cst_167 {dimension_numbers = #tpu.dot_dimension_numbers<[1], [0], [0], [1], [0, 0, 1, 1], [], []>} : vector<8x8xf32>, vector<8x15xf32>, vector<8x15xf32> -> vector<8x15xf32>
    %cst_168 = arith.constant dense<0.000000e+00> : vector<8x15xf32>
    %399 = tpu.matmul %375, %1, %cst_168 {dimension_numbers = #tpu.dot_dimension_numbers<[1], [0], [0], [1], [0, 0, 1, 1], [], []>} : vector<8x7xf32>, vector<7x15xf32>, vector<8x15xf32> -> vector<8x15xf32>
    %400 = arith.addf %398, %399 : vector<8x15xf32>
    %cst_169 = arith.constant dense<0.000000e+00> : vector<7x15xf32>
    %401 = tpu.matmul %382, %0, %cst_169 {dimension_numbers = #tpu.dot_dimension_numbers<[1], [0], [0], [1], [0, 0, 1, 1], [], []>} : vector<7x8xf32>, vector<8x15xf32>, vector<7x15xf32> -> vector<7x15xf32>
    %cst_170 = arith.constant dense<0.000000e+00> : vector<7x15xf32>
    %402 = tpu.matmul %397, %1, %cst_170 {dimension_numbers = #tpu.dot_dimension_numbers<[1], [0], [0], [1], [0, 0, 1, 1], [], []>} : vector<7x7xf32>, vector<7x15xf32>, vector<7x15xf32> -> vector<7x15xf32>
    %403 = arith.addf %401, %402 : vector<7x15xf32>
    %cst_171 = arith.constant dense<0.000000e+00> : vector<15x15xf32>
    %404 = tpu.matmul %2, %400, %cst_171 {dimension_numbers = #tpu.dot_dimension_numbers<[1], [0], [0], [1], [0, 0, 1, 1], [], []>} : vector<15x8xf32>, vector<8x15xf32>, vector<15x15xf32> -> vector<15x15xf32>
    %cst_172 = arith.constant dense<0.000000e+00> : vector<15x15xf32>
    %405 = tpu.matmul %3, %403, %cst_172 {dimension_numbers = #tpu.dot_dimension_numbers<[1], [0], [0], [1], [0, 0, 1, 1], [], []>} : vector<15x7xf32>, vector<7x15xf32>, vector<15x15xf32> -> vector<15x15xf32>
    %406 = arith.addf %404, %405 : vector<15x15xf32>
    %407 = vector.extract_strided_slice %4 {offsets = [0, 6], sizes = [17, 1], strides = [1, 1]} : vector<17x8xf32> to vector<17x1xf32>
    %408 = vector.shape_cast %407 : vector<17x1xf32> to vector<17x1x1xf32>
    %409 = vector.shape_cast %406 : vector<15x15xf32> to vector<1x15x15xf32>
    %410 = vector.broadcast %408 : vector<17x1x1xf32> to vector<17x15x15xf32>
    %411 = vector.broadcast %409 : vector<1x15x15xf32> to vector<17x15x15xf32>
    %412 = arith.mulf %410, %411 : vector<17x15x15xf32>
    %413 = arith.addf %355, %412 : vector<17x15x15xf32>
    %414 = vector.extract_strided_slice %6 {offsets = [7, 0, 0], sizes = [1, 8, 8], strides = [1, 1, 1]} : vector<8x8x8xf32> to vector<1x8x8xf32>
    %415 = vector.shape_cast %414 : vector<1x8x8xf32> to vector<8x8xf32>
    %c7_173 = arith.constant 7 : index
    %c0_174 = arith.constant 0 : index
    %416 = memref.load %arg1[%c7_173, %c0_174] : memref<8x9xf32, #tpu.memory_space<smem>>
    %c7_175 = arith.constant 7 : index
    %c1_176 = arith.constant 1 : index
    %417 = memref.load %arg1[%c7_175, %c1_176] : memref<8x9xf32, #tpu.memory_space<smem>>
    %c7_177 = arith.constant 7 : index
    %c2_178 = arith.constant 2 : index
    %418 = memref.load %arg1[%c7_177, %c2_178] : memref<8x9xf32, #tpu.memory_space<smem>>
    %c7_179 = arith.constant 7 : index
    %c3_180 = arith.constant 3 : index
    %419 = memref.load %arg1[%c7_179, %c3_180] : memref<8x9xf32, #tpu.memory_space<smem>>
    %c7_181 = arith.constant 7 : index
    %c4_182 = arith.constant 4 : index
    %420 = memref.load %arg1[%c7_181, %c4_182] : memref<8x9xf32, #tpu.memory_space<smem>>
    %c7_183 = arith.constant 7 : index
    %c5_184 = arith.constant 5 : index
    %421 = memref.load %arg1[%c7_183, %c5_184] : memref<8x9xf32, #tpu.memory_space<smem>>
    %c7_185 = arith.constant 7 : index
    %c6_186 = arith.constant 6 : index
    %422 = memref.load %arg1[%c7_185, %c6_186] : memref<8x9xf32, #tpu.memory_space<smem>>
    %c7_187 = arith.constant 7 : index
    %c7_188 = arith.constant 7 : index
    %423 = memref.load %arg1[%c7_187, %c7_188] : memref<8x9xf32, #tpu.memory_space<smem>>
    %c7_189 = arith.constant 7 : index
    %c8_190 = arith.constant 8 : index
    %424 = memref.load %arg1[%c7_189, %c8_190] : memref<8x9xf32, #tpu.memory_space<smem>>
    %425 = vector.broadcast %420 : f32 to vector<8x8xf32>
    %426 = arith.mulf %415, %425 : vector<8x8xf32>
    %427 = vector.extract_strided_slice %415 {offsets = [0, 1], sizes = [8, 7], strides = [1, 1]} : vector<8x8xf32> to vector<8x7xf32>
    %428 = vector.broadcast %419 : f32 to vector<8x7xf32>
    %429 = arith.mulf %427, %428 : vector<8x7xf32>
    %430 = vector.extract_strided_slice %415 {offsets = [0, 0], sizes = [8, 7], strides = [1, 1]} : vector<8x8xf32> to vector<8x7xf32>
    %431 = vector.broadcast %421 : f32 to vector<8x7xf32>
    %432 = arith.mulf %430, %431 : vector<8x7xf32>
    %433 = arith.addf %429, %432 : vector<8x7xf32>
    %434 = vector.extract_strided_slice %415 {offsets = [1, 0], sizes = [7, 8], strides = [1, 1]} : vector<8x8xf32> to vector<7x8xf32>
    %435 = vector.broadcast %417 : f32 to vector<7x8xf32>
    %436 = arith.mulf %434, %435 : vector<7x8xf32>
    %437 = vector.extract_strided_slice %415 {offsets = [0, 0], sizes = [7, 8], strides = [1, 1]} : vector<8x8xf32> to vector<7x8xf32>
    %438 = vector.broadcast %423 : f32 to vector<7x8xf32>
    %439 = arith.mulf %437, %438 : vector<7x8xf32>
    %440 = arith.addf %436, %439 : vector<7x8xf32>
    %441 = vector.extract_strided_slice %415 {offsets = [1, 1], sizes = [7, 7], strides = [1, 1]} : vector<8x8xf32> to vector<7x7xf32>
    %442 = vector.broadcast %416 : f32 to vector<7x7xf32>
    %443 = arith.mulf %441, %442 : vector<7x7xf32>
    %444 = vector.extract_strided_slice %415 {offsets = [1, 0], sizes = [7, 7], strides = [1, 1]} : vector<8x8xf32> to vector<7x7xf32>
    %445 = vector.broadcast %418 : f32 to vector<7x7xf32>
    %446 = arith.mulf %444, %445 : vector<7x7xf32>
    %447 = arith.addf %443, %446 : vector<7x7xf32>
    %448 = vector.extract_strided_slice %415 {offsets = [0, 1], sizes = [7, 7], strides = [1, 1]} : vector<8x8xf32> to vector<7x7xf32>
    %449 = vector.broadcast %422 : f32 to vector<7x7xf32>
    %450 = arith.mulf %448, %449 : vector<7x7xf32>
    %451 = arith.addf %447, %450 : vector<7x7xf32>
    %452 = vector.extract_strided_slice %415 {offsets = [0, 0], sizes = [7, 7], strides = [1, 1]} : vector<8x8xf32> to vector<7x7xf32>
    %453 = vector.broadcast %424 : f32 to vector<7x7xf32>
    %454 = arith.mulf %452, %453 : vector<7x7xf32>
    %455 = arith.addf %451, %454 : vector<7x7xf32>
    %cst_191 = arith.constant dense<0.000000e+00> : vector<8x15xf32>
    %456 = tpu.matmul %426, %0, %cst_191 {dimension_numbers = #tpu.dot_dimension_numbers<[1], [0], [0], [1], [0, 0, 1, 1], [], []>} : vector<8x8xf32>, vector<8x15xf32>, vector<8x15xf32> -> vector<8x15xf32>
    %cst_192 = arith.constant dense<0.000000e+00> : vector<8x15xf32>
    %457 = tpu.matmul %433, %1, %cst_192 {dimension_numbers = #tpu.dot_dimension_numbers<[1], [0], [0], [1], [0, 0, 1, 1], [], []>} : vector<8x7xf32>, vector<7x15xf32>, vector<8x15xf32> -> vector<8x15xf32>
    %458 = arith.addf %456, %457 : vector<8x15xf32>
    %cst_193 = arith.constant dense<0.000000e+00> : vector<7x15xf32>
    %459 = tpu.matmul %440, %0, %cst_193 {dimension_numbers = #tpu.dot_dimension_numbers<[1], [0], [0], [1], [0, 0, 1, 1], [], []>} : vector<7x8xf32>, vector<8x15xf32>, vector<7x15xf32> -> vector<7x15xf32>
    %cst_194 = arith.constant dense<0.000000e+00> : vector<7x15xf32>
    %460 = tpu.matmul %455, %1, %cst_194 {dimension_numbers = #tpu.dot_dimension_numbers<[1], [0], [0], [1], [0, 0, 1, 1], [], []>} : vector<7x7xf32>, vector<7x15xf32>, vector<7x15xf32> -> vector<7x15xf32>
    %461 = arith.addf %459, %460 : vector<7x15xf32>
    %cst_195 = arith.constant dense<0.000000e+00> : vector<15x15xf32>
    %462 = tpu.matmul %2, %458, %cst_195 {dimension_numbers = #tpu.dot_dimension_numbers<[1], [0], [0], [1], [0, 0, 1, 1], [], []>} : vector<15x8xf32>, vector<8x15xf32>, vector<15x15xf32> -> vector<15x15xf32>
    %cst_196 = arith.constant dense<0.000000e+00> : vector<15x15xf32>
    %463 = tpu.matmul %3, %461, %cst_196 {dimension_numbers = #tpu.dot_dimension_numbers<[1], [0], [0], [1], [0, 0, 1, 1], [], []>} : vector<15x7xf32>, vector<7x15xf32>, vector<15x15xf32> -> vector<15x15xf32>
    %464 = arith.addf %462, %463 : vector<15x15xf32>
    %465 = vector.extract_strided_slice %4 {offsets = [0, 7], sizes = [17, 1], strides = [1, 1]} : vector<17x8xf32> to vector<17x1xf32>
    %466 = vector.shape_cast %465 : vector<17x1xf32> to vector<17x1x1xf32>
    %467 = vector.shape_cast %464 : vector<15x15xf32> to vector<1x15x15xf32>
    %468 = vector.broadcast %466 : vector<17x1x1xf32> to vector<17x15x15xf32>
    %469 = vector.broadcast %467 : vector<1x15x15xf32> to vector<17x15x15xf32>
    %470 = arith.mulf %468, %469 : vector<17x15x15xf32>
    %471 = arith.addf %413, %470 : vector<17x15x15xf32>
    %c0_197 = arith.constant 0 : index
    %c0_198 = arith.constant 0 : index
    %c0_199 = arith.constant 0 : index
    %c0_200 = arith.constant 0 : index
    %472 = vector.load %arg8[%c0_197, %c0_198, %c0_199, %c0_200] : memref<1x17x15x15xf32, #tpu.memory_space<vmem>>, vector<1x17x15x15xf32>
    %473 = vector.shape_cast %472 : vector<1x17x15x15xf32> to vector<17x15x15xf32>
    %474 = vector.shape_cast %471 : vector<17x15x15xf32> to vector<1x17x15x15xf32>
    tpu.vector_store %arg8[%c0_197, %c0_198, %c0_199, %c0_200], %474 {strides = array<i32>} : memref<1x17x15x15xf32, #tpu.memory_space<vmem>>, vector<1x17x15x15xf32>,
    return
  }
  func.func @transform_0(%arg0: i32) -> (i32, i32) {
    %c0_i32 = arith.constant 0 : i32
    %c0_i32_0 = arith.constant 0 : i32
    %c0_i32_1 = arith.constant 0 : i32
    return %c0_i32, %c0_i32_0 : i32, i32
  }
  func.func @transform_1(%arg0: i32) -> (i32, i32, i32, i32) {
    %c0_i32 = arith.constant 0 : i32
    %c0_i32_0 = arith.constant 0 : i32
    %c0_i32_1 = arith.constant 0 : i32
    %c0_i32_2 = arith.constant 0 : i32
    return %arg0, %c0_i32, %c0_i32_0, %c0_i32_1 : i32, i32, i32, i32
  }
  func.func @transform_2(%arg0: i32) -> (i32, i32) {
    %c0_i32 = arith.constant 0 : i32
    %c0_i32_0 = arith.constant 0 : i32
    %c0_i32_1 = arith.constant 0 : i32
    return %c0_i32, %c0_i32_0 : i32, i32
  }
  func.func @transform_3(%arg0: i32) -> (i32, i32) {
    %c0_i32 = arith.constant 0 : i32
    %c0_i32_0 = arith.constant 0 : i32
    %c0_i32_1 = arith.constant 0 : i32
    return %c0_i32, %c0_i32_0 : i32, i32
  }
  func.func @transform_4(%arg0: i32) -> (i32, i32) {
    %c0_i32 = arith.constant 0 : i32
    %c0_i32_0 = arith.constant 0 : i32
    %c0_i32_1 = arith.constant 0 : i32
    return %c0_i32, %c0_i32_0 : i32, i32
  }
  func.func @transform_5(%arg0: i32) -> (i32, i32) {
    %c0_i32 = arith.constant 0 : i32
    %c0_i32_0 = arith.constant 0 : i32
    %c0_i32_1 = arith.constant 0 : i32
    return %c0_i32, %c0_i32_0 : i32, i32
  }
  func.func @transform_6(%arg0: i32) -> (i32, i32) {
    %c0_i32 = arith.constant 0 : i32
    %c0_i32_0 = arith.constant 0 : i32
    %c0_i32_1 = arith.constant 0 : i32
    return %c0_i32, %c0_i32_0 : i32, i32
  }
  func.func @transform_7(%arg0: i32) -> (i32, i32, i32, i32) {
    %c0_i32 = arith.constant 0 : i32
    %c0_i32_0 = arith.constant 0 : i32
    %c0_i32_1 = arith.constant 0 : i32
    %c0_i32_2 = arith.constant 0 : i32
    return %arg0, %c0_i32, %c0_i32_0, %c0_i32_1 : i32, i32, i32, i32
  }
}

</mosaic_0001>

<bundles_post_ra>
// kernel: dwtrans_forward.3
= control target key start
LH: loop header
LB: loop body
LE: loop exit
PB: predicated region body
PF: predicated region fallthrough
CT: control target
= control target key end

     0   :  { %vm112_vm0 = vcmask 1046528   ;;  %vm105_vm1 = vcmask 121856   ;;  %vm3422_vm2 = vmmov 1   ;;  %vm1269_vm5 = vcmask 120832   ;;  %s4353_s1 = inlined_call_operand.vmem [shape: f32[2,17,15,15], index: 1, kind: input, shape index: {}]   ;;  %s4354_s2 = inlined_call_operand.vmem [shape: f32[2,2,15,15], index: 2, kind: input, shape index: {}]   ;;  %s4355_s0 = inlined_call_operand.<no memory space> [shape: f32[1], index: 0, kind: input, shape index: {}]   ;;  %s4356_s3 = inlined_call_operand.vmem [shape: f32[4,8], index: 3, kind: input, shape index: {}]   ;;  %s4357_s4 = inlined_call_operand.vmem [shape: f32[4,1], index: 4, kind: input, shape index: {}]   ;;  %s4358_s5 = inlined_call_operand.vmem [shape: f32[8,4], index: 5, kind: input, shape index: {}]   ;;  %s4359_s6 = inlined_call_operand.vmem [shape: f32[8,1], index: 6, kind: input, shape index: {}]   ;;  %s4360_s7 = inlined_call_operand.vmem [shape: f32[2,8,15,15], index: 7, kind: output, shape index: {}]  }
   0x1   :  { %v2873_v0 = vld [vmem:[%s4353_s1 + $0x110] sm:$0xff]  ;;  %v2874_v1 = vld [vmem:[%s4353_s1 + $0x118] sm:$0x7f]  ;;  %vm3473_vm3 = vmpackc.low %vm112_vm0, %vm3422_vm2  ;;  %v3656_v47 = vstv %s4355_s0  ;;  %vm1359_vm6 = vcmask 130112   ;;  %vm1424_vm7 = vcmask 1041409   ;;  %vm1426_vm8 = vcmask 1042434  }
   0x2   :  { %v3269_v3 = vpack.c.bf16 %v2874_v1, %v2873_v0  ;;  %v30_v4 = vld [vmem:[%s4354_s2 + $0x10] sm:$0xff]  ;;  %v36_v6 = vld [vmem:[%s4353_s1] sm:$0xff]  ;;  %v37_v7 = vld [vmem:[%s4353_s1 + $0x8] sm:$0x7f]  ;;  %vm1428_vm9 = vcmask 1043459   ;;  %vm1430_vm10 = vcmask 1044484  }
   0x3   :  { %v34_v5 = vld [vmem:[%s4354_s2 + $0x30] sm:$0xff]  ;;  %3099 = vmatprep.mubr.msk.f32.mxu0 %vm105_vm1, %v30_v4  ;;  %v3275_v8 = vpack.c.bf16 %v37_v7, %v36_v6  ;;  %v31_v9 = vld [vmem:[%s4354_s2 + $0x18] sm:$0x7f]  ;;  %v28_v11 = vld [vmem:[%s4354_s2] sm:$0xff]  ;;  %vm1432_vm11 = vcmask 1045509   ;;  %vm1434_vm12 = vcmask 1046534  }
   0x4   :  { %3113 = vmatprep.mubr.msk.f32.mxu1 %vm105_vm1, %v34_v5  ;;  %3271 = vmatprep.subr.msk.bf16.mxu0 %vm3473_vm3, %v3269_v3  ;;  %v35_v10 = vld [vmem:[%s4354_s2 + $0x38] sm:$0x7f]  ;;  %v32_v12 = vld [vmem:[%s4354_s2 + $0x20] sm:$0xff]  ;;  %v29_v13 = vld [vmem:[%s4354_s2 + $0x8] sm:$0x7f]  ;;  %vm1436_vm13 = vcmask 1047559  }
   0x5   :  { %3283 = vmatprep.subr.msk.bf16.mxu1 %vm3473_vm3, %v3269_v3  ;;  %3274 = vmatpush3.bf16.msk.msra.mxu0 %vm3473_vm3, %v3269_v3  ;;  %v33_v14 = vld [vmem:[%s4354_s2 + $0x28] sm:$0x7f]  ;;  %v38_v15 = vld [vmem:[%s4353_s1 + $0x10] sm:$0xff]  ;;  %v39_v16 = vld [vmem:[%s4353_s1 + $0x18] sm:$0x7f]  ;;  %vm3424_vm14 = vmmov 0  }
   0x6   :  { %3286 = vmatpush3.bf16.msk.msra.mxu1 %vm3473_vm3, %v3269_v3  ;;  %3277 = vmatprep.subr.msk.bf16.mxu0 %vm3473_vm3, %v3275_v8  ;;  %v3305_v17 = vpack.c.bf16 %v39_v16, %v38_v15  ;;  %vm3294_vm4 = vmpackc.low %vm105_vm1, %vm105_vm1  ;;  %v46_v24 = vld [vmem:[%s4353_s1 + $0x50] sm:$0xff]  ;;  %v47_v25 = vld [vmem:[%s4353_s1 + $0x58] sm:$0x7f]  ;;  %vm1443_vm15 = vcmask 64512   ;;  %vm1524_vm2 = vcmask 1043456   ;;  %v3425_v2 = vmov 0  }
   0x7   :  { %3289 = vmatprep.subr.msk.bf16.mxu1 %vm3473_vm3, %v3275_v8  ;;  %v3329_v26 = vpack.c.bf16 %v47_v25, %v46_v24  ;;  %v40_v27 = vld [vmem:[%s4353_s1 + $0x20] sm:$0xff]  ;;  %v41_v28 = vld [vmem:[%s4353_s1 + $0x28] sm:$0x7f]  ;;  %v50_v29 = vld [vmem:[%s4353_s1 + $0x70] sm:$0xff]  ;;  %3412 = vset.pattern.permute.xlu0 %v3425_v2 }
   0x8   :  { %3100 = vmatmul.mubr.msk.f32.vlgmr.msra.gmra.mrb[0].mxu0 %vm105_vm1, %v31_v9  ;;  %v3311_v30 = vpack.c.bf16 %v41_v28, %v40_v27  ;;  %v51_v31 = vld [vmem:[%s4353_s1 + $0x78] sm:$0x7f]  ;;  %v42_v33 = vld [vmem:[%s4353_s1 + $0x30] sm:$0xff]  ;;  %v44_v38 = vld [vmem:[%s4353_s1 + $0x40] sm:$0xff]  ;;  %3413 = vset.pattern.permute.xlu1 %v3425_v2 }
   0x9   :  { %3114 = vmatmul.mubr.msk.f32.vlgmr.msra.gmra.mrb[0].mxu1 %vm105_vm1, %v35_v10  ;;  %3280 = vmatpush3.bf16.msk.msra.mxu0 %vm3473_vm3, %v3275_v8  ;;  %v3341_v32 = vpack.c.bf16 %v51_v31, %v50_v29  ;;  %v43_v34 = vld [vmem:[%s4353_s1 + $0x38] sm:$0x7f]  ;;  %v45_v39 = vld [vmem:[%s4353_s1 + $0x48] sm:$0x7f]  ;;  %v48_v41 = vld [vmem:[%s4353_s1 + $0x60] sm:$0xff] }
   0xa   :  { %3292 = vmatpush3.bf16.msk.msra.mxu1 %vm3473_vm3, %v3275_v8  ;;  %3106 = vmatprep.mubr.msk.f32.mxu0 %vm105_vm1, %v28_v11  ;;  %v3317_v37 = vpack.c.bf16 %v43_v34, %v42_v33  ;;  %v3323_v40 = vpack.c.bf16 %v45_v39, %v44_v38  ;;  %v49_v42 = vld [vmem:[%s4353_s1 + $0x68] sm:$0x7f]  ;;  %v52_v44 = vld [vmem:[%s4353_s1 + $0x80] sm:$0xff]  ;;  %v63_v50 = vld [vmem:[%s4353_s1 + $0xd8] sm:$0x7f] }
   0xb   :  { %3120 = vmatprep.mubr.msk.f32.mxu1 %vm105_vm1, %v32_v12  ;;  %3307 = vmatprep.subr.msk.bf16.mxu1 %vm3473_vm3, %v3305_v17  ;;  %v3335_v43 = vpack.c.bf16 %v49_v42, %v48_v41  ;;  %v53_v45 = vld [vmem:[%s4353_s1 + $0x88] sm:$0x7f]  ;;  %v55_v51 = vld [vmem:[%s4353_s1 + $0x98] sm:$0x7f]  ;;  %v54_v57 = vld [vmem:[%s4353_s1 + $0x90] sm:$0xff] }
   0xc   :  { %v3347_v46 = vpack.c.bf16 %v53_v45, %v52_v44  ;;  %v57_v62 = vld [vmem:[%s4353_s1 + $0xa8] sm:$0x7f]  ;;  %v62_v6 = vld [vmem:[%s4353_s1 + $0xd0] sm:$0xff]  ;;  %v67_v9 = vld [vmem:[%s4353_s1 + $0xf8] sm:$0x7f] }
   0xd   :  { %v59_v29 = vld [vmem:[%s4353_s1 + $0xb8] sm:$0x7f]  ;;  %v61_v41 = vld [vmem:[%s4353_s1 + $0xc8] sm:$0x7f]  ;;  %v60_v42 = vld [vmem:[%s4353_s1 + $0xc0] sm:$0xff] }
  0x10   :  { %3107 = vmatmul.mubr.msk.f32.vlgmr.msra.gmra.mrb[0].mxu0 %vm105_vm1, %v29_v13 }
  0x11   :  { %3121 = vmatmul.mubr.msk.f32.vlgmr.msra.gmra.mrb[0].mxu1 %vm105_vm1, %v33_v14 }
  0x12   :  { %3310 = vmatpush3.bf16.msk.msra.mxu1 %vm3473_vm3, %v3305_v17 }
  0x13   :  { %3313 = vmatprep.subr.msk.bf16.mxu1 %vm3473_vm3, %v3311_v30 }
  0xe3   :  { %v3108_v18 = vpop.f32.mrb[0].mxu0 }
  0xe4   :  { %v3122_v19 = vpop.f32.mrb[0].mxu1  ;;  %v266_v20 = vpop.f32.mrb[1].mxu0 }
  0xe5   :  { %v428_v21 = vpop.f32.mrb[1].mxu1  ;;  %v3299_v22 = vpack.c.bf16 %v3108_v18, %v266_v20 }
  0xe6   :  { %v3293_v23 = vpack.c.bf16 %v3122_v19, %v428_v21  ;;  %3127 = vmatprep.mubr.msk.f32.mxu0 %vm105_vm1, %v428_v21 }
  0xe8   :  { %3295 = vmatprep.subr.msk.bf16.mxu0 %vm3294_vm4, %v3293_v23 }
  0xe9   :  { %3298 = vmatpush3.bf16.xpose.msk.msra.mxu0 %vm3294_vm4, %v3293_v23 }
  0xea   :  { %3301 = vmatprep.subr.msk.bf16.mxu0 %vm3294_vm4, %v3299_v22 }
  0xf0   :  { %3128 = vmatmul.mubr.msk.f32.vlgmr.msra.gmra.mrb[2].mxu0 %vm105_vm1, %v3122_v19  ;;  %v56_v19 = vld [vmem:[%s4353_s1 + $0xa0] sm:$0xff] }
  0xf1   :  { %3304 = vmatpush3.bf16.xpose.msk.msra.mxu0 %vm3294_vm4, %v3299_v22  ;;  %3134 = vmatprep.mubr.msk.f32.mxu0 %vm105_vm1, %v266_v20  ;;  %v66_v20 = vld [vmem:[%s4353_s1 + $0xf0] sm:$0xff]  ;;  %vm1520_vm4 = vcmask 31744  }
  0xf2   :  { %3331 = vmatprep.subr.msk.bf16.mxu0 %vm3473_vm3, %v3329_v26 }
  0xf8   :  { %3135 = vmatmul.mubr.msk.f32.vlgmr.msra.gmra.mrb[2].mxu0 %vm105_vm1, %v3108_v18 }
  0xf9   :  { %3334 = vmatpush3.bf16.msk.msra.mxu0 %vm3473_vm3, %v3329_v26 }
  0xfa   :  { %3343 = vmatprep.subr.msk.bf16.mxu0 %vm3473_vm3, %v3341_v32 }
 0x1cb   :  { %v3579_v35 = vpop.f32.mrb[2].mxu0 }
 0x1cc   :  { %v3581_v36 = vpop.f32.mrb[3].mxu0 }
 0x1cd   :  { %3141 = vmatprep.mubr.msk.f32.mxu1 %vm105_vm1, %v3581_v36  ;;  %3169 = vmatprep.mubr.msk.f32.mxu0 %vm105_vm1, %v3581_v36 }
 0x1ce   :  { %3142 = vmatmul.mubr.msk.f32.vlgmr.msra.gmra.mrb[2].mxu1 %vm105_vm1, %v3579_v35  ;;  %3170 = vmatmul.mubr.msk.f32.vlgmr.msra.gmra.mrb[4].mxu0 %vm105_vm1, %v3579_v35 }
 0x1cf   :  { %3316 = vmatpush3.bf16.msk.msra.mxu1 %vm3473_vm3, %v3311_v30  ;;  %3148 = vmatprep.mubr.msk.f32.mxu1 %vm105_vm1, %v3581_v36  ;;  %v58_v30 = vld [vmem:[%s4353_s1 + $0xb0] sm:$0xff] }
 0x1d0   :  { %3346 = vmatpush3.bf16.msk.msra.mxu0 %vm3473_vm3, %v3341_v32  ;;  %3183 = vmatprep.mubr.msk.f32.mxu0 %vm105_vm1, %v3581_v36 }
 0x1d1   :  { %3319 = vmatprep.subr.msk.bf16.mxu1 %vm3473_vm3, %v3317_v37 }
 0x1d2   :  { %3149 = vmatmul.mubr.msk.f32.vlgmr.msra.gmra.mrb[4].mxu1 %vm105_vm1, %v3579_v35 }
 0x1d3   :  { %3184 = vmatmul.mubr.msk.f32.vlgmr.msra.gmra.mrb[6].mxu0 %vm105_vm1, %v3579_v35  ;;  %3322 = vmatpush3.bf16.msk.msra.mxu1 %vm3473_vm3, %v3317_v37 }
 0x1d4   :  { %3155 = vmatprep.mubr.msk.f32.mxu1 %vm105_vm1, %v3581_v36  ;;  %3325 = vmatprep.subr.msk.bf16.mxu1 %vm3473_vm3, %v3323_v40 }
 0x1d6   :  { %3156 = vmatmul.mubr.msk.f32.vlgmr.msra.gmra.mrb[6].mxu1 %vm105_vm1, %v3579_v35 }
 0x1d7   :  { %3328 = vmatpush3.bf16.msk.msra.mxu1 %vm3473_vm3, %v3323_v40  ;;  %3162 = vmatprep.mubr.msk.f32.mxu1 %vm105_vm1, %v3581_v36 }
 0x1d8   :  { %3337 = vmatprep.subr.msk.bf16.mxu1 %vm3473_vm3, %v3335_v43 }
 0x1da   :  { %3163 = vmatmul.mubr.msk.f32.vlgmr.msra.gmra.mrb[8].mxu1 %vm105_vm1, %v3579_v35 }
 0x1db   :  { %3340 = vmatpush3.bf16.msk.msra.mxu1 %vm3473_vm3, %v3335_v43  ;;  %3176 = vmatprep.mubr.msk.f32.mxu1 %vm105_vm1, %v3581_v36 }
 0x1dc   :  { %3349 = vmatprep.subr.msk.bf16.mxu1 %vm3473_vm3, %v3347_v46 }
 0x1de   :  { %3177 = vmatmul.mubr.msk.f32.vlgmr.msra.gmra.mrb[10].mxu1 %vm105_vm1, %v3579_v35 }
 0x1df   :  { %3352 = vmatpush3.bf16.msk.msra.mxu1 %vm3473_vm3, %v3347_v46  ;;  %3190 = vmatprep.mubr.msk.f32.mxu1 %vm105_vm1, %v3581_v36 }
 0x1e2   :  { %3191 = vmatmul.mubr.msk.f32.vlgmr.msra.gmra.mrb[12].mxu1 %vm105_vm1, %v3579_v35 }
 0x2a1   :  { %v3143_v48 = vpop.f32.mrb[2].mxu1  ;;  %v3171_v49 = vpop.f32.mrb[4].mxu0 }
 0x2a2   :  { %v1235_v52 = vmul.f32 %v3143_v48, %v3656_v47  ;;  %v1243_v53 = vmul.f32 %v3171_v49, %v3656_v47  ;;  %v678_v54 = vpop.f32.mrb[3].mxu1  ;;  %v990_v55 = vpop.f32.mrb[5].mxu0 }
 0x2a3   :  { %v1234_v56 = vmul.f32 %v3656_v47, %v678_v54  ;;  %v1242_v60 = vmul.f32 %v3656_v47, %v990_v55 }
 0x2a4   :  { %v3670_v58 = vadd.f32 %v1243_v53, %v63_v50  ;;  %v3672_v59 = vadd.f32 %v1235_v52, %v55_v51  ;;  %v65_v52 = vld [vmem:[%s4353_s1 + $0xe8] sm:$0x7f]  ;;  %v64_v53 = vld [vmem:[%s4353_s1 + $0xe0] sm:$0xff] }
 0x2a5   :  { %v3150_v61 = vpop.f32.mrb[4].mxu1  ;;  %v3683_v5 = vadd.f32 %v1234_v56, %v54_v57  ;;  %v3695_v13 = vadd.f32 %v1242_v60, %v62_v6 }
 0x2a6   :  { %v1237_v63 = vmul.f32 %v3150_v61, %v3656_v47  ;;  %v3185_v0 = vpop.f32.mrb[6].mxu0  ;;  %v756_v1 = vpop.f32.mrb[5].mxu1  ;;  %v1294_v3 = vsel %vm1269_vm5, %v3670_v58, 0.0  ;;  %v1270_v4 = vsel %vm1269_vm5, %v3672_v59, 0.0 }
 0x2a7   :  { %v1247_v7 = vmul.f32 %v3185_v0, %v3656_v47  ;;  %v1146_v8 = vpop.f32.mrb[7].mxu0  ;;  %1295 = vadd.xlane.f32.xlu1 %v1294_v3  ;;  %1271 = vadd.xlane.f32.xlu0 %v1270_v4  ;;  %v1236_v11 = vmul.f32 %v3656_v47, %v756_v1  ;;  %v1266_v17 = vsel %vm105_vm1, %v3683_v5, 0.0  ;;  %v1291_v22 = vsel %vm105_vm1, %v3695_v13, 0.0 }
 0x2a8   :  { %v3692_v10 = vadd.f32 %v1237_v63, %v57_v62  ;;  %v1246_v14 = vmul.f32 %v3656_v47, %v1146_v8  ;;  %v69_v62 = vld [vmem:[%s4353_s1 + $0x108] sm:$0x7f]  ;;  %v68_v63 = vld [vmem:[%s4353_s1 + $0x100] sm:$0xff] }
 0x2a9   :  { %v3157_v12 = vpop.f32.mrb[6].mxu1  ;;  %v3702_v18 = vadd.f32 %v1247_v7, %v67_v9  ;;  %v3712_v23 = vadd.f32 %v1236_v11, %v56_v19  ;;  %v1348_v11 = vlaneseq }
 0x2aa   :  { %v834_v15 = vpop.f32.mrb[7].mxu1  ;;  %v1276_v16 = vsel %vm1269_vm5, %v3692_v10, 0.0  ;;  %v1239_v24 = vmul.f32 %v3157_v12, %v3656_v47  ;;  %v3718_v28 = vadd.f32 %v1246_v14, %v66_v20 }
 0x2ab   :  { %1277 = vadd.xlane.f32.xlu1 %v1276_v16  ;;  %1267 = vadd.xlane.f32.xlu0 %v1266_v17  ;;  %v1238_v25 = vmul.f32 %v3656_v47, %v834_v15  ;;  %v1306_v27 = vsel %vm1269_vm5, %v3702_v18, 0.0  ;;  %v1273_v37 = vsel %vm105_vm1, %v3712_v23, 0.0  ;;  %v1349_v15 = vand.u32 127, %v1348_v11 }
 0x2ac   :  { %v1303_v38 = vsel %vm105_vm1, %v3718_v28, 0.0  ;;  %v3732_v39 = vadd.f32 %v1239_v24, %v59_v29  ;;  %v3786_v19 = vshrl.u32 %v1348_v11, 7 }
 0x2ad   :  { %v3164_v21 = vpop.f32.mrb[8].mxu1  ;;  %v3734_v40 = vadd.f32 %v1238_v25, %v58_v30  ;;  %v1354_v20 = vadd.s32 4294967288, %v1349_v15 }
 0x2ae   :  { %v912_v26 = vpop.f32.mrb[9].mxu1  ;;  %v1241_v31 = vmul.f32 %v3164_v21, %v3656_v47  ;;  %v1282_v50 = vsel %vm1269_vm5, %v3732_v39, 0.0 }
 0x2af   :  { %1307 = vadd.xlane.f32.xlu1 %v1306_v27  ;;  %1292 = vadd.xlane.f32.xlu0 %v1291_v22  ;;  %v1240_v32 = vmul.f32 %v3656_v47, %v912_v26  ;;  %v1279_v51 = vsel %vm105_vm1, %v3734_v40, 0.0  ;;  %v3789_v26 = vsub.s32 %v1349_v15, %v3786_v19  ;;  %v3792_v29 = vsub.s32 %v1354_v20, %v3786_v19 }
 0x2b0   :  { %v3742_v44 = vadd.f32 %v1241_v31, %v61_v41 }
 0x2b1   :  { %v3178_v33 = vpop.f32.mrb[10].mxu1  ;;  %v3744_v45 = vadd.f32 %v1240_v32, %v60_v42 }
 0x2b2   :  { %v1068_v34 = vpop.f32.mrb[11].mxu1  ;;  %v1245_v46 = vmul.f32 %v3178_v33, %v3656_v47  ;;  %v1288_v54 = vsel %vm1269_vm5, %v3742_v44, 0.0 }
 0x2b3   :  { %1274 = vadd.xlane.f32.xlu1 %v1273_v37  ;;  %1304 = vadd.xlane.f32.xlu0 %v1303_v38  ;;  %v1244_v48 = vmul.f32 %v3656_v47, %v1068_v34  ;;  %v1285_v55 = vsel %vm105_vm1, %v3744_v45, 0.0 }
 0x2b4   :  { %v3764_v60 = vadd.f32 %v1245_v46, %v65_v52 }
 0x2b5   :  { %v3192_v43 = vpop.f32.mrb[12].mxu1  ;;  %v3766_v61 = vadd.f32 %v1244_v48, %v64_v53 }
 0x2b6   :  { %v1224_v49 = vpop.f32.mrb[13].mxu1  ;;  %v1249_v56 = vmul.f32 %v3192_v43, %v3656_v47  ;;  %v1300_v0 = vsel %vm1269_vm5, %v3764_v60, 0.0 }
 0x2b7   :  { %1283 = vadd.xlane.f32.xlu1 %v1282_v50  ;;  %1280 = vadd.xlane.f32.xlu0 %v1279_v51  ;;  %v1248_v57 = vmul.f32 %v3656_v47, %v1224_v49  ;;  %v1297_v1 = vsel %vm105_vm1, %v3766_v61, 0.0 }
 0x2b8   :  { %v3778_v3 = vadd.f32 %v1249_v56, %v69_v62 }
 0x2b9   :  { %v3780_v4 = vadd.f32 %v1248_v57, %v68_v63 }
 0x2ba   :  { %v1312_v6 = vsel %vm1269_vm5, %v3778_v3, 0.0 }
 0x2bb   :  { %1289 = vadd.xlane.f32.xlu1 %v1288_v54  ;;  %1286 = vadd.xlane.f32.xlu0 %v1285_v55  ;;  %v1309_v7 = vsel %vm105_vm1, %v3780_v4, 0.0 }
 0x2bf   :  { %1301 = vadd.xlane.f32.xlu1 %v1300_v0  ;;  %1298 = vadd.xlane.f32.xlu0 %v1297_v1 }
 0x2c3   :  { %1313 = vadd.xlane.f32.xlu1 %v1312_v6  ;;  %1310 = vadd.xlane.f32.xlu0 %v1309_v7 }
 0x334   :  { %v1296_v8 = vpop.xlane.xlu1 %1295  ;;  %v1272_v9 = vpop.xlane.xlu0 %1271 }
 0x335   :  { %v1317_v32 = vmul.f32 0.06666667, %v1272_v9  ;;  %v1325_v54 = vmul.f32 0.06666667, %v1296_v8 }
 0x337   :  { %v1358_v50 = vrot.slane %v1317_v32, %v3792_v29 }
 0x338   :  { %v1278_v12 = vpop.xlane.xlu1 %1277  ;;  %v1268_v14 = vpop.xlane.xlu0 %1267 }
 0x339   :  { %v1319_v25 = vmul.f32 0.06666667, %v1278_v12  ;;  %v1316_v27 = vmul.f32 0.06666667, %v1268_v14  ;;  %v1395_v14 = vrot.slane %v1325_v54, %v3792_v29 }
 0x33b   :  { %v1368_v38 = vrot.slane %v1319_v25, %v3792_v29  ;;  %v1353_v41 = vrot.slane %v1316_v27, %v3789_v26 }
 0x33c   :  { %v1308_v16 = vpop.xlane.xlu1 %1307  ;;  %v1293_v17 = vpop.xlane.xlu0 %1292 }
 0x33d   :  { %v1324_v46 = vmul.f32 0.06666667, %v1293_v17  ;;  %v1360_v56 = vsel %vm1359_vm6, %v1358_v50, %v1353_v41  ;;  %v1329_v15 = vmul.f32 0.06666667, %v1308_v16  ;;  %v2875_v50 = vld [vmem:[%s4353_s1 + $0x120] sm:$0xff] }
 0x33f   :  { %v1391_v63 = vrot.slane %v1324_v46, %v3789_v26 }
 0x340   :  { %v1275_v21 = vpop.xlane.xlu1 %1274  ;;  %v1305_v22 = vpop.xlane.xlu0 %1304 }
 0x341   :  { %v1318_v24 = vmul.f32 0.06666667, %v1275_v21  ;;  %v1328_v1 = vmul.f32 0.06666667, %v1305_v22  ;;  %v1396_v22 = vsel %vm1359_vm6, %v1395_v14, %v1391_v63  ;;  %v2883_v63 = vld [vmem:[%s4353_s1 + $0x160] sm:$0xff] }
 0x342   :  { %v2878_v14 = vld [vmem:[%s4353_s1 + $0x138] sm:$0x7f] }
 0x343   :  { %v1364_v33 = vrot.slane %v1318_v24, %v3789_v26  ;;  %v1409_v24 = vrot.slane %v1328_v1, %v3789_v26 }
 0x344   :  { %v1284_v30 = vpop.xlane.xlu1 %1283  ;;  %v1281_v31 = vpop.xlane.xlu0 %1280 }
 0x345   :  { %v1321_v34 = vmul.f32 0.06666667, %v1284_v30  ;;  %v1320_v37 = vmul.f32 0.06666667, %v1281_v31  ;;  %v1369_v51 = vsel %vm1359_vm6, %v1368_v38, %v1364_v33  ;;  %v1413_v33 = vrot.slane %v1329_v15, %v3792_v29 }
 0x346   :  { %v1425_v0 = vsel %vm1424_vm7, %v1369_v51, %v1360_v56  ;;  %v2876_v51 = vld [vmem:[%s4353_s1 + $0x128] sm:$0x7f] }
 0x347   :  { %v1377_v42 = vrot.slane %v1321_v34, %v3792_v29  ;;  %v1373_v43 = vrot.slane %v1320_v37, %v3789_v26  ;;  %v1414_v41 = vsel %vm1359_vm6, %v1413_v33, %v1409_v24 }
 0x348   :  { %v1290_v48 = vpop.xlane.xlu1 %1289  ;;  %v1287_v49 = vpop.xlane.xlu0 %1286 }
 0x349   :  { %v1323_v52 = vmul.f32 0.06666667, %v1290_v48  ;;  %v1322_v53 = vmul.f32 0.06666667, %v1287_v49  ;;  %v1378_v55 = vsel %vm1359_vm6, %v1377_v42, %v1373_v43  ;;  %v3423_v49 = vmov 0.0  }
 0x34a   :  { %v1427_v9 = vsel %vm1426_vm8, %v1378_v55, %v1425_v0  ;;  %3193 = vmatprep.subr.mxu0 %v3423_v49  ;;  %3198 = vmatprep.subr.mxu1 %v3423_v49  ;;  %v3353_v55 = vpack.c.bf16 %v2876_v51, %v2875_v50  ;;  %v2884_v0 = vld [vmem:[%s4353_s1 + $0x168] sm:$0x7f] }
 0x34b   :  { %v1386_v57 = vrot.slane %v1323_v52, %v3792_v29  ;;  %v1382_v62 = vrot.slane %v1322_v53, %v3789_v26  ;;  %3195 = vmatprep.mubr.msk.f32.mxu0 %vm3424_vm14, %v3423_v49  ;;  %3200 = vmatprep.mubr.msk.f32.mxu1 %vm3424_vm14, %v3423_v49  ;;  %v2879_v52 = vld [vmem:[%s4353_s1 + $0x140] sm:$0xff]  ;;  %v2880_v53 = vld [vmem:[%s4353_s1 + $0x148] sm:$0x7f]  ;;  %v3377_v1 = vpack.c.bf16 %v2884_v0, %v2883_v63  ;;  %v2890_v63 = vld [vmem:[%s4353_s1 + $0x198] sm:$0x7f] }
 0x34c   :  { %v1302_v6 = vpop.xlane.xlu1 %1301  ;;  %v1299_v7 = vpop.xlane.xlu0 %1298 }
 0x34d   :  { %v1387_v8 = vsel %vm1359_vm6, %v1386_v57, %v1382_v62  ;;  %v1327_v11 = vmul.f32 0.06666667, %v1302_v6  ;;  %v1326_v12 = vmul.f32 0.06666667, %v1299_v7  ;;  %v3847_v57 = vld [vmem:[%s4356_s3] sm:$0xf]  ;;  %v3365_v62 = vpack.c.bf16 %v2880_v53, %v2879_v52 }
 0x34e   :  { %v1429_v17 = vsel %vm1428_vm9, %v1387_v8, %v1427_v9  ;;  %v2887_v6 = vld [vmem:[%s4353_s1 + $0x180] sm:$0xff]  ;;  %v2888_v7 = vld [vmem:[%s4353_s1 + $0x188] sm:$0x7f] }
 0x34f   :  { %v1404_v20 = vrot.slane %v1327_v11, %v3792_v29  ;;  %v1400_v21 = vrot.slane %v1326_v12, %v3789_v26  ;;  %v1431_v16 = vsel %vm1430_vm10, %v1396_v22, %v1429_v17  ;;  %v3389_v9 = vpack.c.bf16 %v2888_v7, %v2887_v6  ;;  %v3901_v8 = vld [vmem:[%s4357_s4] sm:$0xf]  ;;  %v2877_v12 = vld [vmem:[%s4353_s1 + $0x130] sm:$0xff]  ;;  %v2900_v7 = vld [vmem:[%s4353_s1 + $0x1e8] sm:$0x7f] }
 0x350   :  { %v1314_v25 = vpop.xlane.xlu1 %1313  ;;  %v1311_v27 = vpop.xlane.xlu0 %1310  ;;  %v3359_v24 = vpack.c.bf16 %v2878_v14, %v2877_v12 }
 0x351   :  { %v1405_v30 = vsel %vm1359_vm6, %v1404_v20, %v1400_v21  ;;  %v1331_v31 = vmul.f32 0.06666667, %v1314_v25  ;;  %v1330_v32 = vmul.f32 0.06666667, %v1311_v27  ;;  %v2881_v20 = vld [vmem:[%s4353_s1 + $0x150] sm:$0xff]  ;;  %v3919_v27 = vld [vmem:[%s4358_s5] sm:$0xff] }
 0x352   :  { %v1433_v34 = vsel %vm1432_vm11, %v1405_v30, %v1431_v16  ;;  %v2882_v21 = vld [vmem:[%s4353_s1 + $0x158] sm:$0x7f]  ;;  %v2892_v30 = vld [vmem:[%s4353_s1 + $0x1a8] sm:$0x7f] }
 0x353   :  { %v1422_v37 = vrot.slane %v1331_v31, %v3792_v29  ;;  %v1418_v38 = vrot.slane %v1330_v32, %v3789_v26  ;;  %v1435_v43 = vsel %vm1434_vm12, %v1414_v41, %v1433_v34  ;;  %v3371_v33 = vpack.c.bf16 %v2882_v21, %v2881_v20  ;;  %v2891_v34 = vld [vmem:[%s4353_s1 + $0x1a0] sm:$0xff]  ;;  %v2886_v41 = vld [vmem:[%s4353_s1 + $0x178] sm:$0x7f] }
 0x355   :  { %v1423_v42 = vsel %vm1359_vm6, %v1422_v37, %v1418_v38  ;;  %v2885_v38 = vld [vmem:[%s4353_s1 + $0x170] sm:$0xff] }
 0x356   :  { %v1437_v46 = vsel %vm1436_vm13, %v1423_v42, %v1435_v43  ;;  %v3383_v53 = vpack.c.bf16 %v2886_v41, %v2885_v38 }
 0x357   :  { %v1439_v48 = vsel %vm105_vm1, %v1437_v46, 0.0 }
 0x358   :  { %1440 = vadd.xlane.f32.xlu0 %v1439_v48  ;;  %v2896_v48 = vld [vmem:[%s4353_s1 + $0x1c8] sm:$0x7f] }
 0x3e5   :  { %v1441_v54 = vpop.xlane.xlu0 %1440 }
 0x3e6   :  { %v1442_v56 = vmul.f32 0.06666667, %v1441_v54  ;;  %v2895_v54 = vld [vmem:[%s4353_s1 + $0x1c0] sm:$0xff] }
 0x3e8   :  { %3194 = vmatpush3.msra.mxu0 %v1442_v56 }
 0x3e9   :  { %3196 = vmatmul.mubr.msk.f32.vlgmr.msra.gmra.mrb[8].mxu0 %vm1443_vm15, %v3847_v57  ;;  %3355 = vmatprep.subr.msk.bf16.mxu0 %vm3473_vm3, %v3353_v55 }
 0x3ea   :  { %3358 = vmatpush3.bf16.msk.msra.mxu0 %vm3473_vm3, %v3353_v55  ;;  %3207 = vmatprep.mubr.msk.f32.mxu0 %vm105_vm1, %v3581_v36 }
 0x3eb   :  { %3367 = vmatprep.subr.msk.bf16.mxu0 %vm3473_vm3, %v3365_v62 }
 0x3ed   :  { %3208 = vmatmul.mubr.msk.f32.vlgmr.msra.gmra.mrb[10].mxu0 %vm105_vm1, %v3579_v35 }
 0x3ee   :  { %3370 = vmatpush3.bf16.msk.msra.mxu0 %vm3473_vm3, %v3365_v62  ;;  %3221 = vmatprep.mubr.msk.f32.mxu0 %vm105_vm1, %v3581_v36  ;;  %v2889_v62 = vld [vmem:[%s4353_s1 + $0x190] sm:$0xff] }
 0x3ef   :  { %3379 = vmatprep.subr.msk.bf16.mxu0 %vm3473_vm3, %v3377_v1  ;;  %v3395_v14 = vpack.c.bf16 %v2890_v63, %v2889_v62 }
 0x3f1   :  { %3222 = vmatmul.mubr.msk.f32.vlgmr.msra.gmra.mrb[12].mxu0 %vm105_vm1, %v3579_v35 }
 0x3f2   :  { %3382 = vmatpush3.bf16.msk.msra.mxu0 %vm3473_vm3, %v3377_v1  ;;  %3235 = vmatprep.mubr.msk.f32.mxu0 %vm105_vm1, %v3581_v36 }
 0x3f3   :  { %3391 = vmatprep.subr.msk.bf16.mxu0 %vm3473_vm3, %v3389_v9 }
 0x3f5   :  { %3236 = vmatmul.mubr.msk.f32.vlgmr.msra.gmra.mrb[14].mxu0 %vm105_vm1, %v3579_v35 }
 0x3f6   :  { %3394 = vmatpush3.bf16.msk.msra.mxu0 %vm3473_vm3, %v3389_v9  ;;  %3249 = vmatprep.mubr.msk.f32.mxu0 %vm105_vm1, %v3581_v36 }
 0x3f7   :  { %3259 = vmatprep.subr.mxu0 %v3423_v49 }
 0x3f9   :  { %3250 = vmatmul.mubr.msk.f32.vlgmr.msra.gmra.mrb[16].mxu0 %vm105_vm1, %v3579_v35 }
 0x3fa   :  { %3261 = vmatprep.mubr.msk.f32.mxu0 %vm3424_vm14, %v3423_v49 }
 0x4bc   :  { %v1513_v11 = vpop.f32.mrb[8].mxu0 }
 0x4bd   :  { %v1514_v15 = vadd.f32 %v1513_v11, %v3901_v8  ;;  %v3197_v17 = vpop.f32.mrb[9].mxu0 }
 0x4bf   :  { %vm1517_vm0 = vcmp.ge.f32.partialorder %v1514_v15, 0.0  ;;  %v1518_v22 = vmul.f32 0.1, %v1514_v15 }
 0x4c0   :  { %v3209_v25 = vpop.f32.mrb[10].mxu0 }
 0x4c1   :  { %v1519_v31 = vsel %vm1517_vm0, %v1514_v15, %v1518_v22  ;;  %v2375_v32 = vmul.f32 %v3209_v25, %v3656_v47  ;;  %v1819_v16 = vpop.f32.mrb[11].mxu0  ;;  %v2899_v15 = vld [vmem:[%s4353_s1 + $0x1e0] sm:$0xff]  ;;  %v2904_v25 = vld [vmem:[%s4353_s1 + $0x208] sm:$0x7f] }
 0x4c2   :  { %v2374_v37 = vmul.f32 %v1819_v16, %v3656_v47  ;;  %3199 = vmatpush3.msk.msra.mxu1 %vm1524_vm2, %v1519_v31  ;;  %v2903_v16 = vld [vmem:[%s4353_s1 + $0x200] sm:$0xff] }
 0x4c3   :  { %3201 = vmatmul.mubr.msk.f32.vlgmr.msra.gmra.mrb[14].mxu1 %vm1520_vm4, %v3919_v27  ;;  %3361 = vmatprep.subr.msk.bf16.mxu1 %vm3473_vm3, %v3359_v24  ;;  %v3940_v42 = vadd.f32 %v2892_v30, %v2375_v32 }
 0x4c4   :  { %3364 = vmatpush3.bf16.msk.msra.mxu1 %vm3473_vm3, %v3359_v24  ;;  %3214 = vmatprep.mubr.msk.f32.mxu1 %vm105_vm1, %v3581_v36  ;;  %v3223_v43 = vpop.f32.mrb[12].mxu0  ;;  %v3946_v46 = vadd.f32 %v2891_v34, %v2374_v37 }
 0x4c5   :  { %v2379_v50 = vmul.f32 %v3223_v43, %v3656_v47  ;;  %v1975_v51 = vpop.f32.mrb[13].mxu0  ;;  %v2409_v52 = vsel %vm1269_vm5, %v3940_v42, 0.0  ;;  %3373 = vmatprep.subr.msk.bf16.mxu1 %vm3473_vm3, %v3371_v33 }
 0x4c6   :  { %v2378_v55 = vmul.f32 %v1975_v51, %v3656_v47  ;;  %2410 = vadd.xlane.f32.xlu0 %v2409_v52  ;;  %v2406_v56 = vsel %vm105_vm1, %v3946_v46, 0.0 }
 0x4c7   :  { %3215 = vmatmul.mubr.msk.f32.vlgmr.msra.gmra.mrb[16].mxu1 %vm105_vm1, %v3579_v35  ;;  %2407 = vadd.xlane.f32.xlu1 %v2406_v56  ;;  %v3970_v0 = vadd.f32 %v2896_v48, %v2379_v50 }
 0x4c8   :  { %3376 = vmatpush3.bf16.msk.msra.mxu1 %vm3473_vm3, %v3371_v33  ;;  %3228 = vmatprep.mubr.msk.f32.mxu1 %vm105_vm1, %v3581_v36  ;;  %v3237_v1 = vpop.f32.mrb[14].mxu0  ;;  %v3976_v6 = vadd.f32 %v2895_v54, %v2378_v55  ;;  %v2893_v55 = vld [vmem:[%s4353_s1 + $0x1b0] sm:$0xff] }
 0x4c9   :  { %v2383_v9 = vmul.f32 %v3237_v1, %v3656_v47  ;;  %v2131_v11 = vpop.f32.mrb[15].mxu0  ;;  %v2421_v12 = vsel %vm1269_vm5, %v3970_v0, 0.0  ;;  %3385 = vmatprep.subr.msk.bf16.mxu1 %vm3473_vm3, %v3383_v53 }
 0x4ca   :  { %v2382_v17 = vmul.f32 %v2131_v11, %v3656_v47  ;;  %2422 = vadd.xlane.f32.xlu0 %v2421_v12  ;;  %v2418_v20 = vsel %vm105_vm1, %v3976_v6, 0.0 }
 0x4cb   :  { %3229 = vmatmul.mubr.msk.f32.vlgmr.msra.gmra.mrb[18].mxu1 %vm105_vm1, %v3579_v35  ;;  %2419 = vadd.xlane.f32.xlu1 %v2418_v20  ;;  %v3994_v21 = vadd.f32 %v2900_v7, %v2383_v9  ;;  %v2898_v7 = vld [vmem:[%s4353_s1 + $0x1d8] sm:$0x7f] }
 0x4cc   :  { %3388 = vmatpush3.bf16.msk.msra.mxu1 %vm3473_vm3, %v3383_v53  ;;  %3242 = vmatprep.mubr.msk.f32.mxu1 %vm105_vm1, %v3581_v36  ;;  %v3251_v22 = vpop.f32.mrb[16].mxu0  ;;  %v4000_v24 = vadd.f32 %v2899_v15, %v2382_v17 }
 0x4cd   :  { %v2387_v30 = vmul.f32 %v3251_v22, %v3656_v47  ;;  %v2287_v31 = vpop.f32.mrb[17].mxu0  ;;  %v2433_v32 = vsel %vm1269_vm5, %v3994_v21, 0.0  ;;  %3397 = vmatprep.subr.msk.bf16.mxu1 %vm3473_vm3, %v3395_v14 }
 0x4ce   :  { %v2386_v33 = vmul.f32 %v2287_v31, %v3656_v47  ;;  %2434 = vadd.xlane.f32.xlu0 %v2433_v32  ;;  %v2430_v34 = vsel %vm105_vm1, %v4000_v24, 0.0 }
 0x4cf   :  { %3243 = vmatmul.mubr.msk.f32.vlgmr.msra.gmra.mrb[20].mxu1 %vm105_vm1, %v3579_v35  ;;  %2431 = vadd.xlane.f32.xlu1 %v2430_v34  ;;  %v4018_v37 = vadd.f32 %v2904_v25, %v2387_v30  ;;  %v2902_v30 = vld [vmem:[%s4353_s1 + $0x1f8] sm:$0x7f] }
 0x4d0   :  { %3400 = vmatpush3.bf16.msk.msra.mxu1 %vm3473_vm3, %v3395_v14  ;;  %3256 = vmatprep.mubr.msk.f32.mxu1 %vm105_vm1, %v3581_v36  ;;  %v4024_v38 = vadd.f32 %v2903_v16, %v2386_v33  ;;  %v4038_v36 = vld [vmem:[%s4359_s6] sm:$0xff]  ;;  %v2897_v14 = vld [vmem:[%s4353_s1 + $0x1d0] sm:$0xff] }
 0x4d1   :  { %4367 = vst [vmem:[#allocation3_spill] sm:$0xff] %v4018_v37  ;;  %v2445_v41 = vsel %vm1269_vm5, %v4018_v37, 0.0  ;;  %3264 = vmatprep.subr.mxu1 %v3423_v49  ;;  %v2901_v33 = vld [vmem:[%s4353_s1 + $0x1f0] sm:$0xff] }
 0x4d2   :  { %4368 = vst [vmem:[#allocation4_spill] sm:$0xff] %v4024_v38  ;;  %2446 = vadd.xlane.f32.xlu0 %v2445_v41  ;;  %v2442_v43 = vsel %vm105_vm1, %v4024_v38, 0.0 }
 0x4d3   :  { %3257 = vmatmul.mubr.msk.f32.vlgmr.msra.gmra.mrb[22].mxu1 %vm105_vm1, %v3579_v35  ;;  %2443 = vadd.xlane.f32.xlu1 %v2442_v43  ;;  %v2894_v35 = vld [vmem:[%s4353_s1 + $0x1b8] sm:$0x7f] }
 0x4d4   :  { %3266 = vmatprep.mubr.msk.f32.mxu1 %vm3424_vm14, %v3423_v49 }
 0x596   :  { %v1594_v48 = vpop.f32.mrb[14].mxu1 }
 0x597   :  { %v1595_v50 = vadd.f32 %v1594_v48, %v4038_v36  ;;  %v3202_v51 = vpop.f32.mrb[15].mxu1 }
 0x598   :  { %v2906_v51 = vld [vmem:[%s4353_s1 + $0x218] sm:$0x7f] }
 0x599   :  { %v2954_v52 = vmul.f32 -1.442695, %v1595_v50 }
 0x59a   :  { %v3216_v53 = vpop.f32.mrb[16].mxu1 }
 0x59b   :  { %3414 = vpow2.f32 %v2954_v52  ;;  %v2377_v49 = vmul.f32 %v3216_v53, %v3656_v47  ;;  %v1897_v54 = vpop.f32.mrb[17].mxu1 }
 0x59c   :  { %v2376_v56 = vmul.f32 %v1897_v54, %v3656_v47  ;;  %v2905_v54 = vld [vmem:[%s4353_s1 + $0x210] sm:$0xff] }
 0x59d   :  { %v4049_v62 = vadd.f32 %v2894_v35, %v2377_v49 }
 0x59e   :  { %v3230_v63 = vpop.f32.mrb[18].mxu1  ;;  %v4051_v1 = vadd.f32 %v2893_v55, %v2376_v56 }
 0x59f   :  { %v2381_v9 = vmul.f32 %v3230_v63, %v3656_v47  ;;  %v2053_v11 = vpop.f32.mrb[19].mxu1  ;;  %v2415_v12 = vsel %vm1269_vm5, %v4049_v62, 0.0 }
 0x5a0   :  { %v2380_v15 = vmul.f32 %v2053_v11, %v3656_v47  ;;  %2416 = vadd.xlane.f32.xlu0 %v2415_v12  ;;  %v2412_v17 = vsel %vm105_vm1, %v4051_v1, 0.0  ;;  %v3426_v12 = vmov 1966171168  }
 0x5a1   :  { %2413 = vadd.xlane.f32.xlu1 %v2412_v17  ;;  %v4065_v20 = vadd.f32 %v2898_v7, %v2381_v9 }
 0x5a2   :  { %v3244_v22 = vpop.f32.mrb[20].mxu1  ;;  %v4067_v25 = vadd.f32 %v2897_v14, %v2380_v15  ;;  %v1607_v14 = vunpack.c.l.s4 %v3426_v12 }
 0x5a3   :  { %v2385_v31 = vmul.f32 %v3244_v22, %v3656_v47  ;;  %v2209_v32 = vpop.f32.mrb[21].mxu1  ;;  %v2427_v16 = vsel %vm1269_vm5, %v4065_v20, 0.0 }
 0x5a4   :  { %v2384_v34 = vmul.f32 %v2209_v32, %v3656_v47  ;;  %2428 = vadd.xlane.f32.xlu0 %v2427_v16  ;;  %v2424_v41 = vsel %vm105_vm1, %v4067_v25, 0.0  ;;  %v2411_v16 = vpop.xlane.xlu0 %2410 }
 0x5a5   :  { %v3415_v43 = vpop.eup %3414  ;;  %2425 = vadd.xlane.f32.xlu1 %v2424_v41  ;;  %v4081_v2 = vadd.f32 %v2902_v30, %v2385_v31  ;;  %v4119_v31 = vsub.s32 0, %v3786_v19 }
 0x5a6   :  { %v3258_v48 = vpop.f32.mrb[22].mxu1  ;;  %v4083_v50 = vadd.f32 %v2901_v33, %v2384_v34  ;;  %v1601_v52 = vadd.f32 1.0, %v3415_v43  ;;  %v2408_v33 = vpop.xlane.xlu1 %2407 }
 0x5a7   :  { %v2389_v53 = vmul.f32 %v3258_v48, %v3656_v47  ;;  %v2365_v35 = vpop.f32.mrb[23].mxu1  ;;  %v2439_v49 = vsel %vm1269_vm5, %v4081_v2, 0.0 }
 0x5a8   :  { %v2388_v55 = vmul.f32 %v2365_v35, %v3656_v47  ;;  %2440 = vadd.xlane.f32.xlu0 %v2439_v49  ;;  %v2436_v56 = vsel %vm105_vm1, %v4083_v50, 0.0  ;;  %3416 = vrcp.f32 %v1601_v52  ;;  %v1608_v47 = vunpack.c.0.s8 %v1607_v14  ;;  %v2423_v34 = vpop.xlane.xlu0 %2422 }
 0x5a9   :  { %2437 = vadd.xlane.f32.xlu1 %v2436_v56  ;;  %v4097_v63 = vadd.f32 %v2906_v51, %v2389_v53  ;;  %v2455_v53 = vmul.f32 0.06666667, %v2411_v16  ;;  %v2454_v35 = vmul.f32 0.06666667, %v2408_v33  ;;  %v2459_v49 = vmul.f32 0.06666667, %v2423_v34 }
 0x5aa   :  { %v4099_v7 = vadd.f32 %v2905_v54, %v2388_v55  ;;  %v4106_v15 = vsub.s32 %v1608_v47, %v3786_v19  ;;  %v2420_v41 = vpop.xlane.xlu1 %2419 }
 0x5ab   :  { %4369 = vst [vmem:[#allocation5_spill] sm:$0xff] %v4097_v63  ;;  %v2451_v9 = vsel %vm1269_vm5, %v4097_v63, 0.0  ;;  %v2458_v54 = vmul.f32 0.06666667, %v2420_v41  ;;  %v2511_v47 = vrot.slane %v2459_v49, %v3792_v29 }
 0x5ac   :  { %4370 = vst [vmem:[#allocation6_spill] sm:$0xff] %v4099_v7  ;;  %2452 = vadd.xlane.f32.xlu0 %v2451_v9  ;;  %v2448_v11 = vsel %vm105_vm1, %v4099_v7, 0.0  ;;  %v2435_v43 = vpop.xlane.xlu0 %2434  ;;  %v2493_v9 = vrot.slane %v2455_v53, %v3792_v29 }
 0x5ad   :  { %2449 = vadd.xlane.f32.xlu1 %v2448_v11  ;;  %v2489_v11 = vrot.slane %v2454_v35, %v3789_v26  ;;  %v2463_v63 = vmul.f32 0.06666667, %v2435_v43 }
 0x5ae   :  { %v2432_v48 = vpop.xlane.xlu1 %2431 }
 0x5af   :  { %v2462_v34 = vmul.f32 0.06666667, %v2432_v48 }
 0x5b0   :  { %v2447_v51 = vpop.xlane.xlu0 %2446 }
 0x5b1   :  { %v2525_v48 = vrot.slane %v2462_v34, %v3789_v26 }
 0x5b2   :  { %v4108_v17 = vpop.eup %3416  ;;  %v2444_v52 = vpop.xlane.xlu1 %2443 }
 0x5b3   :  { %v4112_v22 = vrot.slane %v4108_v17, %v4106_v15 }
 0x5b5   :  { %v4116_v30 = vrot.slane %v4112_v22, %v4106_v15 }
 0x5b7   :  { %v1657_v32 = vrot.slane %v4116_v30, %v4119_v31 }
 0x5c2   :  { %1687 = vperm.xlu0 %3412, %v1657_v32   ;;  %v2507_v32 = vrot.slane %v2458_v54, %v3789_v26  ;;  %v2529_v54 = vrot.slane %v2463_v63, %v3792_v29 }
 0x5c4   :  { %v2512_v49 = vsel %vm1359_vm6, %v2511_v47, %v2507_v32 }
 0x62d   :  { %v2417_v55 = vpop.xlane.xlu0 %2416 }
 0x62e   :  { %v2457_v56 = vmul.f32 0.06666667, %v2417_v55  ;;  %v2414_v19 = vpop.xlane.xlu1 %2413  ;;  %v2494_v55 = vsel %vm1359_vm6, %v2493_v9, %v2489_v11 }
 0x62f   :  { %v2456_v12 = vmul.f32 0.06666667, %v2414_v19 }
 0x630   :  { %v2502_v14 = vrot.slane %v2457_v56, %v3792_v29 }
 0x631   :  { %v2498_v16 = vrot.slane %v2456_v12, %v3789_v26  ;;  %v2429_v33 = vpop.xlane.xlu0 %2428  ;;  %v2467_v12 = vmul.f32 0.06666667, %v2447_v51 }
 0x632   :  { %v2461_v41 = vmul.f32 0.06666667, %v2429_v33  ;;  %v2426_v7 = vpop.xlane.xlu1 %2425  ;;  %v2466_v33 = vmul.f32 0.06666667, %v2444_v52 }
 0x633   :  { %v2503_v53 = vsel %vm1359_vm6, %v2502_v14, %v2498_v16  ;;  %v2460_v37 = vmul.f32 0.06666667, %v2426_v7  ;;  %v2547_v34 = vrot.slane %v2467_v12, %v3792_v29 }
 0x634   :  { %v2558_v35 = vsel %vm1424_vm7, %v2503_v53, %v2494_v55  ;;  %v2520_v56 = vrot.slane %v2461_v41, %v3792_v29  ;;  %v2543_v51 = vrot.slane %v2466_v33, %v3789_v26 }
 0x635   :  { %v2516_v43 = vrot.slane %v2460_v37, %v3789_v26  ;;  %v2441_v19 = vpop.xlane.xlu0 %2440  ;;  %v2559_v11 = vsel %vm1426_vm8, %v2512_v49, %v2558_v35  ;;  %v2530_v37 = vsel %vm1359_vm6, %v2529_v54, %v2525_v48 }
 0x636   :  { %v2465_v38 = vmul.f32 0.06666667, %v2441_v19  ;;  %v2438_v9 = vpop.xlane.xlu1 %2437 }
 0x637   :  { %v2521_v7 = vsel %vm1359_vm6, %v2520_v56, %v2516_v43  ;;  %v2464_v14 = vmul.f32 0.06666667, %v2438_v9  ;;  %v2548_v43 = vsel %vm1359_vm6, %v2547_v34, %v2543_v51 }
 0x638   :  { %v2560_v16 = vsel %vm1428_vm9, %v2521_v7, %v2559_v11  ;;  %v2538_v47 = vrot.slane %v2465_v38, %v3792_v29  ;;  %v1605_v7 = vcombine.high %v4108_v17, %v4108_v17 }
 0x639   :  { %v2534_v63 = vrot.slane %v2464_v14, %v3789_v26  ;;  %v2453_v32 = vpop.xlane.xlu0 %2452  ;;  %v2561_v35 = vsel %vm1430_vm10, %v2530_v37, %v2560_v16 }
 0x63a   :  { %v2469_v52 = vmul.f32 0.06666667, %v2453_v32  ;;  %v2450_v41 = vpop.xlane.xlu1 %2449 }
 0x63b   :  { %v2539_v55 = vsel %vm1359_vm6, %v2538_v47, %v2534_v63  ;;  %v2468_v53 = vmul.f32 0.06666667, %v2450_v41  ;;  %v1619_v47 = vrot.slane %v1605_v7, %v4106_v15 }
 0x63c   :  { %v2556_v56 = vrot.slane %v2469_v52, %v3792_v29  ;;  %v2562_v38 = vsel %vm1432_vm11, %v2539_v55, %v2561_v35 }
 0x63d   :  { %v2552_v49 = vrot.slane %v2468_v53, %v3789_v26  ;;  %v2563_v19 = vsel %vm1434_vm12, %v2548_v43, %v2562_v38  ;;  %v1620_v26 = vcombine.high %v4112_v22, %v4112_v22  ;;  %v1635_v22 = vrot.slane %v1619_v47, %v4106_v15 }
 0x63e   :  { %v1621_v32 = vcombine.high %v1619_v47, %v1619_v47 }
 0x63f   :  { %v2557_v54 = vsel %vm1359_vm6, %v2556_v56, %v2552_v49  ;;  %v1642_v29 = vrot.slane %v1620_v26, %v4106_v15  ;;  %v1673_v37 = vrot.slane %v1635_v22, %v4119_v31  ;;  %v1651_v34 = vcombine.high %v1635_v22, %v1635_v22 }
 0x640   :  { %v2564_v48 = vsel %vm1436_vm13, %v2557_v54, %v2563_v19 }
 0x641   :  { %v1688_v12 = vpop.permute.xlu0 %1687  ;;  %v2566_v33 = vsel %vm105_vm1, %v2564_v48, 0.0  ;;  %v1652_v16 = vcombine.high %v1642_v29, %v1642_v29  ;;  %v1681_v51 = vrot.slane %v1651_v34, %v4119_v31 }
 0x642   :  { %v1718_v9 = vmul.f32 %v1688_v12, %v3683_v5  ;;  %v1719_v11 = vmul.f32 %v1688_v12, %v3672_v59  ;;  %2567 = vadd.xlane.f32.xlu1 %v2566_v33  ;;  %v1661_v5 = vrot.slane %v1642_v29, %v4119_v31  ;;  %v1650_v59 = vcombine.high %v4116_v30, %v4116_v30 }
 0x643   :  { %v1669_v63 = vrot.slane %v1652_v16, %v4119_v31  ;;  %v1649_v30 = vrot.slane %v1621_v32, %v4106_v15 }
 0x644   :  { %1734 = vst.msk [vmem:[%s4360_s7] sm:$0xff] %vm105_vm1, %v1718_v9  ;;  %v1665_v14 = vrot.slane %v1650_v59, %v4119_v31 }
 0x645   :  { %1735 = vst.msk [vmem:[%s4360_s7 + $0x8] sm:$0x7f] %vm1269_vm5, %v1719_v11  ;;  %v1677_v17 = vrot.slane %v1649_v30, %v4119_v31  ;;  %v1653_v52 = vcombine.high %v1649_v30, %v1649_v30 }
 0x647   :  { %v1685_v41 = vrot.slane %v1653_v52, %v4119_v31 }
 0x653   :  { %1691 = vperm.xlu1 %3413, %v1661_v5  }
 0x657   :  { %1695 = vperm.xlu1 %3413, %v1665_v14  }
 0x65b   :  { %1699 = vperm.xlu1 %3413, %v1669_v63  }
 0x65f   :  { %1703 = vperm.xlu1 %3413, %v1673_v37  }
 0x663   :  { %1707 = vperm.xlu1 %3413, %v1677_v17  }
 0x667   :  { %1711 = vperm.xlu1 %3413, %v1681_v51  }
 0x66b   :  { %1715 = vperm.xlu1 %3413, %v1685_v41  }
 0x6cf   :  { %v2568_v55 = vpop.xlane.xlu1 %2567 }
 0x6d0   :  { %v2569_v53 = vmul.f32 0.06666667, %v2568_v55 }
 0x6d2   :  { %3260 = vmatpush3.msra.mxu0 %v2569_v53 }
 0x6d3   :  { %3262 = vmatmul.mubr.msk.f32.vlgmr.msra.gmra.mrb[18].mxu0 %vm1443_vm15, %v3847_v57  ;;  %v1692_v35 = vpop.permute.xlu1 %1691 }
 0x6d4   :  { %v1720_v56 = vmul.f32 %v1692_v35, %v3712_v23  ;;  %v1721_v38 = vmul.f32 %v1692_v35, %v3692_v10 }
 0x6d6   :  { %1736 = vst.msk [vmem:[%s4360_s7 + $0x10] sm:$0xff] %vm105_vm1, %v1720_v56 }
 0x6d7   :  { %1737 = vst.msk [vmem:[%s4360_s7 + $0x18] sm:$0x7f] %vm1269_vm5, %v1721_v38  ;;  %v1696_v49 = vpop.permute.xlu1 %1695 }
 0x6d8   :  { %v1722_v43 = vmul.f32 %v1696_v49, %v3734_v40  ;;  %v1723_v57 = vmul.f32 %v1696_v49, %v3732_v39 }
 0x6da   :  { %1738 = vst.msk [vmem:[%s4360_s7 + $0x20] sm:$0xff] %vm105_vm1, %v1722_v43 }
 0x6db   :  { %1739 = vst.msk [vmem:[%s4360_s7 + $0x28] sm:$0x7f] %vm1269_vm5, %v1723_v57  ;;  %v1700_v10 = vpop.permute.xlu1 %1699 }
 0x6dc   :  { %v1724_v23 = vmul.f32 %v1700_v10, %v3744_v45  ;;  %v1725_v54 = vmul.f32 %v1700_v10, %v3742_v44 }
 0x6de   :  { %1740 = vst.msk [vmem:[%s4360_s7 + $0x30] sm:$0xff] %vm105_vm1, %v1724_v23 }
 0x6df   :  { %1741 = vst.msk [vmem:[%s4360_s7 + $0x38] sm:$0x7f] %vm1269_vm5, %v1725_v54  ;;  %v1704_v39 = vpop.permute.xlu1 %1703 }
 0x6e0   :  { %v1726_v40 = vmul.f32 %v1704_v39, %v3695_v13  ;;  %v1727_v19 = vmul.f32 %v1704_v39, %v3670_v58 }
 0x6e2   :  { %1742 = vst.msk [vmem:[%s4360_s7 + $0x40] sm:$0xff] %vm105_vm1, %v1726_v40 }
 0x6e3   :  { %1743 = vst.msk [vmem:[%s4360_s7 + $0x48] sm:$0x7f] %vm1269_vm5, %v1727_v19  ;;  %v1708_v44 = vpop.permute.xlu1 %1707 }
 0x6e4   :  { %v1728_v45 = vmul.f32 %v1708_v44, %v3766_v61  ;;  %v1729_v48 = vmul.f32 %v1708_v44, %v3764_v60 }
 0x6e6   :  { %1744 = vst.msk [vmem:[%s4360_s7 + $0x50] sm:$0xff] %vm105_vm1, %v1728_v45  ;;  %v4372_v45 = vld [vmem:[#allocation3_spill] sm:$0xff] }
 0x6e7   :  { %1745 = vst.msk [vmem:[%s4360_s7 + $0x58] sm:$0x7f] %vm1269_vm5, %v1729_v48  ;;  %v1712_v58 = vpop.permute.xlu1 %1711 }
 0x6e8   :  { %v1730_v13 = vmul.f32 %v1712_v58, %v3718_v28  ;;  %v1731_v12 = vmul.f32 %v1712_v58, %v3702_v18 }
 0x6ea   :  { %1746 = vst.msk [vmem:[%s4360_s7 + $0x60] sm:$0xff] %vm105_vm1, %v1730_v13  ;;  %v4374_v13 = vld [vmem:[#allocation5_spill] sm:$0xff] }
 0x6eb   :  { %1747 = vst.msk [vmem:[%s4360_s7 + $0x68] sm:$0x7f] %vm1269_vm5, %v1731_v12  ;;  %v1716_v60 = vpop.permute.xlu1 %1715 }
 0x6ec   :  { %v1732_v61 = vmul.f32 %v1716_v60, %v3780_v4  ;;  %v1733_v33 = vmul.f32 %v1716_v60, %v3778_v3 }
 0x6ee   :  { %1748 = vst.msk [vmem:[%s4360_s7 + $0x70] sm:$0xff] %vm105_vm1, %v1732_v61 }
 0x6ef   :  { %1749 = vst.msk [vmem:[%s4360_s7 + $0x78] sm:$0x7f] %vm1269_vm5, %v1733_v33 }
 0x7a6   :  { %v2636_v18 = vpop.f32.mrb[18].mxu0 }
 0x7a7   :  { %v2637_v28 = vadd.f32 %v2636_v18, %v3901_v8  ;;  %v3263_v9 = vpop.f32.mrb[19].mxu0 }
 0x7a9   :  { %vm2640_vm3 = vcmp.ge.f32.partialorder %v2637_v28, 0.0  ;;  %v2641_v11 = vmul.f32 0.1, %v2637_v28 }
 0x7ab   :  { %v2642_v26 = vsel %vm2640_vm3, %v2637_v28, %v2641_v11 }
 0x7ac   :  { %3265 = vmatpush3.msk.msra.mxu1 %vm1524_vm2, %v2642_v26 }
 0x7ad   :  { %3267 = vmatmul.mubr.msk.f32.vlgmr.msra.gmra.mrb[24].mxu1 %vm1520_vm4, %v3919_v27 }
 0x880   :  { %v2712_v3 = vpop.f32.mrb[24].mxu1 }
 0x881   :  { %v2713_v4 = vadd.f32 %v2712_v3, %v4038_v36  ;;  %v3268_v29 = vpop.f32.mrb[25].mxu1 }
 0x883   :  { %v2982_v5 = vmul.f32 -1.442695, %v2713_v4 }
 0x885   :  { %3418 = vpow2.f32 %v2982_v5 }
 0x88f   :  { %v3419_v59 = vpop.eup %3418 }
 0x890   :  { %v2719_v7 = vadd.f32 1.0, %v3419_v59 }
 0x892   :  { %3420 = vrcp.f32 %v2719_v7 }
 0x89c   :  { %v3421_v14 = vpop.eup %3420 }
 0x89d   :  { %v2730_v8 = vrot.slane %v3421_v14, %v4106_v15  ;;  %v2723_v16 = vcombine.high %v3421_v14, %v3421_v14 }
 0x89f   :  { %v2746_v47 = vrot.slane %v2730_v8, %v4106_v15  ;;  %v2738_v63 = vcombine.high %v2730_v8, %v2730_v8  ;;  %v2737_v22 = vrot.slane %v2723_v16, %v4106_v15 }
 0x8a1   :  { %v2775_v27 = vrot.slane %v2746_v47, %v4119_v31  ;;  %v2760_v32 = vrot.slane %v2738_v63, %v4106_v15  ;;  %v2768_v36 = vcombine.high %v2746_v47, %v2746_v47  ;;  %v2739_v17 = vcombine.high %v2737_v22, %v2737_v22 }
 0x8a2   :  { %v2753_v51 = vrot.slane %v2737_v22, %v4106_v15 }
 0x8a3   :  { %2805 = vperm.xlu1 %3413, %v2775_v27   ;;  %v2779_v37 = vrot.slane %v2760_v32, %v4119_v31  ;;  %v2770_v30 = vcombine.high %v2760_v32, %v2760_v32  ;;  %v2783_v34 = vrot.slane %v2768_v36, %v4119_v31  ;;  %v2767_v41 = vrot.slane %v2739_v17, %v4106_v15 }
 0x8a4   :  { %v2791_v55 = vrot.slane %v2753_v51, %v4119_v31  ;;  %v2769_v53 = vcombine.high %v2753_v51, %v2753_v51 }
 0x8a5   :  { %2809 = vperm.xlu0 %3412, %v2779_v37   ;;  %v2787_v52 = vrot.slane %v2770_v30, %v4119_v31  ;;  %v2795_v35 = vrot.slane %v2767_v41, %v4119_v31  ;;  %v2771_v56 = vcombine.high %v2767_v41, %v2767_v41 }
 0x8a6   :  { %v2799_v38 = vrot.slane %v2769_v53, %v4119_v31 }
 0x8a7   :  { %2813 = vperm.xlu1 %3413, %v2783_v34   ;;  %v2803_v49 = vrot.slane %v2771_v56, %v4119_v31 }
 0x8a9   :  { %2817 = vperm.xlu0 %3412, %v2787_v52  }
 0x8ab   :  { %2821 = vperm.xlu1 %3413, %v2791_v55  }
 0x8ad   :  { %2825 = vperm.xlu0 %3412, %v2795_v35  }
 0x8af   :  { %2829 = vperm.xlu1 %3413, %v2799_v38  }
 0x8b1   :  { %2833 = vperm.xlu0 %3412, %v2803_v49  }
 0x922   :  { %v2806_v43 = vpop.permute.xlu1 %2805 }
 0x923   :  { %v2836_v57 = vmul.f32 %v2806_v43, %v3946_v46  ;;  %v2837_v15 = vmul.f32 %v2806_v43, %v3940_v42 }
 0x924   :  { %v2810_v10 = vpop.permute.xlu0 %2809 }
 0x925   :  { %2983 = vst.msk [vmem:[%s4360_s7 + $0x80] sm:$0xff] %vm105_vm1, %v2836_v57  ;;  %v2838_v23 = vmul.f32 %v2810_v10, %v4051_v1  ;;  %v2839_v31 = vmul.f32 %v2810_v10, %v4049_v62 }
 0x926   :  { %2984 = vst.msk [vmem:[%s4360_s7 + $0x88] sm:$0x7f] %vm1269_vm5, %v2837_v15  ;;  %v2814_v54 = vpop.permute.xlu1 %2813 }
 0x927   :  { %2985 = vst.msk [vmem:[%s4360_s7 + $0x90] sm:$0xff] %vm105_vm1, %v2838_v23  ;;  %v2840_v42 = vmul.f32 %v2814_v54, %v3976_v6  ;;  %v2841_v46 = vmul.f32 %v2814_v54, %v3970_v0 }
 0x928   :  { %2986 = vst.msk [vmem:[%s4360_s7 + $0x98] sm:$0x7f] %vm1269_vm5, %v2839_v31  ;;  %v2818_v39 = vpop.permute.xlu0 %2817 }
 0x929   :  { %2987 = vst.msk [vmem:[%s4360_s7 + $0xa0] sm:$0xff] %vm105_vm1, %v2840_v42  ;;  %v2842_v62 = vmul.f32 %v2818_v39, %v4067_v25  ;;  %v2843_v1 = vmul.f32 %v2818_v39, %v4065_v20 }
 0x92a   :  { %2988 = vst.msk [vmem:[%s4360_s7 + $0xa8] sm:$0x7f] %vm1269_vm5, %v2841_v46  ;;  %v2822_v40 = vpop.permute.xlu1 %2821 }
 0x92b   :  { %2989 = vst.msk [vmem:[%s4360_s7 + $0xb0] sm:$0xff] %vm105_vm1, %v2842_v62  ;;  %v2844_v0 = vmul.f32 %v2822_v40, %v4000_v24  ;;  %v2845_v6 = vmul.f32 %v2822_v40, %v3994_v21  ;;  %v4371_v21 = vld [vmem:[#allocation4_spill] sm:$0xff] }
 0x92c   :  { %2990 = vst.msk [vmem:[%s4360_s7 + $0xb8] sm:$0x7f] %vm1269_vm5, %v2843_v1  ;;  %v2826_v19 = vpop.permute.xlu0 %2825 }
 0x92d   :  { %2991 = vst.msk [vmem:[%s4360_s7 + $0xc0] sm:$0xff] %vm105_vm1, %v2844_v0  ;;  %v2846_v20 = vmul.f32 %v2826_v19, %v4083_v50  ;;  %v2847_v25 = vmul.f32 %v2826_v19, %v4081_v2  ;;  %v4373_v2 = vld [vmem:[#allocation6_spill] sm:$0xff] }
 0x92e   :  { %2992 = vst.msk [vmem:[%s4360_s7 + $0xc8] sm:$0x7f] %vm1269_vm5, %v2845_v6  ;;  %v2830_v44 = vpop.permute.xlu1 %2829 }
 0x92f   :  { %2993 = vst.msk [vmem:[%s4360_s7 + $0xd0] sm:$0xff] %vm105_vm1, %v2846_v20  ;;  %v2848_v24 = vmul.f32 %v2830_v44, %v4371_v21  ;;  %v2849_v48 = vmul.f32 %v2830_v44, %v4372_v45 }
 0x930   :  { %2994 = vst.msk [vmem:[%s4360_s7 + $0xd8] sm:$0x7f] %vm1269_vm5, %v2847_v25  ;;  %v2834_v58 = vpop.permute.xlu0 %2833 }
 0x931   :  { %2995 = vst.msk [vmem:[%s4360_s7 + $0xe0] sm:$0xff] %vm105_vm1, %v2848_v24  ;;  %v2850_v50 = vmul.f32 %v2834_v58, %v4373_v2  ;;  %v2851_v12 = vmul.f32 %v2834_v58, %v4374_v13 }
 0x932   :  { %2996 = vst.msk [vmem:[%s4360_s7 + $0xe8] sm:$0x7f] %vm1269_vm5, %v2849_v48 }
 0x933   :  { %2997 = vst.msk [vmem:[%s4360_s7 + $0xf0] sm:$0xff] %vm105_vm1, %v2850_v50 }
 0x934   :  { %2998 = vst.msk [vmem:[%s4360_s7 + $0xf8] sm:$0x7f] %vm1269_vm5, %v2851_v12 }

// kernel: dwtrans_forward.2
= control target key start
LH: loop header
LB: loop body
LE: loop exit
PB: predicated region body
PF: predicated region fallthrough
CT: control target
= control target key end

     0   :  { %12 = vsyncpa [#allocation3], 0  ;;  %s6434_s24 = smov 0   ;;  %s8147_s0 = inlined_call_operand.vmem [shape: f32[8,9], index: 0, kind: input, shape index: {}]   ;;  %s8148_s1 = inlined_call_operand.vmem [shape: f32[2,8,8,8], index: 1, kind: input, shape index: {}]   ;;  %s8149_s2 = inlined_call_operand.vmem [shape: f32[17,8], index: 2, kind: input, shape index: {}]   ;;  %s8150_s3 = inlined_call_operand.vmem [shape: f32[8,15], index: 3, kind: input, shape index: {}]   ;;  %s8151_s4 = inlined_call_operand.vmem [shape: f32[7,15], index: 4, kind: input, shape index: {}]   ;;  %s8152_s5 = inlined_call_operand.vmem [shape: f32[15,8], index: 5, kind: input, shape index: {}]   ;;  %s8153_s6 = inlined_call_operand.vmem [shape: f32[15,7], index: 6, kind: input, shape index: {}]   ;;  %s8154_s7 = inlined_call_operand.vmem [shape: f32[2,17,15,15], index: 7, kind: output, shape index: {}]  }
   0x1 LB: > { %s5718_s25 = sadd.s32 4294967295, %s6378_s24   ;;  %p5720_p0 = scmp.ge.s32.totalorder %s6378_s24, 1  ;;  %s6378_s24 = sphi %s6434_s24, %s18_s24  }
   0x2   : > { %p201_p1 = scmp.lt.s32.totalorder %s6378_s24, 3  ;;  %s214_s28 = sshll.u32 %s8147_s0, 4  ;;  %s215_s28 = int_to_ptr.vmem [resolvable:$true] %s214_s28 }
   0x3   : > { %p6300_p3 = scmp.eq.s32.totalorder %s5718_s25, 0  ;;  %s6353_s30 = scalar_lea.vmem %s215_s28, 128 }
   0x4   : > { %p6445_p2 = pnand %p5720_p0, %p201_p1  ;;  %p6354_p6 = scmp.ne.s32.totalorder %s215_s28, %s6353_s30 }
   0x5   : > { %p6361_p10 = scmp.lt.s32.totalorder %s215_s28, %s215_s28  ;;  %p6362_p11 = scmp.lt.s32.totalorder %s6353_s30, %s6353_s30 }
   0x6   : > { %p6296_p4 = pneg %p6445_p2 }
   0x7   : > { %p6363_p12 = por %p6362_p11, %p6361_p10 }
   0x8   : > { %p6297_p5 = pnand %p6300_p3, %p6296_p4 }
   0xa   : > { %p6355_p7 = pneg %p6297_p5 }
   0xc   : > { %p6356_p8 = pnand %p6355_p7, %p6354_p6 }
   0xe   : > { %p6357_p9 = pneg %p6356_p8 }
  0x10   : > { %p6364_p13 = pnand %p6363_p12, %p6357_p9 }
  0x12   : > { %6367 = shalt.err (!%p6364_p13)
}
  0x13   : > { %s6380_s8 = smov [#allocation2]   ;;  %250 = sbr.rel (%p6445_p2) target bundleno = 2382 (0x94e), region = 48 }
  0x14   : > { %6299 = dma.vmem_to_smem (!%p6297_p5), %s215_s28, 128, %s6380_s8, [#allocation3]  }
  0x1a   : > { %6373 = dma.done.wait (%p6300_p3), [#allocation3], 128  }
  0x1b   : > { %6375 = vsyncadd (%p6300_p3), [#allocation3], 4294967168 }
  0x1c   : > { %256 = sfence }
  0x1d   : > { %p283_p0 = scmp.lt.s32.totalorder %s5718_s25, 1  ;;  %s5729_s9 = sld [smem:[#allocation2 + $0x2]]  ;;  %v6475_v8 = vld [vmem:[%s8151_s4] sm:$0x7f]  ;;  %vm367_vm0 = vcmask 1046528   ;;  %v8155_v9 = vmov 0.0  }
  0x1e   : > { %s5732_s10 = sld [smem:[#allocation2 + $0x5]]  ;;  %s5735_s11 = sld [smem:[#allocation2 + $0x8]]  ;;  %6003 = vmatprep.subr.mxu0 %v8155_v9  ;;  %vm6383_vm1 = vmmov 0   ;;  %6013 = vmatprep.subr.mxu1 %v8155_v9  ;;  %vm364_vm2 = vcmask 56320   ;;  %v6507_v34 = vld [vmem:[%s8150_s3] sm:$0xff]  ;;  %vm441_vm3 = vcmask 64512  }
  0x1f   : > { %s8467_s25 = smov (!%p283_p0, %s5718_s25), 1  ;;  %s6381_s16 = smov 1   ;;  %6004 = vmatpush3.msk.msra.mxu0 %vm367_vm0, %v6475_v8  ;;  %6005 = vmatprep.mubr.msk.f32.mxu0 %vm6383_vm1, %v8155_v9  ;;  %vm5617_vm4 = vcmask 120832   ;;  %vm5615_vm5 = vcmask 121856  }
  0x20   : > { %s5890_s12 = sshll.u32 %s8467_s25, 6  ;;  %6015 = vmatprep.mubr.msk.f32.mxu1 %vm6383_vm1, %v8155_v9  ;;  %6014 = vmatpush3.msk.msra.mxu1 %vm367_vm0, %v6475_v8  ;;  %s5733_s19 = sld [smem:[#allocation2 + $0x6]] }
  0x21   : > { %s6462_s15 = scalar_lea.vmem %s8148_s1, %s5890_s12  ;;  %6008 = vmatprep.subr.mxu0 %v8155_v9  ;;  %6018 = vmatprep.subr.mxu1 %v8155_v9  ;;  %s310_s20 = sld [smem:[#allocation2]] }
  0x22   : > { %v6465_v0 = vld [vmem:[%s6462_s15] sm:$0xff]  ;;  %s5730_s21 = sld [smem:[#allocation2 + $0x3]]  ;;  %s5756_s22 = sld [smem:[#allocation2 + $0x88]]  ;;  %v6494_v18 = vld [vmem:[%s6462_s15 + $0x8] sm:$0xff]  ;;  %v6526_v56 = vld [vmem:[%s6462_s15 + $0x10] sm:$0xff] }
  0x23   : > { %v340_v1 = vstv %s5729_s9  ;;  %s5750_s23 = sld [smem:[#allocation2 + $0x82]]  ;;  %s5753_s26 = sld [smem:[#allocation2 + $0x85]] }
  0x24   : > { %v341_v2 = vmul.f32 %v340_v1, %v6465_v0  ;;  %v323_v3 = vstv %s5732_s10  ;;  %v353_v5 = vstv %s5735_s11  ;;  %s6384_s27 = smov 127   ;;  %s5734_s28 = sld [smem:[#allocation2 + $0x7]] }
  0x25   : > { %v324_v4 = vmul.f32 %v323_v3, %v6465_v0  ;;  %v354_v6 = vmul.f32 %v353_v5, %v6465_v0  ;;  %s5728_s29 = sld [smem:[#allocation2 + $0x1]]  ;;  %s5731_s30 = sld [smem:[#allocation2 + $0x4]] }
  0x26   : > { %343 = vrot.lane.b32.xlu0 %v341_v2, %s6381_s16  ;;  %v347_v10 = vstv %s5733_s19  ;;  %s5754_s8 = sld [smem:[#allocation2 + $0x86]]  ;;  %s5748_s9 = sld [smem:[#allocation2 + $0x80]] }
  0x27   : > { %326 = vrot.lane.b32.xlu1 %v324_v4, %s6381_s16  ;;  %v356_v7 = vrot.slane %v354_v6, 7  ;;  %v338_v11 = vstv %s310_s20  ;;  %v348_v13 = vmul.f32 %v347_v10, %v6465_v0  ;;  %s5751_s12 = sld [smem:[#allocation2 + $0x83]]  ;;  %s5776_s13 = sld [smem:[#allocation2 + $0x108]]  ;;  %v6545_v4 = vld [vmem:[%s8153_s6] sm:$0xff] }
  0x28   : > { %v321_v12 = vstv %s5730_s21  ;;  %v339_v14 = vmul.f32 %v338_v11, %v6465_v0  ;;  %v1192_v15 = vstv %s5756_s22  ;;  %s5770_s14 = sld [smem:[#allocation2 + $0x102]]  ;;  %s5773_s17 = sld [smem:[#allocation2 + $0x105]] }
  0x29   : > { %v322_v16 = vmul.f32 %v321_v12, %v6465_v0  ;;  %v350_v17 = vrot.slane %v348_v13, 7  ;;  %v1193_v20 = vmul.f32 %v1192_v15, %v6494_v18  ;;  %v1179_v28 = vstv %s5750_s23  ;;  %s5774_s20 = sld [smem:[#allocation2 + $0x106]]  ;;  %s5768_s21 = sld [smem:[#allocation2 + $0x100]] }
  0x2a   : > { %357 = vrot.lane.b32.xlu0 %v356_v7, %s6381_s16  ;;  %v1180_v30 = vmul.f32 %v1179_v28, %v6494_v18  ;;  %v1162_v31 = vstv %s5753_s26  ;;  %v332_v33 = vstv %s5734_s28  ;;  %s5752_s22 = sld [smem:[#allocation2 + $0x84]]  ;;  %s5771_s23 = sld [smem:[#allocation2 + $0x103]] }
  0x2b   : > { %v1195_v25 = vrot.slane %v1193_v20, 7  ;;  %v1163_v32 = vmul.f32 %v1162_v31, %v6494_v18  ;;  %v333_v35 = vmul.f32 %v332_v33, %v6465_v0  ;;  %v330_v37 = vstv %s5728_s29  ;;  %s5796_s26 = sld [smem:[#allocation2 + $0x188]]  ;;  %s5790_s28 = sld [smem:[#allocation2 + $0x182]] }
  0x2c   : > { %v319_v38 = vstv %s5731_s30  ;;  %v1186_v39 = vstv %s5754_s8  ;;  %v331_v40 = vmul.f32 %v330_v37, %v6465_v0  ;;  %v1177_v42 = vstv %s5748_s9  ;;  %s5793_s29 = sld [smem:[#allocation2 + $0x185]]  ;;  %s5755_s30 = sld [smem:[#allocation2 + $0x87]] }
  0x2d   : > { %v335_v41 = vrot.slane %v333_v35, 7  ;;  %v320_v43 = vmul.f32 %v319_v38, %v6465_v0  ;;  %v1187_v44 = vmul.f32 %v1186_v39, %v6494_v18  ;;  %v1178_v46 = vmul.f32 %v1177_v42, %v6494_v18  ;;  %v6574_v39 = vld [vmem:[%s8153_s6 + $0x8] sm:$0x7f]  ;;  %s5749_s10 = sld [smem:[#allocation2 + $0x81]]  ;;  %s5788_s18 = sld [smem:[#allocation2 + $0x180]] }
  0x2e   : > { %v1160_v48 = vstv %s5751_s12  ;;  %v1830_v51 = vstv %s5776_s13  ;;  %v1817_v62 = vstv %s5770_s14  ;;  %v1800_v2 = vstv %s5773_s17  ;;  %s5794_s17 = sld [smem:[#allocation2 + $0x186]]  ;;  %s5791_s19 = sld [smem:[#allocation2 + $0x183]] }
  0x2f   : > { %v337_v47 = vadd.f32 %v335_v41, %v331_v40  ;;  %v1189_v49 = vrot.slane %v1187_v44, 7  ;;  %v1161_v54 = vmul.f32 %v1160_v48, %v6494_v18  ;;  %v1831_v58 = vmul.f32 %v1830_v51, %v6526_v56  ;;  %v6580_v41 = vld [vmem:[%s8152_s5] sm:$0xff]  ;;  %v6592_v44 = vld [vmem:[%s8152_s5 + $0x8] sm:$0x7f]  ;;  %s5830_s8 = sld [smem:[#allocation2 + $0x282]]  ;;  %s5833_s9 = sld [smem:[#allocation2 + $0x285]] }
  0x30   : > { %v1818_v1 = vmul.f32 %v1817_v62, %v6526_v56  ;;  %v1801_v3 = vmul.f32 %v1800_v2, %v6526_v56  ;;  %v1824_v5 = vstv %s5774_s20  ;;  %v1815_v7 = vstv %s5768_s21  ;;  %s5816_s20 = sld [smem:[#allocation2 + $0x208]]  ;;  %s5810_s21 = sld [smem:[#allocation2 + $0x202]] }
  0x31   : > { %v592_v53 = vrot.slane %v337_v47, 1  ;;  %v1833_v0 = vrot.slane %v1831_v58, 7  ;;  %v1825_v10 = vmul.f32 %v1824_v5, %v6526_v56  ;;  %v1158_v12 = vstv %s5752_s22  ;;  %s5813_s22 = sld [smem:[#allocation2 + $0x205]]  ;;  %s5769_s11 = sld [smem:[#allocation2 + $0x101]] }
  0x32   : > { %v1816_v13 = vmul.f32 %v1815_v7, %v6526_v56  ;;  %v2438_v33 = vstv %s5793_s29  ;;  %v1171_v42 = vstv %s5755_s30  ;;  %s5811_s29 = sld [smem:[#allocation2 + $0x203]]  ;;  %s5836_s30 = sld [smem:[#allocation2 + $0x288]] }
  0x33   : > { %v1827_v15 = vrot.slane %v1825_v10, 7  ;;  %s5834_s12 = sld [smem:[#allocation2 + $0x286]]  ;;  %s5828_s13 = sld [smem:[#allocation2 + $0x280]] }
  0x34   : > { %s5831_s14 = sld [smem:[#allocation2 + $0x283]] }
  0x98   : > { %v344_v19 = vpop.permute.xlu0 %343 }
  0x99   : > { %v346_v21 = vadd.f32 %v344_v19, %v339_v14  ;;  %v327_v22 = vpop.permute.xlu1 %326  ;;  %v1798_v14 = vstv %s5771_s23  ;;  %v2468_v19 = vstv %s5796_s26  ;;  %s5772_s23 = sld [smem:[#allocation2 + $0x104]]  ;;  %s5814_s26 = sld [smem:[#allocation2 + $0x206]] }
  0x9a   : > { %v329_v23 = vadd.f32 %v327_v22, %v322_v16  ;;  %v1159_v16 = vmul.f32 %v1158_v12, %v6494_v18  ;;  %v3076_v12 = vstv %s5813_s22  ;;  %s5848_s22 = sld [smem:[#allocation2 + $0x300]] }
  0x9b   : > { %v352_v24 = vadd.f32 %v350_v17, %v346_v21  ;;  %v1799_v21 = vmul.f32 %v1798_v14, %v6526_v56 }
  0x9c   : > { %362 = vrot.lane.b32.xlu0 %v329_v23, %s6384_s27  ;;  %v358_v26 = vpop.permute.xlu0 %357  ;;  %v6558_v23 = vld [vmem:[%s6462_s15 + $0x18] sm:$0xff] }
  0x9d   : > { %v360_v27 = vadd.f32 %v358_v26, %v352_v24  ;;  %v2439_v35 = vmul.f32 %v2438_v33, %v6558_v23  ;;  %v6643_v33 = vld [vmem:[%s6462_s15 + $0x28] sm:$0xff] }
  0x9f   : > { %v516_v29 = vrot.slane %v360_v27, 1 }
  0xa0   : > { %1196 = vrot.lane.b32.xlu0 %v1195_v25, %s6381_s16  ;;  %v2469_v25 = vmul.f32 %v2468_v19, %v6558_v23  ;;  %v3100_v19 = vstv %s5814_s26  ;;  %s5876_s26 = sld [smem:[#allocation2 + $0x388]] }
  0xa1   : > { %517 = vrot.lane.b32.xlu1 %v516_v29, %s6384_s27  ;;  %v2455_v29 = vstv %s5790_s28  ;;  %s5808_s28 = sld [smem:[#allocation2 + $0x200]] }
  0xa2   : > { %v2471_v31 = vrot.slane %v2469_v25, 7 }
  0xa5   : > { %1182 = vrot.lane.b32.xlu1 %v1180_v30, %s6381_s16 }
  0xa9   : > { %1165 = vrot.lane.b32.xlu1 %v1163_v32, %s6381_s16  ;;  %v2456_v32 = vmul.f32 %v2455_v29, %v6558_v23  ;;  %v3744_v29 = vstv %s5836_s30  ;;  %s5870_s30 = sld [smem:[#allocation2 + $0x382]] }
 0x10e   : > { %v363_v36 = vpop.permute.xlu0 %362 }
 0x10f   : > { %6006 = vmatmul.mubr.msk.f32.vlgmr.msra.gmra.mrb[0].mxu0 %vm364_vm2, %v363_v36 }
 0x110   : > { %6009 = vmatpush3.msra.mxu0 %v6507_v34  ;;  %6010 = vmatprep.mubr.msk.f32.mxu0 %vm6383_vm1, %v8155_v9 }
 0x112   : > { %v1197_v55 = vpop.permute.xlu0 %1196 }
 0x113   : > { %v518_v45 = vpop.permute.xlu1 %517 }
 0x114   : > { %6016 = vmatmul.mubr.msk.f32.vlgmr.msra.gmra.mrb[0].mxu1 %vm364_vm2, %v518_v45  ;;  %v1169_v45 = vstv %s5749_s10  ;;  %s5775_s10 = sld [smem:[#allocation2 + $0x107]] }
 0x115   : > { %6019 = vmatpush3.msra.mxu1 %v6507_v34  ;;  %6020 = vmatprep.mubr.msk.f32.mxu1 %vm6383_vm1, %v8155_v9 }
 0x116   : > { %6033 = vmatprep.subr.mxu1 %v8155_v9 }
 0x117   : > { %6011 = vmatmul.mubr.msk.f32.vlgmr.msra.gmra.mrb[0].mxu0 %vm441_vm3, %v320_v43  ;;  %v1183_v50 = vpop.permute.xlu1 %1182  ;;  %v1172_v43 = vmul.f32 %v1171_v42, %v6494_v18  ;;  %v3731_v42 = vstv %s5830_s8  ;;  %s5873_s8 = sld [smem:[#allocation2 + $0x385]] }
 0x118   : > { %v1185_v52 = vadd.f32 %v1183_v50, %v1178_v46  ;;  %6025 = vmatprep.mubr.msk.f32.mxu0 %vm364_vm2, %v6545_v4  ;;  %v1170_v46 = vmul.f32 %v1169_v45, %v6494_v18  ;;  %v2453_v50 = vstv %s5788_s18  ;;  %s5850_s18 = sld [smem:[#allocation2 + $0x302]] }
 0x119   : > { %v1174_v47 = vrot.slane %v1172_v43, 7 }
 0x11a   : > { %v1191_v57 = vadd.f32 %v1189_v49, %v1185_v52  ;;  %v2462_v49 = vstv %s5794_s17  ;;  %s5856_s17 = sld [smem:[#allocation2 + $0x308]] }
 0x11b   : > { %v1166_v59 = vpop.permute.xlu1 %1165  ;;  %v1176_v48 = vadd.f32 %v1174_v47, %v1170_v46  ;;  %v2463_v52 = vmul.f32 %v2462_v49, %v6558_v23  ;;  %v3732_v46 = vmul.f32 %v3731_v42, %v6643_v33  ;;  %v3714_v47 = vstv %s5833_s9  ;;  %s7390_s9 = sld [smem:[#allocation2 + $0x281]] }
 0x11c   : > { %v1199_v60 = vadd.f32 %v1197_v55, %v1191_v57  ;;  %6021 = vmatmul.mubr.msk.f32.vlgmr.msra.gmra.mrb[0].mxu1 %vm441_vm3, %v592_v53  ;;  %v1168_v61 = vadd.f32 %v1166_v59, %v1161_v54  ;;  %v2454_v54 = vmul.f32 %v2453_v50, %v6558_v23  ;;  %v2436_v55 = vstv %s5791_s19  ;;  %s5853_s19 = sld [smem:[#allocation2 + $0x305]] }
 0x11d   : > { %6034 = vmatpush3.msk.msra.mxu1 %vm367_vm0, %v6475_v8  ;;  %6035 = vmatprep.mubr.msk.f32.mxu1 %vm6383_vm1, %v8155_v9  ;;  %v1425_v18 = vrot.slane %v1176_v48, 1  ;;  %v2465_v57 = vrot.slane %v2463_v52, 7  ;;  %v3106_v59 = vstv %s5816_s20  ;;  %v3715_v48 = vmul.f32 %v3714_v47, %v6643_v33  ;;  %s5792_s20 = sld [smem:[#allocation2 + $0x184]]  ;;  %v299_v47 = vld [vmem:[%s8149_s2] sm:$0xff] }
 0x11e   : > { %v1349_v63 = vrot.slane %v1199_v60, 1  ;;  %1201 = vrot.lane.b32.xlu1 %v1168_v61, %s6384_s27  ;;  %6038 = vmatprep.subr.mxu1 %v8155_v9  ;;  %v2437_v61 = vmul.f32 %v2436_v55, %v6558_v23  ;;  %v1809_v52 = vstv %s5775_s10  ;;  %v1807_v55 = vstv %s5769_s11  ;;  %s5789_s11 = sld [smem:[#allocation2 + $0x181]] }
 0x120   : > { %1350 = vrot.lane.b32.xlu0 %v1349_v63, %s6384_s27  ;;  %v6623_v63 = vld [vmem:[%s6462_s15 + $0x20] sm:$0xff] }
 0x122   : > { %1834 = vrot.lane.b32.xlu1 %v1833_v0, %s6381_s16 }
 0x124   : > { %1820 = vrot.lane.b32.xlu0 %v1818_v1, %s6381_s16  ;;  %v3107_v1 = vmul.f32 %v3106_v59, %v6623_v63 }
 0x126   : > { %v3109_v10 = vrot.slane %v3107_v1, 7 }
 0x128   : > { %1803 = vrot.lane.b32.xlu0 %v1801_v3, %s6381_s16 }
 0x190   : > { %v1202_v6 = vpop.permute.xlu1 %1201 }
 0x191   : > { %6036 = vmatmul.mubr.msk.f32.vlgmr.msra.gmra.mrb[2].mxu1 %vm364_vm2, %v1202_v6  ;;  %v3093_v6 = vstv %s5810_s21  ;;  %s5854_s21 = sld [smem:[#allocation2 + $0x306]] }
 0x192   : > { %v1351_v11 = vpop.permute.xlu0 %1350  ;;  %6039 = vmatpush3.msra.mxu1 %v6507_v34  ;;  %6040 = vmatprep.mubr.msk.f32.mxu1 %vm6383_vm1, %v8155_v9 }
 0x194   : > { %v1835_v22 = vpop.permute.xlu1 %1834 }
 0x196   : > { %v1821_v17 = vpop.permute.xlu0 %1820 }
 0x197   : > { %v1823_v20 = vadd.f32 %v1821_v17, %v1816_v13  ;;  %v3077_v13 = vmul.f32 %v3076_v12, %v6623_v63  ;;  %v308_v12 = vld [vmem:[%s6462_s15 + $0x30] sm:$0xff] }
 0x199   : > { %v1829_v24 = vadd.f32 %v1827_v15, %v1823_v20  ;;  %6041 = vmatmul.mubr.msk.f32.vlgmr.msra.gmra.mrb[2].mxu1 %vm441_vm3, %v1159_v16  ;;  %v1796_v15 = vstv %s5772_s23  ;;  %v3091_v20 = vstv %s5808_s28  ;;  %s5851_s23 = sld [smem:[#allocation2 + $0x303]]  ;;  %s5832_s28 = sld [smem:[#allocation2 + $0x284]] }
 0x19a   : > { %v1804_v26 = vpop.permute.xlu0 %1803  ;;  %6055 = vmatprep.mubr.msk.f32.mxu1 %vm364_vm2, %v6545_v4  ;;  %v1797_v17 = vmul.f32 %v1796_v15, %v6526_v56  ;;  %v3092_v25 = vmul.f32 %v3091_v20, %v6623_v63 }
 0x19b   : > { %v1837_v27 = vadd.f32 %v1835_v22, %v1829_v24  ;;  %v1806_v28 = vadd.f32 %v1804_v26, %v1799_v21  ;;  %v3101_v21 = vmul.f32 %v3100_v19, %v6623_v63  ;;  %v3074_v26 = vstv %s5811_s29 }
 0x19c   : > { %v4369_v19 = vstv %s5850_s18  ;;  %s7566_s18 = sld [smem:[#allocation2 + $0x307]] }
 0x19d   : > { %v1987_v30 = vrot.slane %v1837_v27, 1  ;;  %1839 = vrot.lane.b32.xlu0 %v1806_v28, %s6384_s27  ;;  %v3103_v27 = vrot.slane %v3101_v21, 7 }
 0x19f   : > { %1988 = vrot.lane.b32.xlu1 %v1987_v30, %s6384_s27 }
 0x1a1   : > { %2472 = vrot.lane.b32.xlu0 %v2471_v31, %s6381_s16  ;;  %v3075_v31 = vmul.f32 %v3074_v26, %v6623_v63 }
 0x1a3   : > { %2458 = vrot.lane.b32.xlu1 %v2456_v32, %s6381_s16 }
 0x1a7   : > { %2441 = vrot.lane.b32.xlu1 %v2439_v35, %s6381_s16 }
 0x1ea   : > { %v511_v36 = vpop.f32.mrb[0].mxu0 }
 0x1eb   : > { %v6012_v37 = vpop.f32.mrb[1].mxu0 }
 0x1ef   : > { %v661_v38 = vpop.f32.mrb[0].mxu1 }
 0x1f0   : > { %v6022_v40 = vpop.f32.mrb[1].mxu1  ;;  %6023 = vmatprep.subr.msk.mxu0 %vm367_vm0, %v661_v38 }
 0x1f1   : > { %6024 = vmatpush3.msk.msra.mxu0 %vm367_vm0, %v661_v38 }
 0x1f2   : > { %6026 = vmatmul.mubr.msk.f32.vlgmr.msra.gmra.mrb[2].mxu0 %vm364_vm2, %v6574_v39  ;;  %6028 = vmatprep.subr.mxu0 %v511_v36 }
 0x1f3   : > { %6029 = vmatpush3.msra.mxu0 %v511_v36  ;;  %6030 = vmatprep.mubr.msk.f32.mxu0 %vm441_vm3, %v6580_v41  ;;  %v3745_v36 = vmul.f32 %v3744_v29, %v6643_v33 }
 0x1f4   : > { %6043 = vmatprep.subr.mxu0 %v8155_v9 }
 0x1f5   : > { %v3747_v45 = vrot.slane %v3745_v36, 7 }
 0x1fa   : > { %6031 = vmatmul.mubr.msk.f32.vlgmr.msra.gmra.mrb[2].mxu0 %vm441_vm3, %v6592_v44 }
 0x1fb   : > { %6044 = vmatpush3.msk.msra.mxu0 %vm367_vm0, %v6475_v8  ;;  %6045 = vmatprep.mubr.msk.f32.mxu0 %vm6383_vm1, %v8155_v9 }
 0x1fc   : > { %6048 = vmatprep.subr.mxu0 %v8155_v9 }
 0x1fe   : > { %6046 = vmatmul.mubr.msk.f32.vlgmr.msra.gmra.mrb[4].mxu0 %vm364_vm2, %v1351_v11  ;;  %v3094_v11 = vmul.f32 %v3093_v6, %v6623_v63  ;;  %v4382_v6 = vstv %s5856_s17  ;;  %s5852_s17 = sld [smem:[#allocation2 + $0x304]] }
 0x1ff   : > { %6049 = vmatpush3.msra.mxu0 %v6507_v34  ;;  %6050 = vmatprep.mubr.msk.f32.mxu0 %vm6383_vm1, %v8155_v9 }
 0x200   : > { %6063 = vmatprep.subr.mxu0 %v8155_v9 }
 0x206   : > { %6051 = vmatmul.mubr.msk.f32.vlgmr.msra.gmra.mrb[4].mxu0 %vm441_vm3, %v1425_v18 }
 0x207   : > { %6064 = vmatpush3.msk.msra.mxu0 %vm367_vm0, %v6475_v8  ;;  %6065 = vmatprep.mubr.msk.f32.mxu0 %vm6383_vm1, %v8155_v9 }
 0x208   : > { %6068 = vmatprep.subr.mxu0 %v8155_v9 }
 0x20f   : > { %v1840_v51 = vpop.permute.xlu0 %1839 }
 0x210   : > { %6066 = vmatmul.mubr.msk.f32.vlgmr.msra.gmra.mrb[6].mxu0 %vm364_vm2, %v1840_v51 }
 0x211   : > { %v6615_v53 = vpop.permute.xlu1 %1988  ;;  %6069 = vmatpush3.msra.mxu0 %v6507_v34  ;;  %6070 = vmatprep.mubr.msk.f32.mxu0 %vm6383_vm1, %v8155_v9 }
 0x213   : > { %v2473_v62 = vpop.permute.xlu0 %2472 }
 0x215   : > { %v2459_v58 = vpop.permute.xlu1 %2458 }
 0x216   : > { %v2461_v60 = vadd.f32 %v2459_v58, %v2454_v54  ;;  %v1810_v54 = vmul.f32 %v1809_v52, %v6526_v56  ;;  %v6718_v52 = vld [vmem:[%s6462_s15 + $0x38] sm:$0xff] }
 0x218   : > { %v2467_v0 = vadd.f32 %v2465_v57, %v2461_v60  ;;  %6071 = vmatmul.mubr.msk.f32.vlgmr.msra.gmra.mrb[6].mxu0 %vm441_vm3, %v1797_v17  ;;  %v1808_v57 = vmul.f32 %v1807_v55, %v6526_v56  ;;  %v1812_v58 = vrot.slane %v1810_v54, 7  ;;  %v3729_v60 = vstv %s5828_s13  ;;  %s5868_s13 = sld [smem:[#allocation2 + $0x380]] }
 0x219   : > { %v2442_v2 = vpop.permute.xlu1 %2441  ;;  %6085 = vmatprep.mubr.msk.f32.mxu0 %vm364_vm2, %v6545_v4  ;;  %v3730_v1 = vmul.f32 %v3729_v60, %v6643_v33  ;;  %v5020_v54 = vstv %s5876_s26 }
 0x21a   : > { %v2475_v3 = vadd.f32 %v2473_v62, %v2467_v0  ;;  %v2444_v5 = vadd.f32 %v2442_v2, %v2437_v61  ;;  %v1814_v59 = vadd.f32 %v1812_v58, %v1808_v57  ;;  %v3712_v2 = vstv %s5831_s14  ;;  %s5871_s14 = sld [smem:[#allocation2 + $0x383]] }
 0x21c   : > { %v2625_v7 = vrot.slane %v2475_v3, 1  ;;  %2477 = vrot.lane.b32.xlu1 %v2444_v5, %s6384_s27  ;;  %v2063_v56 = vrot.slane %v1814_v59, 1 }
 0x21e   : > { %2626 = vrot.lane.b32.xlu0 %v2625_v7, %s6384_s27 }
 0x220   : > { %3110 = vrot.lane.b32.xlu1 %v3109_v10, %s6381_s16  ;;  %v3713_v10 = vmul.f32 %v3712_v2, %v6643_v33 }
 0x222   : > { %3096 = vrot.lane.b32.xlu0 %v3094_v11, %s6381_s16 }
 0x226   : > { %3079 = vrot.lane.b32.xlu0 %v3077_v13, %s6381_s16 }
 0x26c   : > { %v1344_v14 = vpop.f32.mrb[2].mxu1 }
 0x26d   : > { %v6042_v16 = vpop.f32.mrb[3].mxu1 }
 0x28e   : > { %v2478_v24 = vpop.permute.xlu1 %2477 }
 0x290   : > { %v6638_v22 = vpop.permute.xlu0 %2626 }
 0x292   : > { %v3111_v32 = vpop.permute.xlu1 %3110 }
 0x294   : > { %v3097_v28 = vpop.permute.xlu0 %3096 }
 0x295   : > { %v3099_v30 = vadd.f32 %v3097_v28, %v3092_v25  ;;  %v4352_v25 = vstv %s5853_s19  ;;  %s6967_s19 = sld [smem:[#allocation2 + $0x207]] }
 0x296   : > { %v4353_v26 = vmul.f32 %v4352_v25, %v308_v12 }
 0x297   : > { %v3105_v35 = vadd.f32 %v3103_v27, %v3099_v30  ;;  %v6385_v27 = vmov 0   ;;  %v2434_v30 = vstv %s5792_s20  ;;  %s6983_s20 = sld [smem:[#allocation2 + $0x201]] }
 0x298   : > { %v3080_v37 = vpop.permute.xlu0 %3079  ;;  %6325 = vset.pattern.permute.xlu1 %v6385_v27  ;;  %6324 = vset.pattern.permute.xlu0 %v6385_v27 }
 0x299   : > { %v3113_v38 = vadd.f32 %v3111_v32, %v3105_v35  ;;  %v3082_v40 = vadd.f32 %v3080_v37, %v3075_v31  ;;  %v2435_v31 = vmul.f32 %v2434_v30, %v6558_v23  ;;  %v6386_v32 = vmov 1966171168  }
 0x29a   : > { %v837_v35 = vlaneseq }
 0x29b   : > { %v3263_v43 = vrot.slane %v3113_v38, 1  ;;  %3115 = vrot.lane.b32.xlu0 %v3082_v40, %s6384_s27  ;;  %v4376_v38 = vstv %s5854_s21  ;;  %v4367_v40 = vstv %s5848_s22 }
 0x29c   : > { %v838_v37 = vshrl.u32 %v837_v35, 7  ;;  %v4377_v42 = vmul.f32 %v4376_v38, %v308_v12 }
 0x29d   : > { %3264 = vrot.lane.b32.xlu1 %v3263_v43, %s6384_s27 }
 0x29f   : > { %3748 = vrot.lane.b32.xlu0 %v3747_v45, %s6381_s16 }
 0x2a1   : > { %3734 = vrot.lane.b32.xlu1 %v3732_v46, %s6381_s16 }
 0x2a5   : > { %3717 = vrot.lane.b32.xlu1 %v3715_v48, %s6381_s16  ;;  %v4368_v48 = vmul.f32 %v4367_v40, %v308_v12 }
 0x2cd   : > { %v6653_v18 = vpop.f32.mrb[2].mxu0 }
 0x2ce   : > { %v6655_v49 = vpop.f32.mrb[3].mxu0 }
 0x2d9   : > { %v1494_v50 = vpop.f32.mrb[4].mxu0 }
 0x2da   : > { %v6052_v51 = vpop.f32.mrb[5].mxu0  ;;  %6053 = vmatprep.subr.msk.mxu1 %vm367_vm0, %v1494_v50 }
 0x2db   : > { %6054 = vmatpush3.msk.msra.mxu1 %vm367_vm0, %v1494_v50  ;;  %v4350_v50 = vstv %s5851_s23  ;;  %v4379_v51 = vrot.slane %v4377_v42, 7 }
 0x2dc   : > { %6056 = vmatmul.mubr.msk.f32.vlgmr.msra.gmra.mrb[4].mxu1 %vm364_vm2, %v6574_v39  ;;  %6058 = vmatprep.subr.mxu1 %v1344_v14  ;;  %v4351_v59 = vmul.f32 %v4350_v50, %v308_v12 }
 0x2dd   : > { %6059 = vmatpush3.msra.mxu1 %v1344_v14  ;;  %6060 = vmatprep.mubr.msk.f32.mxu1 %vm441_vm3, %v6580_v41  ;;  %v4383_v14 = vmul.f32 %v4382_v6, %v308_v12 }
 0x2de   : > { %6073 = vmatprep.subr.mxu1 %v8155_v9 }
 0x2df   : > { %v4385_v21 = vrot.slane %v4383_v14, 7 }
 0x2e4   : > { %6061 = vmatmul.mubr.msk.f32.vlgmr.msra.gmra.mrb[4].mxu1 %vm441_vm3, %v6592_v44 }
 0x2e5   : > { %6074 = vmatpush3.msk.msra.mxu1 %vm367_vm0, %v6475_v8  ;;  %6075 = vmatprep.mubr.msk.f32.mxu1 %vm6383_vm1, %v8155_v9 }
 0x2e6   : > { %6078 = vmatprep.subr.mxu1 %v8155_v9 }
 0x2e8   : > { %6076 = vmatmul.mubr.msk.f32.vlgmr.msra.gmra.mrb[6].mxu1 %vm364_vm2, %v6615_v53  ;;  %v3738_v53 = vstv %s5834_s12  ;;  %s5874_s12 = sld [smem:[#allocation2 + $0x386]] }
 0x2e9   : > { %6079 = vmatpush3.msra.mxu1 %v6507_v34  ;;  %6080 = vmatprep.mubr.msk.f32.mxu1 %vm6383_vm1, %v8155_v9  ;;  %v3739_v61 = vmul.f32 %v3738_v53, %v6643_v33  ;;  %v835_v33 = vunpack.c.l.s4 %v6386_v32  ;;  %v5021_v53 = vmul.f32 %v5020_v54, %v6718_v52 }
 0x2ea   : > { %6093 = vmatprep.subr.mxu1 %v8155_v9 }
 0x2eb   : > { %v3741_v3 = vrot.slane %v3739_v61, 7  ;;  %v6702_v28 = vpop.f32.mrb[6].mxu0  ;;  %v836_v36 = vunpack.c.0.s8 %v835_v33  ;;  %v833_v61 = vcombine.high %v299_v47, %v299_v47  ;;  %v5023_v6 = vrot.slane %v5021_v53, 7 }
 0x2ec   : > { %v6072_v29 = vpop.f32.mrb[7].mxu0 }
 0x2ed   : > { %v6708_v43 = vsub.s32 %v836_v36, %v838_v37 }
 0x2ef   : > { %v840_v55 = vrot.slane %v299_v47, %v6708_v43  ;;  %v847_v14 = vrot.slane %v833_v61, %v6708_v43 }
 0x2f0   : > { %6081 = vmatmul.mubr.msk.f32.vlgmr.msra.gmra.mrb[6].mxu1 %vm441_vm3, %v2063_v56 }
 0x2f1   : > { %6094 = vmatpush3.msk.msra.mxu1 %vm367_vm0, %v6475_v8  ;;  %6095 = vmatprep.mubr.msk.f32.mxu1 %vm6383_vm1, %v8155_v9  ;;  %v863_v36 = vrot.slane %v847_v14, %v6708_v43 }
 0x2f2   : > { %6098 = vmatprep.subr.mxu1 %v8155_v9 }
 0x2f3   : > { %v879_v42 = vcombine.high %v863_v36, %v863_v36 }
 0x2f4   : > { %6096 = vmatmul.mubr.msk.f32.vlgmr.msra.gmra.mrb[8].mxu1 %vm364_vm2, %v2478_v24  ;;  %v4370_v24 = vmul.f32 %v4369_v19, %v308_v12 }
 0x2f5   : > { %6099 = vmatpush3.msra.mxu1 %v6507_v34  ;;  %6100 = vmatprep.mubr.msk.f32.mxu1 %vm6383_vm1, %v8155_v9 }
 0x2fc   : > { %6101 = vmatmul.mubr.msk.f32.vlgmr.msra.gmra.mrb[8].mxu1 %vm441_vm3, %v2435_v31 }
 0x2fd   : > { %6115 = vmatprep.mubr.msk.f32.mxu1 %vm364_vm2, %v6545_v4 }
 0x30d   : > { %v6692_v0 = vpop.permute.xlu0 %3115 }
 0x30f   : > { %v6690_v62 = vpop.permute.xlu1 %3264 }
 0x311   : > { %v3749_v11 = vpop.permute.xlu0 %3748 }
 0x313   : > { %v3735_v5 = vpop.permute.xlu1 %3734 }
 0x314   : > { %v3737_v7 = vadd.f32 %v3735_v5, %v3730_v1  ;;  %v848_v1 = vcombine.high %v840_v55, %v840_v55 }
 0x316   : > { %v3743_v13 = vadd.f32 %v3741_v3, %v3737_v7  ;;  %v5007_v7 = vstv %s5870_s30  ;;  %v870_v12 = vrot.slane %v848_v1, %v6708_v43 }
 0x317   : > { %v3718_v15 = vpop.permute.xlu1 %3717 }
 0x318   : > { %v3751_v16 = vadd.f32 %v3749_v11, %v3743_v13  ;;  %v3720_v17 = vadd.f32 %v3718_v15, %v3713_v10  ;;  %v856_v10 = vrot.slane %v840_v55, %v6708_v43  ;;  %v6724_v13 = vsub.s32 0, %v838_v37 }
 0x319   : > { %v5008_v15 = vmul.f32 %v5007_v7, %v6718_v52  ;;  %v880_v19 = vcombine.high %v870_v12, %v870_v12 }
 0x31a   : > { %v3901_v20 = vrot.slane %v3751_v16, 1  ;;  %3753 = vrot.lane.b32.xlu1 %v3720_v17, %s6384_s27  ;;  %v4990_v16 = vstv %s5873_s8  ;;  %v6732_v17 = vrot.slane %v856_v10, %v6724_v13  ;;  %v6750_v29 = vrot.slane %v870_v12, %v6724_v13  ;;  %s7382_s8 = sld [smem:[#allocation2 + $0x287]] }
 0x31b   : > { %v6743_v25 = vrot.slane %v880_v19, %v6724_v13  ;;  %v878_v30 = vcombine.high %v856_v10, %v856_v10  ;;  %v6768_v40 = vrot.slane %v863_v36, %v6724_v13  ;;  %v4988_v12 = vstv %s5871_s14 }
 0x31c   : > { %3902 = vrot.lane.b32.xlu0 %v3901_v20, %s6384_s27  ;;  %8220 = vst [vmem:[#allocation6_spill] sm:$0xff] %v6732_v17  ;;  %v849_v20 = vcombine.high %v847_v14, %v847_v14  ;;  %8222 = vst [vmem:[#allocation8_spill] sm:$0xff] %v6750_v29 }
 0x31d   : > { %8221 = vst [vmem:[#allocation7_spill] sm:$0xff] %v6743_v25  ;;  %v6758_v35 = vrot.slane %v878_v30, %v6724_v13  ;;  %8226 = vst [vmem:[#allocation12_spill] sm:$0xff] %v6768_v40  ;;  %v5747_v30 = vld.sshfl [vmem:[%s8149_s2 + $0x10] sm:$0x1 pattern:$0x75316420] }
 0x31e   : > { %4386 = vrot.lane.b32.xlu1 %v4385_v21, %s6381_s16  ;;  %v6737_v21 = vld [vmem:[%s8149_s2 + $0x8] sm:$0xff] }
 0x31f   : > { %v889_v27 = vrot.slane %v6737_v21, %v6708_v43  ;;  %8224 = vst [vmem:[#allocation10_spill] sm:$0xff] %v6758_v35 }
 0x320   : > { %4372 = vrot.lane.b32.xlu0 %v4370_v24, %s6381_s16  ;;  %v4991_v24 = vmul.f32 %v4990_v16, %v6718_v52 }
 0x321   : > { %v897_v33 = vcombine.high %v889_v27, %v889_v27  ;;  %v905_v50 = vrot.slane %v889_v27, %v6708_v43 }
 0x323   : > { %v919_v38 = vrot.slane %v897_v33, %v6708_v43  ;;  %v927_v54 = vcombine.high %v905_v50, %v905_v50 }
 0x324   : > { %4355 = vrot.lane.b32.xlu0 %v4353_v26, %s6381_s16  ;;  %v877_v26 = vrot.slane %v849_v20, %v6708_v43  ;;  %v4989_v20 = vmul.f32 %v4988_v12, %v6718_v52 }
 0x325   : > { %v6772_v47 = vrot.slane %v919_v38, %v6724_v13 }
 0x326   : > { %v6754_v31 = vrot.slane %v877_v26, %v6724_v13  ;;  %v881_v32 = vcombine.high %v877_v26, %v877_v26 }
 0x327   : > { %8227 = vst [vmem:[#allocation13_spill] sm:$0xff] %v6772_v47 }
 0x328   : > { %8223 = vst [vmem:[#allocation9_spill] sm:$0xff] %v6754_v31  ;;  %v6763_v37 = vrot.slane %v881_v32, %v6724_v13 }
 0x32a   : > { %8225 = vst [vmem:[#allocation11_spill] sm:$0xff] %v6763_v37 }
 0x38c   : > { %v6712_v46 = vpop.permute.xlu1 %3753 }
 0x38e   : > { %v6710_v45 = vpop.permute.xlu0 %3902 }
 0x38f   : > { %8219 = vst [vmem:[#allocation5_spill] sm:$0xff] %v6710_v45 }
 0x390   : > { %v4387_v56 = vpop.permute.xlu1 %4386 }
 0x392   : > { %v4373_v57 = vpop.permute.xlu0 %4372 }
 0x393   : > { %v4375_v58 = vadd.f32 %v4373_v57, %v4368_v48  ;;  %v6776_v48 = vrot.slane %v879_v42, %v6724_v13  ;;  %v6788_v57 = vrot.slane %v927_v54, %v6724_v13 }
 0x395   : > { %v4381_v60 = vadd.f32 %v4379_v51, %v4375_v58  ;;  %8228 = vst [vmem:[#allocation14_spill] sm:$0xff] %v6776_v48  ;;  %v6782_v51 = vrot.slane %v905_v50, %v6724_v13  ;;  %8230 = vst [vmem:[#allocation16_spill] sm:$0xff] %v6788_v57  ;;  %v929_v58 = vcombine.high %v919_v38, %v919_v38 }
 0x396   : > { %v4356_v2 = vpop.permute.xlu0 %4355  ;;  %v944_v50 = vrot.slane %v5747_v30, %v6708_v43 }
 0x397   : > { %v4389_v3 = vadd.f32 %v4387_v56, %v4381_v60  ;;  %v4358_v5 = vadd.f32 %v4356_v2, %v4351_v59  ;;  %8229 = vst [vmem:[#allocation15_spill] sm:$0xff] %v6782_v51  ;;  %v6794_v56 = vrot.slane %v929_v58, %v6724_v13  ;;  %v2445_v2 = vstv %s5789_s11 }
 0x398   : > { %v6858_v58 = vrot.slane %v944_v50, %v6724_v13 }
 0x399   : > { %v4539_v11 = vrot.slane %v4389_v3, 1  ;;  %4391 = vrot.lane.b32.xlu0 %v4358_v5, %s6384_s27  ;;  %8231 = vst [vmem:[#allocation17_spill] sm:$0xff] %v6794_v56  ;;  %v2446_v3 = vmul.f32 %v2445_v2, %v6558_v23 }
 0x39a   : > { %8236 = vst [vmem:[#allocation22_spill] sm:$0xff] %v6858_v58 }
 0x39b   : > { %4540 = vrot.lane.b32.xlu1 %v4539_v11, %s6384_s27 }
 0x39d   : > { %5024 = vrot.lane.b32.xlu0 %v5023_v6, %s6381_s16  ;;  %v5005_v6 = vstv %s5868_s13 }
 0x39f   : > { %5010 = vrot.lane.b32.xlu1 %v5008_v15, %s6381_s16 }
 0x3a1   : > { %1014 = vperm.xlu0 %6324, %v6732_v17  }
 0x3a3   : > { %4993 = vrot.lane.b32.xlu1 %v4991_v24, %s6381_s16  ;;  %s5795_s16 = sld [smem:[#allocation2 + $0x187]] }
 0x3a5   : > { %1026 = vperm.xlu0 %6324, %v6743_v25  }
 0x3a7   : > { %1018 = vperm.xlu1 %6325, %v6750_v29  }
 0x3a9   : > { %1034 = vperm.xlu0 %6324, %v6754_v31   ;;  %v2447_v61 = vstv %s5795_s16 }
 0x3aa   : > { %v2448_v1 = vmul.f32 %v2447_v61, %v6558_v23 }
 0x3ab   : > { %1022 = vperm.xlu1 %6325, %v6758_v35  }
 0x3ac   : > { %v2450_v5 = vrot.slane %v2448_v1, 7  ;;  %v6387_v1 = vmov 1  }
 0x3ad   : > { %1042 = vperm.xlu0 %6324, %v6763_v37  }
 0x3af   : > { %1030 = vperm.xlu1 %6325, %v6768_v40  }
 0x3b1   : > { %1050 = vperm.xlu0 %6324, %v6772_v47  }
 0x3b3   : > { %1038 = vperm.xlu1 %6325, %v6776_v48  }
 0x3b7   : > { %1046 = vperm.xlu1 %6325, %v6782_v51   ;;  %v6785_v55 = vpop.f32.mrb[4].mxu1 }
 0x3b8   : > { %v6790_v59 = vpop.f32.mrb[5].mxu1 }
 0x3bb   : > { %1054 = vperm.xlu1 %6325, %v6788_v57  }
 0x3bf   : > { %1058 = vperm.xlu1 %6325, %v6794_v56  }
 0x3c3   : > { %v2132_v53 = vpop.f32.mrb[6].mxu1 }
 0x3c4   : > { %v6082_v60 = vpop.f32.mrb[7].mxu1  ;;  %6083 = vmatprep.subr.msk.mxu0 %vm367_vm0, %v2132_v53 }
 0x3c5   : > { %6084 = vmatpush3.msk.msra.mxu0 %vm367_vm0, %v2132_v53 }
 0x3c6   : > { %6086 = vmatmul.mubr.msk.f32.vlgmr.msra.gmra.mrb[8].mxu0 %vm364_vm2, %v6574_v39  ;;  %6088 = vmatprep.subr.mxu0 %v6702_v28 }
 0x3c7   : > { %6089 = vmatpush3.msra.mxu0 %v6702_v28  ;;  %6090 = vmatprep.mubr.msk.f32.mxu0 %vm441_vm3, %v6580_v41  ;;  %v2452_v28 = vadd.f32 %v2450_v5, %v2446_v3  ;;  %v6388_v5 = vmov 2  }
 0x3c8   : > { %6103 = vmatprep.subr.mxu0 %v8155_v9 }
 0x3c9   : > { %v2701_v23 = vrot.slane %v2452_v28, 1 }
 0x3ce   : > { %6091 = vmatmul.mubr.msk.f32.vlgmr.msra.gmra.mrb[8].mxu0 %vm441_vm3, %v6592_v44 }
 0x3cf   : > { %6104 = vmatpush3.msk.msra.mxu0 %vm367_vm0, %v6475_v8  ;;  %6105 = vmatprep.mubr.msk.f32.mxu0 %vm6383_vm1, %v8155_v9 }
 0x3d0   : > { %6108 = vmatprep.subr.mxu0 %v8155_v9 }
 0x3d2   : > { %6106 = vmatmul.mubr.msk.f32.vlgmr.msra.gmra.mrb[10].mxu0 %vm364_vm2, %v6638_v22  ;;  %v882_v22 = vcombine.high %v6737_v21, %v6737_v21 }
 0x3d3   : > { %6109 = vmatpush3.msra.mxu0 %v6507_v34  ;;  %6110 = vmatprep.mubr.msk.f32.mxu0 %vm6383_vm1, %v8155_v9 }
 0x3d4   : > { %6123 = vmatprep.subr.mxu0 %v8155_v9  ;;  %v896_v10 = vrot.slane %v882_v22, %v6708_v43 }
 0x3d6   : > { %v912_v15 = vrot.slane %v896_v10, %v6708_v43  ;;  %v898_v36 = vcombine.high %v896_v10, %v896_v10 }
 0x3d8   : > { %v928_v26 = vcombine.high %v912_v15, %v912_v15  ;;  %v926_v54 = vrot.slane %v898_v36, %v6708_v43  ;;  %v6873_v43 = vpop.f32.mrb[8].mxu1 }
 0x3d9   : > { %v6102_v2 = vpop.f32.mrb[9].mxu1 }
 0x3da   : > { %6111 = vmatmul.mubr.msk.f32.vlgmr.msra.gmra.mrb[10].mxu0 %vm441_vm3, %v2701_v23  ;;  %v6848_v42 = vrot.slane %v928_v26, %v6724_v13  ;;  %v6862_v53 = vrot.slane %v926_v54, %v6724_v13  ;;  %v930_v60 = vcombine.high %v926_v54, %v926_v54 }
 0x3db   : > { %6124 = vmatpush3.msk.msra.mxu0 %vm367_vm0, %v6475_v8  ;;  %6125 = vmatprep.mubr.msk.f32.mxu0 %vm6383_vm1, %v8155_v9  ;;  %v5014_v8 = vstv %s5874_s12 }
 0x3dc   : > { %6128 = vmatprep.subr.mxu0 %v8155_v9  ;;  %v5015_v7 = vmul.f32 %v5014_v8, %v6718_v52  ;;  %8234 = vst [vmem:[#allocation20_spill] sm:$0xff] %v6848_v42  ;;  %8237 = vst [vmem:[#allocation23_spill] sm:$0xff] %v6862_v53  ;;  %v6867_v61 = vrot.slane %v930_v60, %v6724_v13 }
 0x3de   : > { %6126 = vmatmul.mubr.msk.f32.vlgmr.msra.gmra.mrb[12].mxu0 %vm364_vm2, %v6692_v0  ;;  %v5017_v14 = vrot.slane %v5015_v7, 7  ;;  %8238 = vst [vmem:[#allocation24_spill] sm:$0xff] %v6867_v61 }
 0x3df   : > { %6129 = vmatpush3.msra.mxu0 %v6507_v34  ;;  %6130 = vmatprep.mubr.msk.f32.mxu0 %vm6383_vm1, %v8155_v9  ;;  %v5006_v34 = vmul.f32 %v5005_v6, %v6718_v52  ;;  %v6853_v52 = vrot.slane %v912_v15, %v6724_v13 }
 0x3e1   : > { %8235 = vst [vmem:[#allocation21_spill] sm:$0xff] %v6853_v52 }
 0x40b   : > { %v6838_v0 = vpop.permute.xlu0 %4391 }
 0x40c   : > { %8233 = vst [vmem:[#allocation19_spill] sm:$0xff] %v6838_v0 }
 0x40d   : > { %v6836_v11 = vpop.permute.xlu1 %4540 }
 0x40e   : > { %8232 = vst [vmem:[#allocation18_spill] sm:$0xff] %v6836_v11 }
 0x40f   : > { %v5025_v21 = vpop.permute.xlu0 %5024 }
 0x411   : > { %v5011_v16 = vpop.permute.xlu1 %5010 }
 0x412   : > { %v5013_v19 = vadd.f32 %v5011_v16, %v5006_v34 }
 0x414   : > { %v5019_v24 = vadd.f32 %v5017_v14, %v5013_v19 }
 0x415   : > { %v4994_v27 = vpop.permute.xlu1 %4993 }
 0x416   : > { %v4996_v32 = vadd.f32 %v4994_v27, %v4989_v20  ;;  %v5027_v33 = vadd.f32 %v5025_v21, %v5019_v24 }
 0x418   : > { %v5177_v38 = vrot.slane %v5027_v33, 1  ;;  %5029 = vrot.lane.b32.xlu1 %v4996_v32, %s6384_s27 }
 0x41a   : > { %5178 = vrot.lane.b32.xlu0 %v5177_v38, %s6384_s27  ;;  %s5812_s27 = sld [smem:[#allocation2 + $0x204]] }
 0x41c   : > { %1070 = vperm.xlu1 %6325, %v6848_v42  }
 0x41e   : > { %1062 = vperm.xlu0 %6324, %v6853_v52  }
 0x420   : > { %1078 = vperm.xlu1 %6325, %v6858_v58   ;;  %v3072_v13 = vstv %s5812_s27  ;;  %v1015_v8 = vpop.permute.xlu0 %1014  ;;  %s7574_s27 = sld [smem:[#allocation2 + $0x301]] }
 0x421   : > { %v3073_v3 = vmul.f32 %v3072_v13, %v6623_v63  ;;  %v1081_v9 = vmul.f32 %v1015_v8, %v6655_v49 }
 0x422   : > { %1066 = vperm.xlu0 %6324, %v6862_v53  }
 0x423   : > { %6131 = vmatmul.mubr.msk.f32.vlgmr.msra.gmra.mrb[12].mxu0 %vm441_vm3, %v3073_v3 }
 0x424   : > { %6327 = vset.pattern.permute.xlu1 %v6387_v1  ;;  %6145 = vmatprep.mubr.msk.f32.mxu0 %vm364_vm2, %v6545_v4  ;;  %v6389_v4 = vmov 3   ;;  %v1027_v7 = vpop.permute.xlu0 %1026 }
 0x425   : > { %1656 = vperm.xlu1 %6327, %v6750_v29  }
 0x426   : > { %1074 = vperm.xlu0 %6324, %v6867_v61   ;;  %v1019_v28 = vpop.permute.xlu1 %1018 }
 0x427   : > { %v1083_v36 = vmul.f32 %v1019_v28, %v6655_v49  ;;  %v1084_v38 = vmul.f32 %v6653_v18, %v1019_v28 }
 0x428   : > { %v6927_v34 = vpop.permute.xlu0 %1034 }
 0x429   : > { %1660 = vperm.xlu1 %6327, %v6758_v35  }
 0x42a   : > { %6326 = vset.pattern.permute.xlu0 %v6387_v1  ;;  %v1023_v23 = vpop.permute.xlu1 %1022 }
 0x42b   : > { %1652 = vperm.xlu0 %6326, %v6732_v17   ;;  %v1085_v3 = vmul.f32 %v1023_v23, %v6655_v49 }
 0x42c   : > { %v6934_v14 = vpop.permute.xlu0 %1042 }
 0x42d   : > { %1668 = vperm.xlu1 %6327, %v6768_v40  }
 0x42e   : > { %v1031_v22 = vpop.permute.xlu1 %1030 }
 0x42f   : > { %1664 = vperm.xlu0 %6326, %v6743_v25  }
 0x430   : > { %v6939_v16 = vpop.permute.xlu0 %1050 }
 0x431   : > { %1676 = vperm.xlu1 %6327, %v6776_v48  }
 0x432   : > { %v6919_v6 = vpop.permute.xlu1 %1038 }
 0x433   : > { %1672 = vperm.xlu0 %6326, %v6754_v31  }
 0x435   : > { %1684 = vperm.xlu1 %6327, %v6782_v51  }
 0x436   : > { %v6924_v10 = vpop.permute.xlu1 %1046 }
 0x437   : > { %1680 = vperm.xlu0 %6326, %v6763_v37  }
 0x439   : > { %1692 = vperm.xlu1 %6327, %v6788_v57  }
 0x43a   : > { %v6931_v12 = vpop.permute.xlu1 %1054 }
 0x43b   : > { %1688 = vperm.xlu0 %6326, %v6772_v47  }
 0x43d   : > { %1700 = vperm.xlu1 %6327, %v6853_v52  }
 0x43e   : > { %v6937_v15 = vpop.permute.xlu1 %1058 }
 0x43f   : > { %1696 = vperm.xlu0 %6326, %v6794_v56  }
 0x441   : > { %1708 = vperm.xlu1 %6327, %v6848_v42  }
 0x443   : > { %1704 = vperm.xlu0 %6326, %v6862_v53  }
 0x445   : > { %1716 = vperm.xlu1 %6327, %v6858_v58  }
 0x447   : > { %1712 = vperm.xlu0 %6326, %v6867_v61  }
 0x449   : > { %6329 = vset.pattern.permute.xlu1 %v6388_v5 }
 0x44a   : > { %2294 = vperm.xlu1 %6329, %v6750_v29  }
 0x44b   : > { %6328 = vset.pattern.permute.xlu0 %v6388_v5  ;;  %v1086_v5 = vmul.f32 %v6653_v18, %v1023_v23  ;;  %v1090_v23 = vmul.f32 %v6653_v18, %v1031_v22 }
 0x44c   : > { %2290 = vperm.xlu0 %6328, %v6732_v17  }
 0x44e   : > { %2298 = vperm.xlu1 %6329, %v6758_v35  }
 0x450   : > { %2302 = vperm.xlu0 %6328, %v6743_v25  }
 0x452   : > { %2306 = vperm.xlu1 %6329, %v6768_v40  }
 0x454   : > { %2310 = vperm.xlu0 %6328, %v6754_v31  }
 0x456   : > { %2314 = vperm.xlu1 %6329, %v6776_v48  }
 0x458   : > { %2318 = vperm.xlu0 %6328, %v6763_v37  }
 0x45a   : > { %2322 = vperm.xlu1 %6329, %v6782_v51  }
 0x45c   : > { %2326 = vperm.xlu0 %6328, %v6772_v47  }
 0x45e   : > { %2330 = vperm.xlu1 %6329, %v6788_v57  }
 0x460   : > { %2334 = vperm.xlu0 %6328, %v6794_v56  }
 0x462   : > { %2338 = vperm.xlu1 %6329, %v6853_v52  }
 0x464   : > { %2342 = vperm.xlu0 %6328, %v6862_v53  }
 0x466   : > { %2346 = vperm.xlu1 %6329, %v6848_v42  }
 0x468   : > { %2350 = vperm.xlu0 %6328, %v6867_v61  }
 0x46a   : > { %2354 = vperm.xlu1 %6329, %v6858_v58  }
 0x46c   : > { %6330 = vset.pattern.permute.xlu0 %v6389_v4 }
 0x46d   : > { %2928 = vperm.xlu0 %6330, %v6732_v17  }
 0x46e   : > { %6331 = vset.pattern.permute.xlu1 %v6389_v4 }
 0x46f   : > { %2932 = vperm.xlu1 %6331, %v6750_v29  }
 0x471   : > { %2940 = vperm.xlu0 %6330, %v6743_v25  }
 0x473   : > { %2936 = vperm.xlu1 %6331, %v6758_v35  }
 0x475   : > { %2948 = vperm.xlu0 %6330, %v6754_v31  }
 0x477   : > { %2944 = vperm.xlu1 %6331, %v6768_v40  }
 0x479   : > { %2956 = vperm.xlu0 %6330, %v6763_v37  }
 0x47b   : > { %2952 = vperm.xlu1 %6331, %v6776_v48  }
 0x47d   : > { %2964 = vperm.xlu0 %6330, %v6772_v47  }
 0x47f   : > { %2960 = vperm.xlu1 %6331, %v6782_v51  }
 0x481   : > { %2972 = vperm.xlu0 %6330, %v6794_v56  }
 0x483   : > { %2968 = vperm.xlu1 %6331, %v6788_v57  }
 0x485   : > { %2980 = vperm.xlu0 %6330, %v6862_v53  }
 0x487   : > { %2976 = vperm.xlu1 %6331, %v6853_v52  }
 0x489   : > { %2988 = vperm.xlu0 %6330, %v6867_v61  }
 0x48a   : > { %v6941_v19 = vpop.permute.xlu1 %5029 }
 0x48b   : > { %2984 = vperm.xlu1 %6331, %v6848_v42   ;;  %8239 = vst [vmem:[#allocation25_spill] sm:$0xff] %v6941_v19  ;;  %v1089_v19 = vmul.f32 %v1031_v22, %v6655_v49 }
 0x48c   : > { %v6943_v20 = vpop.permute.xlu0 %5178 }
 0x48d   : > { %8240 = vst [vmem:[#allocation26_spill] sm:$0xff] %v6943_v20 }
 0x48f   : > { %2992 = vperm.xlu1 %6331, %v6858_v58   ;;  %v3083_v58 = vstv %s6983_s20  ;;  %s7743_s20 = sld [smem:[#allocation2 + $0x381]] }
 0x49b   : > { %v6945_v21 = vpop.permute.xlu1 %1070 }
 0x49d   : > { %v6947_v24 = vpop.permute.xlu0 %1062 }
 0x49f   : > { %v6949_v26 = vpop.permute.xlu1 %1078 }
 0x4a1   : > { %v6951_v27 = vpop.permute.xlu0 %1066  ;;  %v6953_v30 = vpop.f32.mrb[8].mxu0 }
 0x4a2   : > { %v6955_v32 = vpop.f32.mrb[9].mxu0 }
 0x4a4   : > { %v1657_v33 = vpop.permute.xlu1 %1656 }
 0x4a5   : > { %v1721_v50 = vmul.f32 %v1657_v33, %v6790_v59  ;;  %v1722_v54 = vmul.f32 %v6785_v55, %v1657_v33  ;;  %v6961_v60 = vpop.permute.xlu0 %1074  ;;  %v1082_v33 = vmul.f32 %v6653_v18, %v1015_v8 }
 0x4a7   : > { %v6963_v1 = vadd.f32 %v1721_v50, %v1083_v36  ;;  %v6965_v2 = vadd.f32 %v1722_v54, %v1084_v38 }
 0x4a8   : > { %v1661_v13 = vpop.permute.xlu1 %1660 }
 0x4a9   : > { %v1723_v4 = vmul.f32 %v1661_v13, %v6790_v59  ;;  %v1724_v28 = vmul.f32 %v6785_v55, %v1661_v13 }
 0x4aa   : > { %v1653_v20 = vpop.permute.xlu0 %1652 }
 0x4ab   : > { %v6975_v36 = vadd.f32 %v1723_v4, %v1085_v3  ;;  %v6977_v38 = vadd.f32 %v1724_v28, %v1086_v5  ;;  %v1719_v50 = vmul.f32 %v1653_v20, %v6790_v59  ;;  %v1720_v54 = vmul.f32 %v6785_v55, %v1653_v20 }
 0x4ac   : > { %v1669_v11 = vpop.permute.xlu1 %1668  ;;  %v1087_v4 = vmul.f32 %v1027_v7, %v6655_v49  ;;  %v1088_v20 = vmul.f32 %v6653_v18, %v1027_v7  ;;  %v1094_v7 = vmul.f32 %v6653_v18, %v6919_v6 }
 0x4ad   : > { %v6985_v13 = vadd.f32 %v1719_v50, %v1081_v9  ;;  %v6987_v0 = vadd.f32 %v1720_v54, %v1082_v33  ;;  %v1727_v8 = vmul.f32 %v1669_v11, %v6790_v59  ;;  %v1728_v3 = vmul.f32 %v6785_v55, %v1669_v11  ;;  %v2770_v5 = vpop.f32.mrb[10].mxu0 }
 0x4ae   : > { %v1665_v28 = vpop.permute.xlu0 %1664  ;;  %v6112_v45 = vpop.f32.mrb[11].mxu0  ;;  %6113 = vmatprep.subr.msk.mxu1 %vm367_vm0, %v2770_v5  ;;  %v1093_v11 = vmul.f32 %v6919_v6, %v6655_v49  ;;  %v1091_v6 = vmul.f32 %v6927_v34, %v6655_v49 }
 0x4af   : > { %v6994_v22 = vadd.f32 %v1727_v8, %v1089_v19  ;;  %v6996_v9 = vadd.f32 %v1728_v3, %v1090_v23  ;;  %v1725_v33 = vmul.f32 %v1665_v28, %v6790_v59  ;;  %v1726_v50 = vmul.f32 %v6785_v55, %v1665_v28  ;;  %6114 = vmatpush3.msk.msra.mxu1 %vm367_vm0, %v2770_v5 }
 0x4b0   : > { %v1677_v54 = vpop.permute.xlu1 %1676  ;;  %6116 = vmatmul.mubr.msk.f32.vlgmr.msra.gmra.mrb[10].mxu1 %vm364_vm2, %v6574_v39  ;;  %6118 = vmatprep.subr.mxu1 %v6873_v43  ;;  %v3085_v45 = vstv %s6967_s19  ;;  %v1092_v39 = vmul.f32 %v6653_v18, %v6927_v34  ;;  %v1098_v34 = vmul.f32 %v6653_v18, %v6924_v10  ;;  %s5872_s19 = sld [smem:[#allocation2 + $0x384]] }
 0x4b1   : > { %v7009_v19 = vadd.f32 %v1725_v33, %v1087_v4  ;;  %v7011_v23 = vadd.f32 %v1726_v50, %v1088_v20  ;;  %v1731_v8 = vmul.f32 %v1677_v54, %v6790_v59  ;;  %v1732_v3 = vmul.f32 %v6785_v55, %v1677_v54  ;;  %6119 = vmatpush3.msra.mxu1 %v6873_v43 }
 0x4b2   : > { %v1673_v5 = vpop.permute.xlu0 %1672  ;;  %6120 = vmatprep.mubr.msk.f32.mxu1 %vm441_vm3, %v6580_v41  ;;  %v8241_v4 = vmov 0.0   ;;  %v1097_v50 = vmul.f32 %v6924_v10, %v6655_v49  ;;  %v3086_v41 = vmul.f32 %v3085_v45, %v6623_v63 }
 0x4b3   : > { %6133 = vmatprep.subr.mxu1 %v8241_v4  ;;  %v7023_v20 = vadd.f32 %v1731_v8, %v1093_v11  ;;  %v7025_v28 = vadd.f32 %v1732_v3, %v1094_v7  ;;  %v1729_v33 = vmul.f32 %v1673_v5, %v6790_v59  ;;  %v1730_v43 = vmul.f32 %v6785_v55, %v1673_v5 }
 0x4b4   : > { %v1685_v54 = vpop.permute.xlu1 %1684  ;;  %v1095_v3 = vmul.f32 %v6934_v14, %v6655_v49  ;;  %v1096_v5 = vmul.f32 %v6653_v18, %v6934_v14  ;;  %v3084_v14 = vmul.f32 %v3083_v58, %v6623_v63  ;;  %v1100_v63 = vmul.f32 %v6653_v18, %v6939_v16 }
 0x4b5   : > { %v7035_v61 = vadd.f32 %v1729_v33, %v1091_v6  ;;  %v7037_v11 = vadd.f32 %v1730_v43, %v1092_v39  ;;  %v1735_v7 = vmul.f32 %v1685_v54, %v6790_v59  ;;  %v1736_v8 = vmul.f32 %v6785_v55, %v1685_v54 }
 0x4b6   : > { %v1681_v42 = vpop.permute.xlu0 %1680  ;;  %v1101_v39 = vmul.f32 %v6931_v12, %v6655_v49  ;;  %v1102_v33 = vmul.f32 %v6653_v18, %v6931_v12 }
 0x4b7   : > { %v7045_v10 = vadd.f32 %v1735_v7, %v1097_v50  ;;  %v7047_v53 = vadd.f32 %v1736_v8, %v1098_v34  ;;  %v1733_v45 = vmul.f32 %v1681_v42, %v6790_v59  ;;  %v1734_v6 = vmul.f32 %v6785_v55, %v1681_v42  ;;  %v7067_v8 = vld [vmem:[%s8151_s4] sm:$0x7f] }
 0x4b8   : > { %v1693_v43 = vpop.permute.xlu1 %1692  ;;  %6121 = vmatmul.mubr.msk.f32.vlgmr.msra.gmra.mrb[10].mxu1 %vm441_vm3, %v6592_v44  ;;  %v3088_v50 = vrot.slane %v3086_v41, 7  ;;  %8242 = vst [vmem:[#allocation27_spill] sm:$0xff] %v7067_v8  ;;  %v1099_v44 = vmul.f32 %v6939_v16, %v6655_v49  ;;  %v1106_v16 = vmul.f32 %v6653_v18, %v6947_v24 }
 0x4b9   : > { %v7058_v54 = vadd.f32 %v1733_v45, %v1095_v3  ;;  %v7060_v34 = vadd.f32 %v1734_v6, %v1096_v5  ;;  %v1739_v7 = vmul.f32 %v1693_v43, %v6790_v59  ;;  %v1740_v42 = vmul.f32 %v6785_v55, %v1693_v43  ;;  %6134 = vmatpush3.msk.msra.mxu1 %vm367_vm0, %v7067_v8 }
 0x4ba   : > { %v1689_v58 = vpop.permute.xlu0 %1688  ;;  %6135 = vmatprep.mubr.msk.f32.mxu1 %vm6383_vm1, %v8241_v4  ;;  %6138 = vmatprep.subr.mxu1 %v8241_v4  ;;  %v1105_v45 = vmul.f32 %v6947_v24, %v6655_v49  ;;  %v3090_v43 = vadd.f32 %v3088_v50, %v3084_v14  ;;  %v1103_v24 = vmul.f32 %v6937_v15, %v6655_v49 }
 0x4bb   : > { %v7078_v12 = vadd.f32 %v1739_v7, %v1101_v39  ;;  %v7080_v41 = vadd.f32 %v1740_v42, %v1102_v33  ;;  %v1737_v3 = vmul.f32 %v1689_v58, %v6790_v59  ;;  %v1738_v5 = vmul.f32 %v6785_v55, %v1689_v58  ;;  %v7099_v42 = vld [vmem:[%s8150_s3] sm:$0xff] }
 0x4bc   : > { %v1701_v6 = vpop.permute.xlu1 %1700  ;;  %6136 = vmatmul.mubr.msk.f32.vlgmr.msra.gmra.mrb[12].mxu1 %vm364_vm2, %v6690_v62  ;;  %8243 = vst [vmem:[#allocation28_spill] sm:$0xff] %v7099_v42  ;;  %v1104_v62 = vmul.f32 %v6653_v18, %v6937_v15  ;;  %v1110_v15 = vmul.f32 %v6653_v18, %v6945_v21 }
 0x4bd   : > { %v7090_v52 = vadd.f32 %v1737_v3, %v1099_v44  ;;  %v7092_v39 = vadd.f32 %v1738_v5, %v1100_v63  ;;  %v1743_v33 = vmul.f32 %v1701_v6, %v6790_v59  ;;  %v1744_v7 = vmul.f32 %v6785_v55, %v1701_v6  ;;  %6139 = vmatpush3.msra.mxu1 %v7099_v42 }
 0x4be   : > { %v1697_v14 = vpop.permute.xlu0 %1696  ;;  %6140 = vmatprep.mubr.msk.f32.mxu1 %vm6383_vm1, %v8241_v4  ;;  %6153 = vmatprep.subr.mxu1 %v8241_v4  ;;  %v1109_v3 = vmul.f32 %v6945_v21, %v6655_v49  ;;  %v3339_v6 = vrot.slane %v3090_v43, 1 }
 0x4bf   : > { %v7109_v50 = vadd.f32 %v1743_v33, %v1105_v45  ;;  %v7111_v44 = vadd.f32 %v1744_v7, %v1106_v16  ;;  %v1741_v63 = vmul.f32 %v1697_v14, %v6790_v59  ;;  %v1742_v58 = vmul.f32 %v6785_v55, %v1697_v14 }
 0x4c0   : > { %v1709_v5 = vpop.permute.xlu1 %1708  ;;  %v1107_v33 = vmul.f32 %v6951_v27, %v6655_v49  ;;  %v1108_v7 = vmul.f32 %v6653_v18, %v6951_v27 }
 0x4c1   : > { %v7119_v56 = vadd.f32 %v1741_v63, %v1103_v24  ;;  %v7121_v57 = vadd.f32 %v1742_v58, %v1104_v62  ;;  %v1747_v45 = vmul.f32 %v1709_v5, %v6790_v59  ;;  %v1748_v16 = vmul.f32 %v6785_v55, %v1709_v5 }
 0x4c2   : > { %v1705_v14 = vpop.permute.xlu0 %1704  ;;  %v1113_v62 = vmul.f32 %v6949_v26, %v6655_v49  ;;  %v1114_v63 = vmul.f32 %v6653_v18, %v6949_v26  ;;  %v1112_v26 = vmul.f32 %v6653_v18, %v6961_v60 }
 0x4c3   : > { %v7129_v47 = vadd.f32 %v1747_v45, %v1109_v3  ;;  %v7131_v21 = vadd.f32 %v1748_v16, %v1110_v15  ;;  %v1745_v43 = vmul.f32 %v1705_v14, %v6790_v59  ;;  %v1746_v24 = vmul.f32 %v6785_v55, %v1705_v14 }
 0x4c4   : > { %v1717_v58 = vpop.permute.xlu1 %1716  ;;  %6141 = vmatmul.mubr.msk.f32.vlgmr.msra.gmra.mrb[12].mxu1 %vm441_vm3, %v3339_v6  ;;  %v1111_v45 = vmul.f32 %v6961_v60, %v6655_v49 }
 0x4c5   : > { %v7140_v5 = vadd.f32 %v1745_v43, %v1107_v33  ;;  %v7142_v27 = vadd.f32 %v1746_v24, %v1108_v7  ;;  %v1751_v3 = vmul.f32 %v1717_v58, %v6790_v59  ;;  %v1752_v15 = vmul.f32 %v6785_v55, %v1717_v58  ;;  %6154 = vmatpush3.msk.msra.mxu1 %vm367_vm0, %v7067_v8 }
 0x4c6   : > { %v1713_v16 = vpop.permute.xlu0 %1712  ;;  %6155 = vmatprep.mubr.msk.f32.mxu1 %vm6383_vm1, %v8241_v4  ;;  %6158 = vmatprep.subr.mxu1 %v8241_v4 }
 0x4c7   : > { %v7155_v6 = vadd.f32 %v1751_v3, %v1113_v62  ;;  %v7157_v33 = vadd.f32 %v1752_v15, %v1114_v63  ;;  %v1749_v7 = vmul.f32 %v1713_v16, %v6790_v59  ;;  %v1750_v14 = vmul.f32 %v6785_v55, %v1713_v16 }
 0x4c8   : > { %6156 = vmatmul.mubr.msk.f32.vlgmr.msra.gmra.mrb[14].mxu1 %vm364_vm2, %v6712_v46 }
 0x4c9   : > { %v7163_v49 = vadd.f32 %v1749_v7, %v1111_v45  ;;  %v7165_v18 = vadd.f32 %v1750_v14, %v1112_v26  ;;  %v2295_v60 = vpop.permute.xlu1 %2294  ;;  %6159 = vmatpush3.msra.mxu1 %v7099_v42  ;;  %6160 = vmatprep.mubr.msk.f32.mxu1 %vm6383_vm1, %v8241_v4 }
 0x4ca   : > { %v2359_v43 = vmul.f32 %v2295_v60, %v6955_v32  ;;  %v2360_v24 = vmul.f32 %v6953_v30, %v2295_v60 }
 0x4cb   : > { %v2291_v59 = vpop.permute.xlu0 %2290 }
 0x4cc   : > { %v7173_v55 = vadd.f32 %v2359_v43, %v6963_v1  ;;  %v7176_v46 = vadd.f32 %v2360_v24, %v6965_v2  ;;  %v2357_v62 = vmul.f32 %v2291_v59, %v6955_v32  ;;  %v2358_v63 = vmul.f32 %v6953_v30, %v2291_v59 }
 0x4cd   : > { %v2299_v58 = vpop.permute.xlu1 %2298 }
 0x4ce   : > { %v7181_v3 = vadd.f32 %v2357_v62, %v6985_v13  ;;  %v7184_v15 = vadd.f32 %v2358_v63, %v6987_v0  ;;  %v2361_v45 = vmul.f32 %v2299_v58, %v6955_v32  ;;  %v2362_v26 = vmul.f32 %v6953_v30, %v2299_v58 }
 0x4cf   : > { %v2303_v1 = vpop.permute.xlu0 %2302 }
 0x4d0   : > { %v7189_v16 = vadd.f32 %v2361_v45, %v6975_v36  ;;  %v7192_v2 = vadd.f32 %v2362_v26, %v6977_v38  ;;  %v2363_v7 = vmul.f32 %v2303_v1, %v6955_v32  ;;  %v2364_v14 = vmul.f32 %v6953_v30, %v2303_v1 }
 0x4d1   : > { %v2307_v13 = vpop.permute.xlu1 %2306 }
 0x4d2   : > { %v7197_v60 = vadd.f32 %v2363_v7, %v7009_v19  ;;  %v7200_v0 = vadd.f32 %v2364_v14, %v7011_v23  ;;  %v2365_v43 = vmul.f32 %v2307_v13, %v6955_v32  ;;  %v2366_v24 = vmul.f32 %v6953_v30, %v2307_v13 }
 0x4d3   : > { %v2311_v36 = vpop.permute.xlu0 %2310 }
 0x4d4   : > { %v7205_v59 = vadd.f32 %v2365_v43, %v6994_v22  ;;  %v7208_v38 = vadd.f32 %v2366_v24, %v6996_v9  ;;  %v2367_v62 = vmul.f32 %v2311_v36, %v6955_v32  ;;  %v2368_v63 = vmul.f32 %v6953_v30, %v2311_v36 }
 0x4d5   : > { %v2315_v19 = vpop.permute.xlu1 %2314 }
 0x4d6   : > { %v7213_v58 = vadd.f32 %v2367_v62, %v7035_v61  ;;  %v7216_v23 = vadd.f32 %v2368_v63, %v7037_v11  ;;  %v2369_v45 = vmul.f32 %v2315_v19, %v6955_v32  ;;  %v2370_v26 = vmul.f32 %v6953_v30, %v2315_v19 }
 0x4d7   : > { %v2319_v22 = vpop.permute.xlu0 %2318 }
 0x4d8   : > { %8244 = vst [vmem:[#allocation29_spill] sm:$0xff] %v7213_v58  ;;  %v7221_v1 = vadd.f32 %v2369_v45, %v7023_v20  ;;  %v7224_v9 = vadd.f32 %v2370_v26, %v7025_v28  ;;  %v2371_v7 = vmul.f32 %v2319_v22, %v6955_v32  ;;  %v2372_v14 = vmul.f32 %v6953_v30, %v2319_v22 }
 0x4d9   : > { %v2323_v61 = vpop.permute.xlu1 %2322 }
 0x4da   : > { %8245 = vst [vmem:[#allocation30_spill] sm:$0xff] %v7221_v1  ;;  %v7229_v13 = vadd.f32 %v2371_v7, %v7058_v54  ;;  %v7232_v11 = vadd.f32 %v2372_v14, %v7060_v34  ;;  %v2373_v43 = vmul.f32 %v2323_v61, %v6955_v32  ;;  %v2374_v24 = vmul.f32 %v6953_v30, %v2323_v61 }
 0x4db   : > { %v2327_v20 = vpop.permute.xlu0 %2326 }
 0x4dc   : > { %8246 = vst [vmem:[#allocation31_spill] sm:$0xff] %v7229_v13  ;;  %v7237_v36 = vadd.f32 %v2373_v43, %v7045_v10  ;;  %v7240_v28 = vadd.f32 %v2374_v24, %v7047_v53  ;;  %v2375_v62 = vmul.f32 %v2327_v20, %v6955_v32  ;;  %v2376_v63 = vmul.f32 %v6953_v30, %v2327_v20 }
 0x4dd   : > { %v2331_v54 = vpop.permute.xlu1 %2330 }
 0x4de   : > { %8247 = vst [vmem:[#allocation32_spill] sm:$0xff] %v7237_v36  ;;  %v7245_v19 = vadd.f32 %v2375_v62, %v7090_v52  ;;  %v7248_v34 = vadd.f32 %v2376_v63, %v7092_v39  ;;  %v2377_v45 = vmul.f32 %v2331_v54, %v6955_v32  ;;  %v2378_v26 = vmul.f32 %v6953_v30, %v2331_v54 }
 0x4df   : > { %v2335_v10 = vpop.permute.xlu0 %2334 }
 0x4e0   : > { %8248 = vst [vmem:[#allocation33_spill] sm:$0xff] %v7245_v19  ;;  %v7253_v22 = vadd.f32 %v2377_v45, %v7078_v12  ;;  %v7256_v53 = vadd.f32 %v2378_v26, %v7080_v41  ;;  %v2379_v7 = vmul.f32 %v2335_v10, %v6955_v32  ;;  %v2380_v14 = vmul.f32 %v6953_v30, %v2335_v10 }
 0x4e1   : > { %v2339_v52 = vpop.permute.xlu1 %2338 }
 0x4e2   : > { %8249 = vst [vmem:[#allocation34_spill] sm:$0xff] %v7253_v22  ;;  %v7261_v61 = vadd.f32 %v2379_v7, %v7119_v56  ;;  %v7264_v39 = vadd.f32 %v2380_v14, %v7121_v57  ;;  %v2381_v43 = vmul.f32 %v2339_v52, %v6955_v32  ;;  %v2382_v24 = vmul.f32 %v6953_v30, %v2339_v52 }
 0x4e3   : > { %v2343_v12 = vpop.permute.xlu0 %2342 }
 0x4e4   : > { %8250 = vst [vmem:[#allocation35_spill] sm:$0xff] %v7261_v61  ;;  %v7269_v20 = vadd.f32 %v2381_v43, %v7109_v50  ;;  %v7272_v41 = vadd.f32 %v2382_v24, %v7111_v44  ;;  %v2383_v62 = vmul.f32 %v2343_v12, %v6955_v32  ;;  %v2384_v63 = vmul.f32 %v6953_v30, %v2343_v12 }
 0x4e5   : > { %v2347_v56 = vpop.permute.xlu1 %2346 }
 0x4e6   : > { %8251 = vst [vmem:[#allocation36_spill] sm:$0xff] %v7269_v20  ;;  %v7277_v54 = vadd.f32 %v2383_v62, %v7140_v5  ;;  %v7280_v57 = vadd.f32 %v2384_v63, %v7142_v27  ;;  %v2385_v45 = vmul.f32 %v2347_v56, %v6955_v32  ;;  %v2386_v26 = vmul.f32 %v6953_v30, %v2347_v56  ;;  %v8261_v56 = vld [vmem:[#allocation17_spill] sm:$0xff] }
 0x4e7   : > { %v2351_v50 = vpop.permute.xlu0 %2350  ;;  %v3710_v63 = vstv %s5832_s28  ;;  %s6291_s28 = smul.u32 272, %s8467_s25 }
 0x4e8   : > { %8252 = vst [vmem:[#allocation37_spill] sm:$0xff] %v7277_v54  ;;  %v7285_v44 = vadd.f32 %v2385_v45, %v7129_v47  ;;  %v7288_v10 = vadd.f32 %v2386_v26, %v7131_v21  ;;  %v2387_v7 = vmul.f32 %v2351_v50, %v6955_v32  ;;  %v2388_v5 = vmul.f32 %v6953_v30, %v2351_v50  ;;  %v8262_v45 = vld [vmem:[#allocation21_spill] sm:$0xff]  ;;  %v8263_v26 = vld [vmem:[#allocation23_spill] sm:$0xff]  ;;  %v8264_v50 = vld [vmem:[#allocation20_spill] sm:$0xff] }
 0x4e9   : > { %v2355_v14 = vpop.permute.xlu1 %2354  ;;  %s8005_s30 = scalar_lea.vmem %s8154_s7, %s6291_s28 }
 0x4ea   : > { %8253 = vst [vmem:[#allocation38_spill] sm:$0xff] %v7285_v44  ;;  %v7293_v27 = vadd.f32 %v2387_v7, %v7163_v49  ;;  %v7296_v52 = vadd.f32 %v2388_v5, %v7165_v18  ;;  %v2389_v43 = vmul.f32 %v2355_v14, %v6955_v32  ;;  %v2390_v24 = vmul.f32 %v6953_v30, %v2355_v14  ;;  %v7309_v49 = vld [vmem:[%s6462_s15 + $0x28] sm:$0xff]  ;;  %v7318_v30 = vld [vmem:[%s8153_s6] sm:$0xff]  ;;  %v8265_v7 = vld [vmem:[#allocation24_spill] sm:$0xff] }
 0x4eb   : > { %8257 = vst [vmem:[#allocation42_spill] sm:$0xff] %v7309_v49  ;;  %v3711_v18 = vmul.f32 %v7309_v49, %v3710_v63  ;;  %v6390_v32 = vmov 4   ;;  %8258 = vst [vmem:[#allocation43_spill] sm:$0xff] %v7318_v30  ;;  %v8266_v5 = vld [vmem:[#allocation22_spill] sm:$0xff] }
 0x4ec   : > { %8254 = vst [vmem:[#allocation39_spill] sm:$0xff] %v7293_v27  ;;  %v7301_v47 = vadd.f32 %v2389_v43, %v7155_v6  ;;  %v7304_v21 = vadd.f32 %v2390_v24, %v7157_v33  ;;  %6333 = vset.pattern.permute.xlu1 %v6390_v32  ;;  %6332 = vset.pattern.permute.xlu0 %v6390_v32  ;;  %v8259_v6 = vld [vmem:[#allocation13_spill] sm:$0xff]  ;;  %v8260_v33 = vld [vmem:[#allocation16_spill] sm:$0xff]  ;;  %v2929_v43 = vpop.permute.xlu0 %2928 }
 0x4ed   : > { %6161 = vmatmul.mubr.msk.f32.vlgmr.msra.gmra.mrb[14].mxu1 %vm441_vm3, %v3711_v18  ;;  %3570 = vperm.xlu1 %6333, %v6750_v29  }
 0x4ee   : > { %8255 = vst [vmem:[#allocation40_spill] sm:$0xff] %v7301_v47  ;;  %3566 = vperm.xlu0 %6332, %v6732_v17   ;;  %6175 = vmatprep.mubr.msk.f32.mxu1 %vm364_vm2, %v7318_v30  ;;  %v2933_v14 = vpop.permute.xlu1 %2932 }
 0x4f1   : > { %3574 = vperm.xlu1 %6333, %v6758_v35  }
 0x4f2   : > { %3578 = vperm.xlu0 %6332, %v6743_v25   ;;  %v2937_v24 = vpop.permute.xlu1 %2936 }
 0x4f5   : > { %3582 = vperm.xlu1 %6333, %v6768_v40  }
 0x4f6   : > { %v7306_v12 = vpop.f32.mrb[12].mxu0  ;;  %3586 = vperm.xlu0 %6332, %v6754_v31   ;;  %v2945_v63 = vpop.permute.xlu1 %2944 }
 0x4f7   : > { %8256 = vst [vmem:[#allocation41_spill] sm:$0xff] %v7306_v12  ;;  %v6132_v62 = vpop.f32.mrb[13].mxu0 }
 0x4f8   : > { %v2941_v62 = vpop.permute.xlu0 %2940 }
 0x4f9   : > { %3590 = vperm.xlu1 %6333, %v6776_v48  }
 0x4fa   : > { %3594 = vperm.xlu0 %6332, %v6763_v37   ;;  %v2953_v32 = vpop.permute.xlu1 %2952 }
 0x4fc   : > { %v2949_v18 = vpop.permute.xlu0 %2948 }
 0x4fd   : > { %3598 = vperm.xlu1 %6333, %v6782_v51  }
 0x4fe   : > { %3602 = vperm.xlu0 %6332, %v8259_v6   ;;  %v2961_v6 = vpop.permute.xlu1 %2960 }
 0x501   : > { %3606 = vperm.xlu1 %6333, %v8260_v33   ;;  %v2957_v33 = vpop.permute.xlu0 %2956 }
 0x502   : > { %3610 = vperm.xlu0 %6332, %v8261_v56   ;;  %v2969_v51 = vpop.permute.xlu1 %2968 }
 0x505   : > { %3614 = vperm.xlu1 %6333, %v8262_v45   ;;  %v2965_v56 = vpop.permute.xlu0 %2964 }
 0x506   : > { %3618 = vperm.xlu0 %6332, %v8263_v26   ;;  %v2977_v37 = vpop.permute.xlu1 %2976 }
 0x509   : > { %3622 = vperm.xlu1 %6333, %v8264_v50   ;;  %v2973_v45 = vpop.permute.xlu0 %2972 }
 0x50a   : > { %3626 = vperm.xlu0 %6332, %v8265_v7   ;;  %v2985_v48 = vpop.permute.xlu1 %2984 }
 0x50d   : > { %3630 = vperm.xlu1 %6333, %v8266_v5   ;;  %v2981_v26 = vpop.permute.xlu0 %2980 }
 0x50e   : > { %v2993_v30 = vpop.permute.xlu1 %2992 }
 0x511   : > { %v2989_v31 = vpop.permute.xlu0 %2988 }
 0x58b   : > { %v6122_v50 = vpop.f32.mrb[10].mxu1 }
 0x58c   : > { %v2996_v7 = vmul.f32 %v6122_v50, %v2929_v43  ;;  %v2998_v40 = vmul.f32 %v6122_v50, %v2933_v14  ;;  %v3000_v5 = vmul.f32 %v6122_v50, %v2937_v24  ;;  %v3002_v25 = vmul.f32 %v6122_v50, %v2941_v62  ;;  %v2918_v35 = vpop.f32.mrb[11].mxu1 }
 0x58d   : > { %v3004_v17 = vmul.f32 %v6122_v50, %v2945_v63  ;;  %v3006_v29 = vmul.f32 %v6122_v50, %v2949_v18  ;;  %v3008_v42 = vmul.f32 %v6122_v50, %v2953_v32  ;;  %v3010_v8 = vmul.f32 %v6122_v50, %v2957_v33 }
 0x58e   : > { %v3012_v49 = vmul.f32 %v6122_v50, %v2961_v6  ;;  %v3014_v47 = vmul.f32 %v6122_v50, %v2965_v56  ;;  %v3016_v27 = vmul.f32 %v6122_v50, %v2969_v51  ;;  %v3018_v44 = vmul.f32 %v6122_v50, %v2973_v45 }
 0x58f   : > { %v3020_v54 = vmul.f32 %v6122_v50, %v2977_v37  ;;  %v3022_v20 = vmul.f32 %v6122_v50, %v2981_v26  ;;  %v3024_v61 = vmul.f32 %v6122_v50, %v2985_v48  ;;  %v3026_v4 = vmul.f32 %v6122_v50, %v2989_v31 }
 0x590   : > { %v3028_v22 = vmul.f32 %v6122_v50, %v2993_v30  ;;  %v7338_v19 = vadd.f32 %v2996_v7, %v7184_v15  ;;  %v7341_v36 = vadd.f32 %v2998_v40, %v7176_v46  ;;  %v7344_v13 = vadd.f32 %v3000_v5, %v7192_v2  ;;  %v8280_v7 = vld [vmem:[#allocation34_spill] sm:$0xff] }
 0x591   : > { %v7347_v1 = vadd.f32 %v3002_v25, %v7200_v0  ;;  %v7350_v58 = vadd.f32 %v3004_v17, %v7208_v38  ;;  %v7353_v12 = vadd.f32 %v3006_v29, %v7216_v23  ;;  %v7356_v50 = vadd.f32 %v3008_v42, %v7224_v9 }
 0x592   : > { %v7359_v15 = vadd.f32 %v3010_v8, %v7232_v11  ;;  %v7362_v40 = vadd.f32 %v3012_v49, %v7240_v28  ;;  %v7365_v46 = vadd.f32 %v3014_v47, %v7248_v34  ;;  %v7368_v25 = vadd.f32 %v3016_v27, %v7256_v53 }
 0x593   : > { %v7371_v17 = vadd.f32 %v3018_v44, %v7264_v39  ;;  %v7374_v29 = vadd.f32 %v3020_v54, %v7272_v41  ;;  %v7377_v42 = vadd.f32 %v3022_v20, %v7280_v57  ;;  %v7380_v8 = vadd.f32 %v3024_v61, %v7288_v10 }
 0x594   : > { %v7385_v2 = vadd.f32 %v3026_v4, %v7296_v52  ;;  %v7388_v0 = vadd.f32 %v3028_v22, %v7304_v21  ;;  %v2995_v38 = vmul.f32 %v2929_v43, %v2918_v35  ;;  %v2997_v23 = vmul.f32 %v2933_v14, %v2918_v35  ;;  %v8283_v43 = vld [vmem:[#allocation35_spill] sm:$0xff] }
 0x595   : > { %v2999_v9 = vmul.f32 %v2937_v24, %v2918_v35  ;;  %v3001_v11 = vmul.f32 %v2941_v62, %v2918_v35  ;;  %v3003_v28 = vmul.f32 %v2945_v63, %v2918_v35  ;;  %v3005_v34 = vmul.f32 %v2949_v18, %v2918_v35  ;;  %v8285_v62 = vld [vmem:[#allocation36_spill] sm:$0xff]  ;;  %v8287_v18 = vld [vmem:[#allocation37_spill] sm:$0xff] }
 0x596   : > { %v3007_v53 = vmul.f32 %v2953_v32, %v2918_v35  ;;  %v3009_v39 = vmul.f32 %v2957_v33, %v2918_v35  ;;  %v3011_v20 = vmul.f32 %v2961_v6, %v2918_v35  ;;  %v3013_v41 = vmul.f32 %v2965_v56, %v2918_v35  ;;  %v8276_v33 = vld [vmem:[#allocation32_spill] sm:$0xff] }
 0x597   : > { %v3015_v61 = vmul.f32 %v2969_v51, %v2918_v35  ;;  %v3017_v54 = vmul.f32 %v2973_v45, %v2918_v35  ;;  %v3019_v57 = vmul.f32 %v2977_v37, %v2918_v35  ;;  %v3021_v44 = vmul.f32 %v2981_v26, %v2918_v35  ;;  %v3408_v10 = vpop.f32.mrb[12].mxu1  ;;  %v8278_v45 = vld [vmem:[#allocation33_spill] sm:$0xff] }
 0x598   : > { %v3023_v4 = vmul.f32 %v2985_v48, %v2918_v35  ;;  %v3025_v22 = vmul.f32 %v2989_v31, %v2918_v35  ;;  %v3027_v27 = vmul.f32 %v2993_v30, %v2918_v35  ;;  %v6142_v52 = vpop.f32.mrb[13].mxu1  ;;  %6143 = vmatprep.subr.msk.mxu0 %vm367_vm0, %v3408_v10  ;;  %v7394_v47 = vadd.f32 %v2995_v38, %v7181_v3  ;;  %v7412_v35 = vld [vmem:[%s8153_s6 + $0x8] sm:$0x7f]  ;;  %v8268_v48 = vld [vmem:[#allocation41_spill] sm:$0xff] }
 0x599   : > { %6144 = vmatpush3.msk.msra.mxu0 %vm367_vm0, %v3408_v10  ;;  %v7398_v51 = vadd.f32 %v2997_v23, %v7173_v55  ;;  %v7401_v37 = vadd.f32 %v2999_v9, %v7189_v16  ;;  %v7404_v21 = vadd.f32 %v3001_v11, %v7197_v60  ;;  %v7407_v31 = vadd.f32 %v3003_v28, %v7205_v59  ;;  %v8269_v55 = vld [vmem:[#allocation29_spill] sm:$0xff]  ;;  %v8271_v16 = vld [vmem:[#allocation30_spill] sm:$0xff]  ;;  %v8273_v60 = vld [vmem:[#allocation31_spill] sm:$0xff] }
 0x59a   : > { %8267 = vst [vmem:[#allocation44_spill] sm:$0xff] %v7412_v35  ;;  %6146 = vmatmul.mubr.msk.f32.vlgmr.msra.gmra.mrb[14].mxu0 %vm364_vm2, %v7412_v35  ;;  %6148 = vmatprep.subr.mxu0 %v8268_v48  ;;  %v7418_v3 = vadd.f32 %v3005_v34, %v8269_v55  ;;  %v7421_v49 = vadd.f32 %v3007_v53, %v8271_v16  ;;  %v7430_v59 = vld [vmem:[%s8152_s5] sm:$0xff]  ;;  %v3723_v6 = vstv %s7382_s8  ;;  %v8282_v14 = vmov 0.0   ;;  %v8289_v38 = vld [vmem:[#allocation38_spill] sm:$0xff]  ;;  %v8291_v9 = vld [vmem:[#allocation39_spill] sm:$0xff] }
 0x59b   : > { %v7424_v30 = vadd.f32 %v3009_v39, %v8273_v60  ;;  %6149 = vmatpush3.msra.mxu0 %v8268_v48  ;;  %8275 = vst [vmem:[#allocation31_spill] sm:$0xff] %v7430_v59  ;;  %6150 = vmatprep.mubr.msk.f32.mxu0 %vm441_vm3, %v7430_v59  ;;  %v7436_v56 = vadd.f32 %v3011_v20, %v8276_v33  ;;  %v8293_v28 = vld [vmem:[#allocation40_spill] sm:$0xff]  ;;  %v8295_v53 = vld [vmem:[#allocation42_spill] sm:$0xff]  ;;  %v3721_v20 = vstv %s7390_s9  ;;  %v4348_v55 = vstv %s5852_s17  ;;  %v7498_v16 = vld [vmem:[%s6462_s15 + $0x30] sm:$0xff] }
 0x59c   : > { %8270 = vst [vmem:[#allocation41_spill] sm:$0xff] %v7418_v3  ;;  %8272 = vst [vmem:[#allocation29_spill] sm:$0xff] %v7421_v49  ;;  %v7439_v26 = vadd.f32 %v3013_v41, %v8278_v45  ;;  %v7442_v5 = vadd.f32 %v3015_v61, %v8280_v7  ;;  %6163 = vmatprep.subr.mxu0 %v8282_v14  ;;  %v7446_v24 = vadd.f32 %v3017_v54, %v8283_v43  ;;  %v7468_v41 = vld [vmem:[%s8152_s5 + $0x8] sm:$0x7f]  ;;  %v8303_v33 = vld [vmem:[#allocation8_spill] sm:$0xff] }
 0x59d   : > { %8274 = vst [vmem:[#allocation30_spill] sm:$0xff] %v7424_v30  ;;  %8277 = vst [vmem:[#allocation32_spill] sm:$0xff] %v7436_v56  ;;  %v7449_v63 = vadd.f32 %v3019_v57, %v8285_v62  ;;  %v7452_v32 = vadd.f32 %v3021_v44, %v8287_v18  ;;  %v7455_v23 = vadd.f32 %v3023_v4, %v8289_v38  ;;  %v8297_v57 = vld [vmem:[#allocation27_spill] sm:$0xff]  ;;  %v8298_v44 = vld [vmem:[#allocation5_spill] sm:$0xff] }
 0x59e   : > { %8279 = vst [vmem:[#allocation33_spill] sm:$0xff] %v7439_v26  ;;  %8281 = vst [vmem:[#allocation34_spill] sm:$0xff] %v7442_v5  ;;  %v7458_v11 = vadd.f32 %v3025_v22, %v8291_v9  ;;  %v7461_v34 = vadd.f32 %v3027_v27, %v8293_v28  ;;  %v3724_v39 = vmul.f32 %v8295_v53, %v3723_v6  ;;  %v8299_v4 = vld [vmem:[#allocation28_spill] sm:$0xff]  ;;  %v8300_v27 = vld [vmem:[#allocation19_spill] sm:$0xff]  ;;  %v6391_v6 = vmov 5  }
 0x59f   : > { %8284 = vst [vmem:[#allocation35_spill] sm:$0xff] %v7446_v24  ;;  %8286 = vst [vmem:[#allocation36_spill] sm:$0xff] %v7449_v63  ;;  %v3722_v61 = vmul.f32 %v8295_v53, %v3721_v20  ;;  %v4349_v60 = vmul.f32 %v7498_v16, %v4348_v55  ;;  %6335 = vset.pattern.permute.xlu1 %v6391_v6  ;;  %6334 = vset.pattern.permute.xlu0 %v6391_v6  ;;  %v8304_v45 = vld [vmem:[#allocation6_spill] sm:$0xff]  ;;  %v8305_v7 = vld [vmem:[#allocation43_spill] sm:$0xff]  ;;  %v3567_v55 = vpop.permute.xlu0 %3566 }
 0x5a0   : > { %8288 = vst [vmem:[#allocation37_spill] sm:$0xff] %v7452_v32  ;;  %8290 = vst [vmem:[#allocation38_spill] sm:$0xff] %v7455_v23  ;;  %v3726_v54 = vrot.slane %v3724_v39, 7  ;;  %4208 = vperm.xlu1 %6335, %v8303_v33   ;;  %4204 = vperm.xlu0 %6334, %v8304_v45   ;;  %v8306_v43 = vld [vmem:[#allocation10_spill] sm:$0xff]  ;;  %v8307_v62 = vld [vmem:[#allocation7_spill] sm:$0xff] }
 0x5a1   : > { %8292 = vst [vmem:[#allocation39_spill] sm:$0xff] %v7458_v11  ;;  %8294 = vst [vmem:[#allocation40_spill] sm:$0xff] %v7461_v34  ;;  %v8308_v18 = vld [vmem:[#allocation12_spill] sm:$0xff]  ;;  %v8309_v38 = vld [vmem:[#allocation9_spill] sm:$0xff] }
 0x5a2   : > { %8296 = vst [vmem:[#allocation42_spill] sm:$0xff] %v7468_v41  ;;  %6151 = vmatmul.mubr.msk.f32.vlgmr.msra.gmra.mrb[14].mxu0 %vm441_vm3, %v7468_v41  ;;  %v3728_v10 = vadd.f32 %v3726_v54, %v3722_v61  ;;  %8302 = vst [vmem:[#allocation19_spill] sm:$0xff] %v7498_v16  ;;  %v8310_v9 = vld [vmem:[#allocation14_spill] sm:$0xff]  ;;  %v8311_v28 = vld [vmem:[#allocation11_spill] sm:$0xff] }
 0x5a3   : > { %6164 = vmatpush3.msk.msra.mxu0 %vm367_vm0, %v8297_v57  ;;  %6165 = vmatprep.mubr.msk.f32.mxu0 %vm6383_vm1, %v8282_v14  ;;  %v8312_v53 = vld [vmem:[#allocation15_spill] sm:$0xff]  ;;  %v8313_v39 = vld [vmem:[#allocation13_spill] sm:$0xff]  ;;  %v8314_v20 = vld [vmem:[#allocation16_spill] sm:$0xff]  ;;  %v3579_v6 = vpop.permute.xlu0 %3578 }
 0x5a4   : > { %6168 = vmatprep.subr.mxu0 %v8282_v14  ;;  %v3977_v22 = vrot.slane %v3728_v10, 1  ;;  %4212 = vperm.xlu1 %6335, %v8306_v43   ;;  %v8315_v61 = vld [vmem:[#allocation17_spill] sm:$0xff]  ;;  %v8318_v10 = vld [vmem:[#allocation20_spill] sm:$0xff] }
 0x5a5   : > { %4216 = vperm.xlu0 %6334, %v8307_v62   ;;  %v8316_v54 = vld [vmem:[#allocation21_spill] sm:$0xff] }
 0x5a6   : > { %6166 = vmatmul.mubr.msk.f32.vlgmr.msra.gmra.mrb[16].mxu0 %vm364_vm2, %v8298_v44  ;;  %v8317_v44 = vld [vmem:[#allocation23_spill] sm:$0xff] }
 0x5a7   : > { %6169 = vmatpush3.msra.mxu0 %v8299_v4  ;;  %6170 = vmatprep.mubr.msk.f32.mxu0 %vm6383_vm1, %v8282_v14 }
 0x5a8   : > { %6183 = vmatprep.subr.mxu0 %v8282_v14  ;;  %4220 = vperm.xlu1 %6335, %v8308_v18  }
 0x5a9   : > { %4224 = vperm.xlu0 %6334, %v8309_v38  }
 0x5ac   : > { %4228 = vperm.xlu1 %6335, %v8310_v9  }
 0x5ad   : > { %4232 = vperm.xlu0 %6334, %v8311_v28  }
 0x5ae   : > { %6171 = vmatmul.mubr.msk.f32.vlgmr.msra.gmra.mrb[16].mxu0 %vm441_vm3, %v3977_v22  ;;  %v8319_v22 = vld [vmem:[#allocation24_spill] sm:$0xff] }
 0x5af   : > { %6184 = vmatpush3.msk.msra.mxu0 %vm367_vm0, %v8297_v57  ;;  %6185 = vmatprep.mubr.msk.f32.mxu0 %vm6383_vm1, %v8282_v14 }
 0x5b0   : > { %6188 = vmatprep.subr.mxu0 %v8282_v14  ;;  %4236 = vperm.xlu1 %6335, %v8312_v53  }
 0x5b1   : > { %4240 = vperm.xlu0 %6334, %v8313_v39   ;;  %v3587_v39 = vpop.permute.xlu0 %3586 }
 0x5b2   : > { %6186 = vmatmul.mubr.msk.f32.vlgmr.msra.gmra.mrb[18].mxu0 %vm364_vm2, %v8300_v27  ;;  %v8320_v27 = vld [vmem:[#allocation22_spill] sm:$0xff] }
 0x5b3   : > { %6189 = vmatpush3.msra.mxu0 %v8299_v4  ;;  %6190 = vmatprep.mubr.msk.f32.mxu0 %vm6383_vm1, %v8282_v14 }
 0x5b4   : > { %4244 = vperm.xlu1 %6335, %v8314_v20  }
 0x5b5   : > { %4248 = vperm.xlu0 %6334, %v8315_v61   ;;  %v3595_v20 = vpop.permute.xlu0 %3594 }
 0x5b8   : > { %4252 = vperm.xlu1 %6335, %v8316_v54  }
 0x5b9   : > { %4256 = vperm.xlu0 %6334, %v8317_v44   ;;  %v3603_v61 = vpop.permute.xlu0 %3602 }
 0x5ba   : > { %6191 = vmatmul.mubr.msk.f32.vlgmr.msra.gmra.mrb[18].mxu0 %vm441_vm3, %v4349_v60 }
 0x5bb   : > { %6205 = vmatprep.mubr.msk.f32.mxu0 %vm364_vm2, %v8305_v7 }
 0x5bc   : > { %4260 = vperm.xlu1 %6335, %v8318_v10  }
 0x5bd   : > { %4264 = vperm.xlu0 %6334, %v8319_v22   ;;  %v3611_v54 = vpop.permute.xlu0 %3610 }
 0x5c0   : > { %v7495_v52 = vpop.f32.mrb[14].mxu1  ;;  %4268 = vperm.xlu1 %6335, %v8320_v27  }
 0x5c1   : > { %8301 = vst [vmem:[#allocation5_spill] sm:$0xff] %v7495_v52  ;;  %v6162_v48 = vpop.f32.mrb[15].mxu1  ;;  %v3619_v44 = vpop.permute.xlu0 %3618 }
 0x5c2   : > { %v3571_v48 = vpop.permute.xlu1 %3570 }
 0x5c5   : > { %v3627_v43 = vpop.permute.xlu0 %3626 }
 0x5c6   : > { %v3575_v60 = vpop.permute.xlu1 %3574 }
 0x5ca   : > { %v3583_v53 = vpop.permute.xlu1 %3582 }
 0x5ce   : > { %v3591_v28 = vpop.permute.xlu1 %3590 }
 0x5d2   : > { %v3599_v9 = vpop.permute.xlu1 %3598 }
 0x5d6   : > { %v3607_v38 = vpop.permute.xlu1 %3606 }
 0x5da   : > { %v3615_v18 = vpop.permute.xlu1 %3614 }
 0x5de   : > { %v3623_v62 = vpop.permute.xlu1 %3622 }
 0x5e2   : > { %v3631_v4 = vpop.permute.xlu1 %3630 }
 0x675   : > { %v6152_v10 = vpop.f32.mrb[14].mxu0 }
 0x676   : > { %v3634_v22 = vmul.f32 %v6152_v10, %v3567_v55  ;;  %v3636_v7 = vmul.f32 %v6152_v10, %v3571_v48  ;;  %v3638_v27 = vmul.f32 %v6152_v10, %v3575_v60  ;;  %v3640_v45 = vmul.f32 %v6152_v10, %v3579_v6  ;;  %v3556_v33 = vpop.f32.mrb[15].mxu0 }
 0x677   : > { %v3642_v57 = vmul.f32 %v6152_v10, %v3583_v53  ;;  %v3644_v41 = vmul.f32 %v6152_v10, %v3587_v39  ;;  %v3646_v16 = vmul.f32 %v6152_v10, %v3591_v28  ;;  %v3648_v34 = vmul.f32 %v6152_v10, %v3595_v20 }
 0x678   : > { %v3650_v11 = vmul.f32 %v6152_v10, %v3599_v9  ;;  %v3652_v23 = vmul.f32 %v6152_v10, %v3603_v61  ;;  %v3654_v32 = vmul.f32 %v6152_v10, %v3607_v38  ;;  %v3656_v63 = vmul.f32 %v6152_v10, %v3611_v54 }
 0x679   : > { %v3658_v24 = vmul.f32 %v6152_v10, %v3615_v18  ;;  %v3660_v14 = vmul.f32 %v6152_v10, %v3619_v44  ;;  %v3662_v5 = vmul.f32 %v6152_v10, %v3623_v62  ;;  %v3664_v26 = vmul.f32 %v6152_v10, %v3627_v43 }
 0x67a   : > { %v3666_v56 = vmul.f32 %v6152_v10, %v3631_v4  ;;  %v7522_v59 = vadd.f32 %v3634_v22, %v7338_v19  ;;  %v7525_v30 = vadd.f32 %v3636_v7, %v7341_v36  ;;  %v7528_v49 = vadd.f32 %v3638_v27, %v7344_v13  ;;  %v8337_v22 = vld [vmem:[#allocation35_spill] sm:$0xff] }
 0x67b   : > { %v7531_v3 = vadd.f32 %v3640_v45, %v7347_v1  ;;  %v7534_v52 = vadd.f32 %v3642_v57, %v7350_v58  ;;  %v7537_v35 = vadd.f32 %v3644_v41, %v7353_v12  ;;  %v7540_v10 = vadd.f32 %v3646_v16, %v7356_v50 }
 0x67c   : > { %v7543_v19 = vadd.f32 %v3648_v34, %v7359_v15  ;;  %v7546_v36 = vadd.f32 %v3650_v11, %v7362_v40  ;;  %v7549_v13 = vadd.f32 %v3652_v23, %v7365_v46  ;;  %v7552_v1 = vadd.f32 %v3654_v32, %v7368_v25 }
 0x67d   : > { %v7555_v58 = vadd.f32 %v3656_v63, %v7371_v17  ;;  %v7558_v12 = vadd.f32 %v3658_v24, %v7374_v29  ;;  %v7561_v50 = vadd.f32 %v3660_v14, %v7377_v42  ;;  %v7564_v15 = vadd.f32 %v3662_v5, %v7380_v8 }
 0x67e   : > { %v7569_v40 = vadd.f32 %v3664_v26, %v7385_v2  ;;  %v7572_v46 = vadd.f32 %v3666_v56, %v7388_v0  ;;  %v3633_v25 = vmul.f32 %v3567_v55, %v3556_v33  ;;  %v3635_v17 = vmul.f32 %v3571_v48, %v3556_v33  ;;  %v8339_v48 = vld [vmem:[#allocation36_spill] sm:$0xff] }
 0x67f   : > { %v3637_v63 = vmul.f32 %v3575_v60, %v3556_v33  ;;  %v3639_v32 = vmul.f32 %v3579_v6, %v3556_v33  ;;  %v3641_v29 = vmul.f32 %v3583_v53, %v3556_v33  ;;  %v3643_v24 = vmul.f32 %v3587_v39, %v3556_v33  ;;  %v8332_v39 = vld [vmem:[#allocation33_spill] sm:$0xff] }
 0x680   : > { %v3645_v23 = vmul.f32 %v3591_v28, %v3556_v33  ;;  %v3647_v42 = vmul.f32 %v3595_v20, %v3556_v33  ;;  %v3649_v14 = vmul.f32 %v3599_v9, %v3556_v33  ;;  %v3651_v11 = vmul.f32 %v3603_v61, %v3556_v33  ;;  %v8327_v9 = vld [vmem:[#allocation30_spill] sm:$0xff]  ;;  %v8330_v28 = vld [vmem:[#allocation32_spill] sm:$0xff]  ;;  %v8341_v60 = vld [vmem:[#allocation37_spill] sm:$0xff] }
 0x681   : > { %v3653_v8 = vmul.f32 %v3607_v38, %v3556_v33  ;;  %v3655_v5 = vmul.f32 %v3611_v54, %v3556_v33  ;;  %v3657_v34 = vmul.f32 %v3615_v18, %v3556_v33  ;;  %v3659_v41 = vmul.f32 %v3619_v44, %v3556_v33  ;;  %v4046_v57 = vpop.f32.mrb[16].mxu0  ;;  %v8325_v38 = vld [vmem:[#allocation29_spill] sm:$0xff]  ;;  %v8334_v61 = vld [vmem:[#allocation34_spill] sm:$0xff] }
 0x682   : > { %v3661_v2 = vmul.f32 %v3623_v62, %v3556_v33  ;;  %v3663_v0 = vmul.f32 %v3627_v43, %v3556_v33  ;;  %v3665_v56 = vmul.f32 %v3631_v4, %v3556_v33  ;;  %v6172_v26 = vpop.f32.mrb[17].mxu0  ;;  %6173 = vmatprep.subr.msk.mxu1 %vm367_vm0, %v4046_v57  ;;  %v7578_v16 = vadd.f32 %v3633_v25, %v7394_v47  ;;  %v8321_v33 = vld [vmem:[#allocation44_spill] sm:$0xff]  ;;  %v8322_v43 = vld [vmem:[#allocation5_spill] sm:$0xff]  ;;  %v8343_v25 = vld [vmem:[#allocation38_spill] sm:$0xff] }
 0x683   : > { %6174 = vmatpush3.msk.msra.mxu1 %vm367_vm0, %v4046_v57  ;;  %v7582_v45 = vadd.f32 %v3635_v17, %v7398_v51  ;;  %v7585_v7 = vadd.f32 %v3637_v63, %v7401_v37  ;;  %v7588_v18 = vadd.f32 %v3639_v32, %v7404_v21  ;;  %v7591_v4 = vadd.f32 %v3641_v29, %v7407_v31  ;;  %v8323_v47 = vld [vmem:[#allocation41_spill] sm:$0xff]  ;;  %v8329_v21 = vld [vmem:[#allocation31_spill] sm:$0xff]  ;;  %v8347_v29 = vld [vmem:[#allocation40_spill] sm:$0xff] }
 0x684   : > { %6176 = vmatmul.mubr.msk.f32.vlgmr.msra.gmra.mrb[16].mxu1 %vm364_vm2, %v8321_v33  ;;  %6178 = vmatprep.subr.mxu1 %v8322_v43  ;;  %v7597_v62 = vadd.f32 %v3643_v24, %v8323_v47  ;;  %v7600_v51 = vadd.f32 %v3645_v23, %v8325_v38  ;;  %v7603_v37 = vadd.f32 %v3647_v42, %v8327_v9  ;;  %v4361_v31 = vstv %s7566_s18  ;;  %v8345_v63 = vld [vmem:[#allocation39_spill] sm:$0xff]  ;;  %v7667_v38 = vld [vmem:[%s6462_s15 + $0x38] sm:$0xff]  ;;  %s7735_s15 = sld [smem:[#allocation2 + $0x387]] }
 0x685   : > { %6179 = vmatpush3.msra.mxu1 %v8322_v43  ;;  %6180 = vmatprep.mubr.msk.f32.mxu1 %vm441_vm3, %v8329_v21  ;;  %v7610_v53 = vadd.f32 %v3649_v14, %v8330_v28  ;;  %v7613_v20 = vadd.f32 %v3651_v11, %v8332_v39  ;;  %v7616_v54 = vadd.f32 %v3653_v8, %v8334_v61  ;;  %v8336_v44 = vmov 0.0   ;;  %v8349_v23 = vld [vmem:[#allocation19_spill] sm:$0xff]  ;;  %v8350_v11 = vld [vmem:[#allocation42_spill] sm:$0xff]  ;;  %v8357_v28 = vld [vmem:[#allocation8_spill] sm:$0xff] }
 0x686   : > { %8324 = vst [vmem:[#allocation5_spill] sm:$0xff] %v7597_v62  ;;  %8326 = vst [vmem:[#allocation41_spill] sm:$0xff] %v7600_v51  ;;  %6193 = vmatprep.subr.mxu1 %v8336_v44  ;;  %v7620_v27 = vadd.f32 %v3655_v5, %v8337_v22  ;;  %v7623_v55 = vadd.f32 %v3657_v34, %v8339_v48  ;;  %v7626_v6 = vadd.f32 %v3659_v41, %v8341_v60  ;;  %v8351_v34 = vld [vmem:[#allocation27_spill] sm:$0xff]  ;;  %v8352_v41 = vld [vmem:[#allocation18_spill] sm:$0xff] }
 0x687   : > { %8328 = vst [vmem:[#allocation29_spill] sm:$0xff] %v7603_v37  ;;  %8331 = vst [vmem:[#allocation30_spill] sm:$0xff] %v7610_v53  ;;  %v7629_v17 = vadd.f32 %v3661_v2, %v8343_v25  ;;  %v7632_v32 = vadd.f32 %v3663_v0, %v8345_v63  ;;  %v7635_v24 = vadd.f32 %v3665_v56, %v8347_v29  ;;  %v4359_v14 = vstv %s7574_s27  ;;  %v8353_v2 = vld [vmem:[#allocation28_spill] sm:$0xff]  ;;  %v8354_v56 = vld [vmem:[#allocation25_spill] sm:$0xff] }
 0x688   : > { %8333 = vst [vmem:[#allocation32_spill] sm:$0xff] %v7613_v20  ;;  %8335 = vst [vmem:[#allocation33_spill] sm:$0xff] %v7616_v54  ;;  %v4362_v42 = vmul.f32 %v8349_v23, %v4361_v31  ;;  %v4360_v8 = vmul.f32 %v8349_v23, %v4359_v14  ;;  %v4986_v47 = vstv %s5872_s19  ;;  %v6392_v31 = vmov 6   ;;  %v8358_v39 = vld [vmem:[#allocation6_spill] sm:$0xff]  ;;  %v8359_v61 = vld [vmem:[#allocation43_spill] sm:$0xff] }
 0x689   : > { %8338 = vst [vmem:[#allocation34_spill] sm:$0xff] %v7620_v27  ;;  %8340 = vst [vmem:[#allocation35_spill] sm:$0xff] %v7623_v55  ;;  %v4987_v9 = vmul.f32 %v7667_v38, %v4986_v47  ;;  %6337 = vset.pattern.permute.xlu1 %v6392_v31  ;;  %6336 = vset.pattern.permute.xlu0 %v6392_v31  ;;  %v8360_v22 = vld [vmem:[#allocation10_spill] sm:$0xff]  ;;  %v8361_v48 = vld [vmem:[#allocation7_spill] sm:$0xff] }
 0x68a   : > { %8342 = vst [vmem:[#allocation36_spill] sm:$0xff] %v7626_v6  ;;  %8344 = vst [vmem:[#allocation37_spill] sm:$0xff] %v7629_v17  ;;  %v4364_v5 = vrot.slane %v4362_v42, 7  ;;  %4846 = vperm.xlu1 %6337, %v8357_v28   ;;  %4842 = vperm.xlu0 %6336, %v8358_v39   ;;  %v8362_v60 = vld [vmem:[#allocation12_spill] sm:$0xff]  ;;  %v8363_v25 = vld [vmem:[#allocation9_spill] sm:$0xff] }
 0x68b   : > { %8346 = vst [vmem:[#allocation38_spill] sm:$0xff] %v7632_v32  ;;  %8348 = vst [vmem:[#allocation39_spill] sm:$0xff] %v7635_v24  ;;  %v8364_v63 = vld [vmem:[#allocation14_spill] sm:$0xff]  ;;  %v8365_v29 = vld [vmem:[#allocation11_spill] sm:$0xff] }
 0x68c   : > { %6181 = vmatmul.mubr.msk.f32.vlgmr.msra.gmra.mrb[16].mxu1 %vm441_vm3, %v8350_v11  ;;  %v4366_v57 = vadd.f32 %v4364_v5, %v4360_v8  ;;  %8356 = vst [vmem:[#allocation19_spill] sm:$0xff] %v7667_v38  ;;  %v8366_v23 = vld [vmem:[#allocation15_spill] sm:$0xff]  ;;  %v8367_v42 = vld [vmem:[#allocation13_spill] sm:$0xff]  ;;  %v8368_v14 = vld [vmem:[#allocation16_spill] sm:$0xff] }
 0x68d   : > { %6194 = vmatpush3.msk.msra.mxu1 %vm367_vm0, %v8351_v34  ;;  %6195 = vmatprep.mubr.msk.f32.mxu1 %vm6383_vm1, %v8336_v44  ;;  %v7664_v26 = vpop.f32.mrb[18].mxu0  ;;  %v8369_v8 = vld [vmem:[#allocation17_spill] sm:$0xff] }
 0x68e   : > { %6198 = vmatprep.subr.mxu1 %v8336_v44  ;;  %v4615_v0 = vrot.slane %v4366_v57, 1  ;;  %8355 = vst [vmem:[#allocation40_spill] sm:$0xff] %v7664_v26  ;;  %v6192_v43 = vpop.f32.mrb[19].mxu0  ;;  %4850 = vperm.xlu1 %6337, %v8360_v22   ;;  %v8370_v5 = vld [vmem:[#allocation21_spill] sm:$0xff]  ;;  %v8373_v57 = vld [vmem:[#allocation24_spill] sm:$0xff] }
 0x68f   : > { %4854 = vperm.xlu0 %6336, %v8361_v48  }
 0x690   : > { %6196 = vmatmul.mubr.msk.f32.vlgmr.msra.gmra.mrb[18].mxu1 %vm364_vm2, %v8352_v41  ;;  %v8372_v41 = vld [vmem:[#allocation20_spill] sm:$0xff] }
 0x691   : > { %6199 = vmatpush3.msra.mxu1 %v8353_v2  ;;  %6200 = vmatprep.mubr.msk.f32.mxu1 %vm6383_vm1, %v8336_v44 }
 0x692   : > { %6213 = vmatprep.subr.mxu1 %v8336_v44  ;;  %4858 = vperm.xlu1 %6337, %v8362_v60  }
 0x693   : > { %4862 = vperm.xlu0 %6336, %v8363_v25  }
 0x696   : > { %4866 = vperm.xlu1 %6337, %v8364_v63  }
 0x697   : > { %4870 = vperm.xlu0 %6336, %v8365_v29  }
 0x698   : > { %6201 = vmatmul.mubr.msk.f32.vlgmr.msra.gmra.mrb[18].mxu1 %vm441_vm3, %v4615_v0  ;;  %v4209_v0 = vpop.permute.xlu1 %4208 }
 0x699   : > { %6214 = vmatpush3.msk.msra.mxu1 %vm367_vm0, %v8351_v34  ;;  %6215 = vmatprep.mubr.msk.f32.mxu1 %vm6383_vm1, %v8336_v44  ;;  %v8371_v34 = vld [vmem:[#allocation23_spill] sm:$0xff] }
 0x69a   : > { %6218 = vmatprep.subr.mxu1 %v8336_v44  ;;  %4874 = vperm.xlu1 %6337, %v8366_v23  }
 0x69b   : > { %4878 = vperm.xlu0 %6336, %v8367_v42  }
 0x69c   : > { %6216 = vmatmul.mubr.msk.f32.vlgmr.msra.gmra.mrb[20].mxu1 %vm364_vm2, %v8354_v56  ;;  %v4205_v56 = vpop.permute.xlu0 %4204  ;;  %v4213_v43 = vpop.permute.xlu1 %4212 }
 0x69d   : > { %6219 = vmatpush3.msra.mxu1 %v8353_v2  ;;  %6220 = vmatprep.mubr.msk.f32.mxu1 %vm6383_vm1, %v8336_v44  ;;  %v8374_v2 = vld [vmem:[#allocation22_spill] sm:$0xff] }
 0x69e   : > { %4882 = vperm.xlu1 %6337, %v8368_v14  }
 0x69f   : > { %4886 = vperm.xlu0 %6336, %v8369_v8  }
 0x6a0   : > { %v4217_v47 = vpop.permute.xlu0 %4216 }
 0x6a2   : > { %4890 = vperm.xlu1 %6337, %v8370_v5  }
 0x6a3   : > { %4894 = vperm.xlu0 %6336, %v8371_v34  }
 0x6a4   : > { %6221 = vmatmul.mubr.msk.f32.vlgmr.msra.gmra.mrb[20].mxu1 %vm441_vm3, %v4987_v9  ;;  %v4221_v9 = vpop.permute.xlu1 %4220  ;;  %v4225_v31 = vpop.permute.xlu0 %4224 }
 0x6a5   : > { %6235 = vmatprep.mubr.msk.f32.mxu1 %vm364_vm2, %v8359_v61 }
 0x6a6   : > { %4898 = vperm.xlu1 %6337, %v8372_v41  }
 0x6a7   : > { %4902 = vperm.xlu0 %6336, %v8373_v57  }
 0x6a8   : > { %v4229_v61 = vpop.permute.xlu1 %4228  ;;  %v4233_v14 = vpop.permute.xlu0 %4232 }
 0x6aa   : > { %4906 = vperm.xlu1 %6337, %v8374_v2  }
 0x6ac   : > { %v4237_v42 = vpop.permute.xlu1 %4236  ;;  %v4241_v8 = vpop.permute.xlu0 %4240 }
 0x6b0   : > { %v4245_v23 = vpop.permute.xlu1 %4244  ;;  %v4249_v5 = vpop.permute.xlu0 %4248 }
 0x6b4   : > { %v4253_v29 = vpop.permute.xlu1 %4252  ;;  %v4257_v34 = vpop.permute.xlu0 %4256 }
 0x6b8   : > { %v4261_v63 = vpop.permute.xlu1 %4260  ;;  %v4265_v25 = vpop.permute.xlu0 %4264 }
 0x6bc   : > { %v4269_v39 = vpop.permute.xlu1 %4268 }
 0x75f   : > { %v6182_v41 = vpop.f32.mrb[16].mxu1 }
 0x760   : > { %v4272_v57 = vmul.f32 %v6182_v41, %v4205_v56  ;;  %v4274_v60 = vmul.f32 %v6182_v41, %v4209_v0  ;;  %v4276_v2 = vmul.f32 %v6182_v41, %v4213_v43  ;;  %v4278_v48 = vmul.f32 %v6182_v41, %v4217_v47  ;;  %v4194_v22 = vpop.f32.mrb[17].mxu1 }
 0x761   : > { %v4280_v28 = vmul.f32 %v6182_v41, %v4221_v9  ;;  %v4282_v11 = vmul.f32 %v6182_v41, %v4225_v31  ;;  %v4284_v38 = vmul.f32 %v6182_v41, %v4229_v61  ;;  %v4286_v24 = vmul.f32 %v6182_v41, %v4233_v14 }
 0x762   : > { %v4288_v32 = vmul.f32 %v6182_v41, %v4237_v42  ;;  %v4290_v17 = vmul.f32 %v6182_v41, %v4241_v8  ;;  %v4292_v6 = vmul.f32 %v6182_v41, %v4245_v23  ;;  %v4294_v55 = vmul.f32 %v6182_v41, %v4249_v5 }
 0x763   : > { %v4296_v27 = vmul.f32 %v6182_v41, %v4253_v29  ;;  %v4298_v44 = vmul.f32 %v6182_v41, %v4257_v34  ;;  %v4300_v54 = vmul.f32 %v6182_v41, %v4261_v63  ;;  %v4302_v20 = vmul.f32 %v6182_v41, %v4265_v25 }
 0x764   : > { %v4304_v53 = vmul.f32 %v6182_v41, %v4269_v39  ;;  %v7691_v21 = vadd.f32 %v4272_v57, %v7522_v59  ;;  %v7694_v37 = vadd.f32 %v4274_v60, %v7525_v30  ;;  %v7697_v51 = vadd.f32 %v4276_v2, %v7528_v49  ;;  %v8388_v57 = vld [vmem:[#allocation33_spill] sm:$0xff] }
 0x765   : > { %v7700_v62 = vadd.f32 %v4278_v48, %v7531_v3  ;;  %v7703_v26 = vadd.f32 %v4280_v28, %v7534_v52  ;;  %v7706_v33 = vadd.f32 %v4282_v11, %v7537_v35  ;;  %v7709_v41 = vadd.f32 %v4284_v38, %v7540_v10 }
 0x766   : > { %v7712_v59 = vadd.f32 %v4286_v24, %v7543_v19  ;;  %v7715_v30 = vadd.f32 %v4288_v32, %v7546_v36  ;;  %v7718_v49 = vadd.f32 %v4290_v17, %v7549_v13  ;;  %v7721_v3 = vadd.f32 %v4292_v6, %v7552_v1 }
 0x767   : > { %v7724_v52 = vadd.f32 %v4294_v55, %v7555_v58  ;;  %v7727_v35 = vadd.f32 %v4296_v27, %v7558_v12  ;;  %v7730_v10 = vadd.f32 %v4298_v44, %v7561_v50  ;;  %v7733_v19 = vadd.f32 %v4300_v54, %v7564_v15 }
 0x768   : > { %v7738_v36 = vadd.f32 %v4302_v20, %v7569_v40  ;;  %v7741_v13 = vadd.f32 %v4304_v53, %v7572_v46  ;;  %v4271_v1 = vmul.f32 %v4205_v56, %v4194_v22  ;;  %v4273_v58 = vmul.f32 %v4209_v0, %v4194_v22  ;;  %v8391_v56 = vld [vmem:[#allocation34_spill] sm:$0xff] }
 0x769   : > { %v4275_v55 = vmul.f32 %v4213_v43, %v4194_v22  ;;  %v4277_v6 = vmul.f32 %v4217_v47, %v4194_v22  ;;  %v4279_v12 = vmul.f32 %v4221_v9, %v4194_v22  ;;  %v4281_v27 = vmul.f32 %v4225_v31, %v4194_v22  ;;  %v8393_v47 = vld [vmem:[#allocation35_spill] sm:$0xff]  ;;  %v8395_v31 = vld [vmem:[#allocation36_spill] sm:$0xff] }
 0x76a   : > { %v4283_v17 = vmul.f32 %v4229_v61, %v4194_v22  ;;  %v4285_v50 = vmul.f32 %v4233_v14, %v4194_v22  ;;  %v4287_v44 = vmul.f32 %v4237_v42, %v4194_v22  ;;  %v4289_v32 = vmul.f32 %v4241_v8, %v4194_v22  ;;  %v8381_v42 = vld [vmem:[#allocation29_spill] sm:$0xff]  ;;  %v8384_v14 = vld [vmem:[#allocation30_spill] sm:$0xff] }
 0x76b   : > { %v4684_v15 = vpop.f32.mrb[18].mxu1  ;;  %v4291_v54 = vmul.f32 %v4245_v23, %v4194_v22  ;;  %v4293_v24 = vmul.f32 %v4249_v5, %v4194_v22  ;;  %v4295_v40 = vmul.f32 %v4253_v29, %v4194_v22  ;;  %v4297_v20 = vmul.f32 %v4257_v34, %v4194_v22  ;;  %v8386_v5 = vld [vmem:[#allocation32_spill] sm:$0xff] }
 0x76c   : > { %v6202_v11 = vpop.f32.mrb[19].mxu1  ;;  %6203 = vmatprep.subr.msk.mxu0 %vm367_vm0, %v4684_v15  ;;  %v4299_v46 = vmul.f32 %v4261_v63, %v4194_v22  ;;  %v4301_v53 = vmul.f32 %v4265_v25, %v4194_v22  ;;  %v4303_v38 = vmul.f32 %v4269_v39, %v4194_v22  ;;  %v7747_v28 = vadd.f32 %v4271_v1, %v7578_v16  ;;  %v8375_v63 = vld [vmem:[#allocation44_spill] sm:$0xff]  ;;  %v8377_v16 = vld [vmem:[#allocation5_spill] sm:$0xff] }
 0x76d   : > { %6204 = vmatpush3.msk.msra.mxu0 %vm367_vm0, %v4684_v15  ;;  %v7751_v48 = vadd.f32 %v4273_v58, %v7582_v45  ;;  %v7754_v60 = vadd.f32 %v4275_v55, %v7585_v7  ;;  %v7757_v29 = vadd.f32 %v4277_v6, %v7588_v18  ;;  %v7760_v23 = vadd.f32 %v4279_v12, %v7591_v4  ;;  %v8376_v39 = vld [vmem:[#allocation40_spill] sm:$0xff]  ;;  %v8379_v25 = vld [vmem:[#allocation41_spill] sm:$0xff]  ;;  %v8383_v18 = vld [vmem:[#allocation31_spill] sm:$0xff] }
 0x76e   : > { %6206 = vmatmul.mubr.msk.f32.vlgmr.msra.gmra.mrb[20].mxu0 %vm364_vm2, %v8375_v63  ;;  %6208 = vmatprep.subr.mxu0 %v8376_v39  ;;  %v7766_v22 = vadd.f32 %v4281_v27, %v8377_v16  ;;  %v7769_v45 = vadd.f32 %v4283_v17, %v8379_v25  ;;  %v7772_v7 = vadd.f32 %v4285_v50, %v8381_v42  ;;  %v4999_v4 = vstv %s7735_s15  ;;  %v8397_v1 = vld [vmem:[#allocation37_spill] sm:$0xff]  ;;  %v8399_v55 = vld [vmem:[#allocation38_spill] sm:$0xff]  ;;  %v8401_v12 = vld [vmem:[#allocation39_spill] sm:$0xff] }
 0x76f   : > { %6209 = vmatpush3.msra.mxu0 %v8376_v39  ;;  %6210 = vmatprep.mubr.msk.f32.mxu0 %vm441_vm3, %v8383_v18  ;;  %v7779_v8 = vadd.f32 %v4287_v44, %v8384_v14  ;;  %v7782_v34 = vadd.f32 %v4289_v32, %v8386_v5  ;;  %v7785_v2 = vadd.f32 %v4291_v54, %v8388_v57  ;;  %v8390_v0 = vmov 0.0   ;;  %v8403_v17 = vld [vmem:[#allocation19_spill] sm:$0xff]  ;;  %v8404_v32 = vld [vmem:[#allocation42_spill] sm:$0xff]  ;;  %v6352_v11 = vld [vmem:[%s8150_s3] sm:$0xff] }
 0x770   : > { %8378 = vst [vmem:[#allocation27_spill] sm:$0xff] %v7766_v22  ;;  %8380 = vst [vmem:[#allocation18_spill] sm:$0xff] %v7769_v45  ;;  %6223 = vmatprep.subr.mxu0 %v8390_v0  ;;  %v7789_v43 = vadd.f32 %v4293_v24, %v8391_v56  ;;  %v7792_v9 = vadd.f32 %v4295_v40, %v8393_v47  ;;  %v7795_v61 = vadd.f32 %v4297_v20, %v8395_v31  ;;  %v6351_v24 = vld [vmem:[%s8151_s4] sm:$0x7f]  ;;  %v8405_v40 = vld [vmem:[#allocation26_spill] sm:$0xff]  ;;  %v6393_v39 = vmov 7  }
 0x771   : > { %8382 = vst [vmem:[#allocation28_spill] sm:$0xff] %v7772_v7  ;;  %8385 = vst [vmem:[#allocation25_spill] sm:$0xff] %v7779_v8  ;;  %v7798_v58 = vadd.f32 %v4299_v46, %v8397_v1  ;;  %v7801_v6 = vadd.f32 %v4301_v53, %v8399_v55  ;;  %v7804_v27 = vadd.f32 %v4303_v38, %v8401_v12  ;;  %v4997_v44 = vstv %s7743_s20  ;;  %v8407_v16 = vld [vmem:[#allocation8_spill] sm:$0xff]  ;;  %v8408_v25 = vld [vmem:[#allocation6_spill] sm:$0xff] }
 0x772   : > { %8387 = vst [vmem:[#allocation43_spill] sm:$0xff] %v7782_v34  ;;  %8389 = vst [vmem:[#allocation40_spill] sm:$0xff] %v7785_v2  ;;  %v5000_v50 = vmul.f32 %v8403_v17, %v4999_v4  ;;  %v4998_v15 = vmul.f32 %v8403_v17, %v4997_v44  ;;  %6339 = vset.pattern.permute.xlu1 %v6393_v39  ;;  %6338 = vset.pattern.permute.xlu0 %v6393_v39  ;;  %v8409_v42 = vld [vmem:[#allocation10_spill] sm:$0xff]  ;;  %v8410_v4 = vld [vmem:[#allocation7_spill] sm:$0xff] }
 0x773   : > { %8392 = vst [vmem:[#allocation5_spill] sm:$0xff] %v7789_v43  ;;  %8394 = vst [vmem:[#allocation41_spill] sm:$0xff] %v7792_v9  ;;  %5484 = vperm.xlu1 %6339, %v8407_v16   ;;  %5480 = vperm.xlu0 %6338, %v8408_v25   ;;  %v8411_v14 = vld [vmem:[#allocation12_spill] sm:$0xff]  ;;  %v8412_v5 = vld [vmem:[#allocation9_spill] sm:$0xff] }
 0x774   : > { %8396 = vst [vmem:[#allocation29_spill] sm:$0xff] %v7795_v61  ;;  %8398 = vst [vmem:[#allocation30_spill] sm:$0xff] %v7798_v58  ;;  %v5002_v54 = vrot.slane %v5000_v50, 7  ;;  %v8413_v57 = vld [vmem:[#allocation14_spill] sm:$0xff]  ;;  %v8415_v56 = vld [vmem:[#allocation15_spill] sm:$0xff] }
 0x775   : > { %8400 = vst [vmem:[#allocation32_spill] sm:$0xff] %v7801_v6  ;;  %8402 = vst [vmem:[#allocation33_spill] sm:$0xff] %v7804_v27  ;;  %v8416_v47 = vld [vmem:[#allocation13_spill] sm:$0xff]  ;;  %v8417_v31 = vld [vmem:[#allocation16_spill] sm:$0xff] }
 0x776   : > { %6211 = vmatmul.mubr.msk.f32.vlgmr.msra.gmra.mrb[20].mxu0 %vm441_vm3, %v8404_v32  ;;  %v5004_v20 = vadd.f32 %v5002_v54, %v4998_v15  ;;  %v8418_v1 = vld [vmem:[#allocation17_spill] sm:$0xff]  ;;  %v8420_v12 = vld [vmem:[#allocation23_spill] sm:$0xff]  ;;  %v8421_v17 = vld [vmem:[#allocation20_spill] sm:$0xff]  ;;  %v4847_v15 = vpop.permute.xlu1 %4846  ;;  %v4843_v54 = vpop.permute.xlu0 %4842 }
 0x777   : > { %6224 = vmatpush3.msk.msra.mxu0 %vm367_vm0, %v6351_v24  ;;  %6225 = vmatprep.mubr.msk.f32.mxu0 %vm6383_vm1, %v8390_v0  ;;  %v7826_v53 = vpop.f32.mrb[20].mxu1  ;;  %v8419_v55 = vld [vmem:[#allocation21_spill] sm:$0xff]  ;;  %v8422_v50 = vld [vmem:[#allocation24_spill] sm:$0xff]  ;;  %v8423_v44 = vld [vmem:[#allocation22_spill] sm:$0xff] }
 0x778   : > { %6228 = vmatprep.subr.mxu0 %v8390_v0  ;;  %v5253_v46 = vrot.slane %v5004_v20, 1  ;;  %8406 = vst [vmem:[#allocation34_spill] sm:$0xff] %v7826_v53  ;;  %v6222_v38 = vpop.f32.mrb[21].mxu1  ;;  %5488 = vperm.xlu1 %6339, %v8409_v42  }
 0x779   : > { %5492 = vperm.xlu0 %6338, %v8410_v4  }
 0x77a   : > { %6226 = vmatmul.mubr.msk.f32.vlgmr.msra.gmra.mrb[22].mxu0 %vm364_vm2, %v8405_v40  ;;  %v4851_v24 = vpop.permute.xlu1 %4850  ;;  %v4855_v40 = vpop.permute.xlu0 %4854 }
 0x77b   : > { %6229 = vmatpush3.msra.mxu0 %v6352_v11  ;;  %6230 = vmatprep.mubr.msk.f32.mxu0 %vm6383_vm1, %v8390_v0  ;;  %v8414_v0 = vld [vmem:[#allocation11_spill] sm:$0xff] }
 0x77c   : > { %5496 = vperm.xlu1 %6339, %v8411_v14  }
 0x77d   : > { %5500 = vperm.xlu0 %6338, %v8412_v5  }
 0x77e   : > { %v4859_v20 = vpop.permute.xlu1 %4858  ;;  %v4863_v11 = vpop.permute.xlu0 %4862 }
 0x780   : > { %5504 = vperm.xlu1 %6339, %v8413_v57  }
 0x781   : > { %5508 = vperm.xlu0 %6338, %v8414_v0  }
 0x782   : > { %6231 = vmatmul.mubr.msk.f32.vlgmr.msra.gmra.mrb[22].mxu0 %vm441_vm3, %v5253_v46  ;;  %v4867_v46 = vpop.permute.xlu1 %4866  ;;  %v4871_v38 = vpop.permute.xlu0 %4870 }
 0x784   : > { %5512 = vperm.xlu1 %6339, %v8415_v56  }
 0x785   : > { %5516 = vperm.xlu0 %6338, %v8416_v47  }
 0x786   : > { %v4875_v39 = vpop.permute.xlu1 %4874  ;;  %v4879_v16 = vpop.permute.xlu0 %4878 }
 0x788   : > { %5520 = vperm.xlu1 %6339, %v8417_v31  }
 0x789   : > { %5524 = vperm.xlu0 %6338, %v8418_v1  }
 0x78a   : > { %v4883_v25 = vpop.permute.xlu1 %4882  ;;  %v4887_v42 = vpop.permute.xlu0 %4886 }
 0x78c   : > { %5528 = vperm.xlu1 %6339, %v8419_v55  }
 0x78d   : > { %5532 = vperm.xlu0 %6338, %v8420_v12  }
 0x78e   : > { %v4891_v4 = vpop.permute.xlu1 %4890  ;;  %v4895_v14 = vpop.permute.xlu0 %4894 }
 0x790   : > { %5536 = vperm.xlu1 %6339, %v8421_v17  }
 0x791   : > { %5540 = vperm.xlu0 %6338, %v8422_v50  }
 0x792   : > { %v4899_v5 = vpop.permute.xlu1 %4898  ;;  %v4903_v0 = vpop.permute.xlu0 %4902 }
 0x794   : > { %5544 = vperm.xlu1 %6339, %v8423_v44  }
 0x796   : > { %v4907_v12 = vpop.permute.xlu1 %4906 }
 0x849   : > { %v6212_v57 = vpop.f32.mrb[20].mxu0 }
 0x84a   : > { %v4910_v56 = vmul.f32 %v6212_v57, %v4843_v54  ;;  %v4912_v47 = vmul.f32 %v6212_v57, %v4847_v15  ;;  %v4914_v31 = vmul.f32 %v6212_v57, %v4851_v24  ;;  %v4916_v1 = vmul.f32 %v6212_v57, %v4855_v40  ;;  %v4832_v55 = vpop.f32.mrb[21].mxu0 }
 0x84b   : > { %v4918_v17 = vmul.f32 %v6212_v57, %v4859_v20  ;;  %v4920_v50 = vmul.f32 %v6212_v57, %v4863_v11  ;;  %v4922_v44 = vmul.f32 %v6212_v57, %v4867_v46  ;;  %v4924_v32 = vmul.f32 %v6212_v57, %v4871_v38 }
 0x84c   : > { %v4926_v27 = vmul.f32 %v6212_v57, %v4875_v39  ;;  %v4928_v6 = vmul.f32 %v6212_v57, %v4879_v16  ;;  %v4930_v58 = vmul.f32 %v6212_v57, %v4883_v25  ;;  %v4932_v61 = vmul.f32 %v6212_v57, %v4887_v42 }
 0x84d   : > { %v4934_v9 = vmul.f32 %v6212_v57, %v4891_v4  ;;  %v4936_v43 = vmul.f32 %v6212_v57, %v4895_v14  ;;  %v4938_v2 = vmul.f32 %v6212_v57, %v4899_v5  ;;  %v4940_v34 = vmul.f32 %v6212_v57, %v4903_v0 }
 0x84e   : > { %v4942_v8 = vmul.f32 %v6212_v57, %v4907_v12  ;;  %v7846_v18 = vadd.f32 %v4910_v56, %v7691_v21  ;;  %v7849_v7 = vadd.f32 %v4912_v47, %v7694_v37  ;;  %v7852_v45 = vadd.f32 %v4914_v31, %v7697_v51 }
 0x84f   : > { %v7855_v22 = vadd.f32 %v4916_v1, %v7700_v62  ;;  %v7858_v53 = vadd.f32 %v4918_v17, %v7703_v26  ;;  %v7861_v63 = vadd.f32 %v4920_v50, %v7706_v33  ;;  %v7864_v57 = vadd.f32 %v4922_v44, %v7709_v41  ;;  %v8442_v1 = vld [vmem:[#allocation41_spill] sm:$0xff]  ;;  %v8446_v50 = vld [vmem:[#allocation30_spill] sm:$0xff] }
 0x850   : > { %v7867_v21 = vadd.f32 %v4924_v32, %v7712_v59  ;;  %v7870_v37 = vadd.f32 %v4926_v27, %v7715_v30  ;;  %v7873_v51 = vadd.f32 %v4928_v6, %v7718_v49  ;;  %v7876_v62 = vadd.f32 %v4930_v58, %v7721_v3 }
 0x851   : > { %v7879_v26 = vadd.f32 %v4932_v61, %v7724_v52  ;;  %v7882_v33 = vadd.f32 %v4934_v9, %v7727_v35  ;;  %v7885_v41 = vadd.f32 %v4936_v43, %v7730_v10  ;;  %v7888_v59 = vadd.f32 %v4938_v2, %v7733_v19 }
 0x852   : > { %v7891_v30 = vadd.f32 %v4940_v34, %v7738_v36  ;;  %v7894_v49 = vadd.f32 %v4942_v8, %v7741_v13  ;;  %v4909_v3 = vmul.f32 %v4843_v54, %v4832_v55  ;;  %v4911_v58 = vmul.f32 %v4847_v15, %v4832_v55 }
 0x853   : > { %v4913_v6 = vmul.f32 %v4851_v24, %v4832_v55  ;;  %v4915_v52 = vmul.f32 %v4855_v40, %v4832_v55  ;;  %v4917_v61 = vmul.f32 %v4859_v20, %v4832_v55  ;;  %v4919_v27 = vmul.f32 %v4863_v11, %v4832_v55  ;;  %v8425_v11 = vld [vmem:[#allocation44_spill] sm:$0xff] }
 0x854   : > { %v4921_v35 = vmul.f32 %v4867_v46, %v4832_v55  ;;  %v4923_v9 = vmul.f32 %v4871_v38, %v4832_v55  ;;  %v4925_v32 = vmul.f32 %v4875_v39, %v4832_v55  ;;  %v4927_v10 = vmul.f32 %v4879_v16, %v4832_v55  ;;  %v8426_v46 = vld [vmem:[#allocation34_spill] sm:$0xff]  ;;  %v8431_v16 = vld [vmem:[#allocation28_spill] sm:$0xff] }
 0x855   : > { %v5322_v43 = vpop.f32.mrb[22].mxu0  ;;  %v4929_v56 = vmul.f32 %v4883_v25, %v4832_v55  ;;  %v4931_v19 = vmul.f32 %v4887_v42, %v4832_v55  ;;  %v4933_v2 = vmul.f32 %v4891_v4, %v4832_v55  ;;  %v4935_v47 = vmul.f32 %v4895_v14, %v4832_v55  ;;  %v8429_v39 = vld [vmem:[#allocation18_spill] sm:$0xff]  ;;  %v8436_v42 = vld [vmem:[#allocation43_spill] sm:$0xff]  ;;  %v8438_v14 = vld [vmem:[#allocation40_spill] sm:$0xff] }
 0x856   : > { %v6232_v36 = vpop.f32.mrb[23].mxu0  ;;  %6233 = vmatprep.subr.msk.mxu1 %vm367_vm0, %v5322_v43  ;;  %v4937_v13 = vmul.f32 %v4899_v5, %v4832_v55  ;;  %v4939_v8 = vmul.f32 %v4903_v0, %v4832_v55  ;;  %v4941_v34 = vmul.f32 %v4907_v12, %v4832_v55  ;;  %v7898_v15 = vadd.f32 %v4909_v3, %v7747_v28  ;;  %v8427_v28 = vld [vmem:[#allocation27_spill] sm:$0xff]  ;;  %v8440_v0 = vld [vmem:[#allocation5_spill] sm:$0xff]  ;;  %v8448_v3 = vld [vmem:[#allocation32_spill] sm:$0xff] }
 0x857   : > { %6234 = vmatpush3.msk.msra.mxu1 %vm367_vm0, %v5322_v43  ;;  %v7902_v54 = vadd.f32 %v4911_v58, %v7751_v48  ;;  %v7905_v24 = vadd.f32 %v4913_v6, %v7754_v60  ;;  %v7908_v40 = vadd.f32 %v4915_v52, %v7757_v29  ;;  %v7911_v20 = vadd.f32 %v4917_v61, %v7760_v23  ;;  %v8433_v29 = vld [vmem:[#allocation31_spill] sm:$0xff]  ;;  %v8434_v23 = vld [vmem:[#allocation25_spill] sm:$0xff]  ;;  %v8452_v61 = vld [vmem:[#allocation42_spill] sm:$0xff] }
 0x858   : > { %6236 = vmatmul.mubr.msk.f32.vlgmr.msra.gmra.mrb[22].mxu1 %vm364_vm2, %v8425_v11  ;;  %6238 = vmatprep.subr.mxu1 %v8426_v46  ;;  %v7917_v38 = vadd.f32 %v4919_v27, %v8427_v28  ;;  %v7920_v48 = vadd.f32 %v4921_v35, %v8429_v39  ;;  %v7923_v60 = vadd.f32 %v4923_v9, %v8431_v16  ;;  %v8444_v12 = vld [vmem:[#allocation29_spill] sm:$0xff]  ;;  %v7957_v27 = vpop.permute.xlu1 %5484  ;;  %v7959_v35 = vpop.permute.xlu0 %5480 }
 0x859   : > { %8424 = vst [vmem:[#allocation35_spill] sm:$0xff] %v7911_v20  ;;  %6239 = vmatpush3.msra.mxu1 %v8426_v46  ;;  %6240 = vmatprep.mubr.msk.f32.mxu1 %vm441_vm3, %v8433_v29  ;;  %v7929_v25 = vadd.f32 %v4925_v32, %v8434_v23  ;;  %v7932_v4 = vadd.f32 %v4927_v10, %v8436_v42  ;;  %v8450_v6 = vld [vmem:[#allocation33_spill] sm:$0xff] }
 0x85a   : > { %8428 = vst [vmem:[#allocation36_spill] sm:$0xff] %v7917_v38  ;;  %8430 = vst [vmem:[#allocation37_spill] sm:$0xff] %v7920_v48  ;;  %v7935_v5 = vadd.f32 %v4929_v56, %v8438_v14  ;;  %v7938_v31 = vadd.f32 %v4931_v19, %v8440_v0  ;;  %v7941_v55 = vadd.f32 %v4933_v2, %v8442_v1 }
 0x85b   : > { %8432 = vst [vmem:[#allocation38_spill] sm:$0xff] %v7923_v60  ;;  %8435 = vst [vmem:[#allocation39_spill] sm:$0xff] %v7929_v25  ;;  %v7944_v17 = vadd.f32 %v4935_v47, %v8444_v12  ;;  %v7947_v44 = vadd.f32 %v4937_v13, %v8446_v50  ;;  %v7950_v58 = vadd.f32 %v4939_v8, %v8448_v3 }
 0x85c   : > { %8437 = vst [vmem:[#allocation19_spill] sm:$0xff] %v7932_v4  ;;  %8439 = vst [vmem:[#allocation26_spill] sm:$0xff] %v7935_v5  ;;  %v7953_v52 = vadd.f32 %v4941_v34, %v8450_v6  ;;  %v7961_v9 = vpop.permute.xlu1 %5488  ;;  %v7963_v32 = vpop.permute.xlu0 %5492 }
 0x85d   : > { %8441 = vst [vmem:[#allocation8_spill] sm:$0xff] %v7938_v31  ;;  %8443 = vst [vmem:[#allocation6_spill] sm:$0xff] %v7941_v55 }
 0x85e   : > { %8445 = vst [vmem:[#allocation10_spill] sm:$0xff] %v7944_v17  ;;  %8447 = vst [vmem:[#allocation7_spill] sm:$0xff] %v7947_v44 }
 0x85f   : > { %8449 = vst [vmem:[#allocation12_spill] sm:$0xff] %v7950_v58  ;;  %8451 = vst [vmem:[#allocation9_spill] sm:$0xff] %v7953_v52 }
 0x860   : > { %6241 = vmatmul.mubr.msk.f32.vlgmr.msra.gmra.mrb[22].mxu1 %vm441_vm3, %v8452_v61  ;;  %v7965_v10 = vpop.permute.xlu1 %5496  ;;  %v7967_v43 = vpop.permute.xlu0 %5500 }
 0x864   : > { %v7969_v56 = vpop.permute.xlu1 %5504  ;;  %v7971_v19 = vpop.permute.xlu0 %5508 }
 0x868   : > { %v7973_v2 = vpop.permute.xlu1 %5512  ;;  %v7975_v47 = vpop.permute.xlu0 %5516 }
 0x86c   : > { %v7977_v36 = vpop.permute.xlu1 %5520  ;;  %v7979_v13 = vpop.permute.xlu0 %5524 }
 0x870   : > { %v7981_v8 = vpop.permute.xlu1 %5528  ;;  %v7983_v34 = vpop.permute.xlu0 %5532 }
 0x874   : > { %v7985_v11 = vpop.permute.xlu1 %5536  ;;  %v5541_v12 = vpop.permute.xlu0 %5540 }
 0x878   : > { %v5545_v52 = vpop.permute.xlu1 %5544 }
 0x933   : > { %v6242_v46 = vpop.f32.mrb[22].mxu1 }
 0x934   : > { %v5548_v28 = vmul.f32 %v6242_v46, %v7959_v35  ;;  %v5550_v39 = vmul.f32 %v6242_v46, %v7957_v27  ;;  %v5552_v16 = vmul.f32 %v6242_v46, %v7961_v9  ;;  %v5554_v29 = vmul.f32 %v6242_v46, %v7963_v32  ;;  %v7992_v23 = vpop.f32.mrb[23].mxu1 }
 0x935   : > { %v5556_v42 = vmul.f32 %v6242_v46, %v7965_v10  ;;  %v5558_v14 = vmul.f32 %v6242_v46, %v7967_v43  ;;  %v5560_v0 = vmul.f32 %v6242_v46, %v7969_v56  ;;  %v5562_v1 = vmul.f32 %v6242_v46, %v7971_v19 }
 0x936   : > { %v5564_v50 = vmul.f32 %v6242_v46, %v7973_v2  ;;  %v5566_v3 = vmul.f32 %v6242_v46, %v7975_v47  ;;  %v5568_v6 = vmul.f32 %v6242_v46, %v7977_v36  ;;  %v5570_v61 = vmul.f32 %v6242_v46, %v7979_v13 }
 0x937   : > { %v5572_v58 = vmul.f32 %v6242_v46, %v7981_v8  ;;  %v5574_v44 = vmul.f32 %v6242_v46, %v7983_v34  ;;  %v5576_v17 = vmul.f32 %v6242_v46, %v7985_v11  ;;  %v5578_v55 = vmul.f32 %v6242_v46, %v5541_v12 }
 0x938   : > { %v5580_v31 = vmul.f32 %v6242_v46, %v5545_v52  ;;  %v5582_v5 = vadd.f32 %v5548_v28, %v7846_v18  ;;  %v5584_v4 = vadd.f32 %v5550_v39, %v7849_v7  ;;  %v5586_v25 = vadd.f32 %v5552_v16, %v7852_v45  ;;  %v8463_v39 = vld [vmem:[#allocation7_spill] sm:$0xff] }
 0x939   : > { %v5588_v60 = vadd.f32 %v5554_v29, %v7855_v22  ;;  %v5590_v48 = vadd.f32 %v5556_v42, %v7858_v53  ;;  %v5592_v38 = vadd.f32 %v5558_v14, %v7861_v63  ;;  %v5594_v20 = vadd.f32 %v5560_v0, %v7864_v57  ;;  %v8464_v29 = vld [vmem:[#allocation12_spill] sm:$0xff]  ;;  %v8465_v42 = vld [vmem:[#allocation9_spill] sm:$0xff] }
 0x93a   : > { %v5596_v46 = vadd.f32 %v5562_v1, %v7867_v21  ;;  %v5598_v18 = vadd.f32 %v5564_v50, %v7870_v37  ;;  %v5600_v7 = vadd.f32 %v5566_v3, %v7873_v51  ;;  %v5602_v45 = vadd.f32 %v5568_v6, %v7876_v62  ;;  %5618 = vst.msk [vmem:[%s8005_s30 + $0x8] sm:$0x7f] %vm5617_vm4, %v5582_v5 }
 0x93b   : > { %5620 = vst.msk [vmem:[%s8005_s30 + $0x18] sm:$0x7f] %vm5617_vm4, %v5584_v4  ;;  %5622 = vst.msk [vmem:[%s8005_s30 + $0x28] sm:$0x7f] %vm5617_vm4, %v5586_v25  ;;  %v5604_v63 = vadd.f32 %v5570_v61, %v7879_v26  ;;  %v5606_v22 = vadd.f32 %v5572_v58, %v7882_v33  ;;  %v5608_v53 = vadd.f32 %v5574_v44, %v7885_v41 }
 0x93c   : > { %v5610_v57 = vadd.f32 %v5576_v17, %v7888_v59  ;;  %5624 = vst.msk [vmem:[%s8005_s30 + $0x38] sm:$0x7f] %vm5617_vm4, %v5588_v60  ;;  %5626 = vst.msk [vmem:[%s8005_s30 + $0x48] sm:$0x7f] %vm5617_vm4, %v5590_v48  ;;  %v5612_v21 = vadd.f32 %v5578_v55, %v7891_v30  ;;  %v5614_v37 = vadd.f32 %v5580_v31, %v7894_v49 }
 0x93d   : > { %5628 = vst.msk [vmem:[%s8005_s30 + $0x58] sm:$0x7f] %vm5617_vm4, %v5592_v38  ;;  %5630 = vst.msk [vmem:[%s8005_s30 + $0x68] sm:$0x7f] %vm5617_vm4, %v5594_v20  ;;  %v5547_v51 = vmul.f32 %v7959_v35, %v7992_v23  ;;  %v5549_v62 = vmul.f32 %v7957_v27, %v7992_v23  ;;  %v5551_v26 = vmul.f32 %v7961_v9, %v7992_v23  ;;  %v8453_v35 = vld [vmem:[#allocation35_spill] sm:$0xff] }
 0x93e   : > { %5632 = vst.msk [vmem:[%s8005_s30 + $0x78] sm:$0x7f] %vm5617_vm4, %v5596_v46  ;;  %5634 = vst.msk [vmem:[%s8005_s30 + $0x88] sm:$0x7f] %vm5617_vm4, %v5598_v18  ;;  %v5553_v33 = vmul.f32 %v7963_v32, %v7992_v23  ;;  %v5555_v41 = vmul.f32 %v7965_v10, %v7992_v23  ;;  %v5557_v59 = vmul.f32 %v7967_v43, %v7992_v23  ;;  %v8454_v32 = vld [vmem:[#allocation36_spill] sm:$0xff]  ;;  %v8455_v43 = vld [vmem:[#allocation37_spill] sm:$0xff] }
 0x93f   : > { %5636 = vst.msk [vmem:[%s8005_s30 + $0x98] sm:$0x7f] %vm5617_vm4, %v5600_v7  ;;  %5638 = vst.msk [vmem:[%s8005_s30 + $0xa8] sm:$0x7f] %vm5617_vm4, %v5602_v45  ;;  %v5559_v30 = vmul.f32 %v7969_v56, %v7992_v23  ;;  %v5561_v49 = vmul.f32 %v7971_v19, %v7992_v23  ;;  %v5563_v20 = vmul.f32 %v7973_v2, %v7992_v23  ;;  %v8456_v19 = vld [vmem:[#allocation38_spill] sm:$0xff]  ;;  %v8457_v2 = vld [vmem:[#allocation39_spill] sm:$0xff] }
 0x940   : > { %5640 = vst.msk [vmem:[%s8005_s30 + $0xb8] sm:$0x7f] %vm5617_vm4, %v5604_v63  ;;  %5642 = vst.msk [vmem:[%s8005_s30 + $0xc8] sm:$0x7f] %vm5617_vm4, %v5606_v22  ;;  %v5565_v38 = vmul.f32 %v7975_v47, %v7992_v23  ;;  %v5567_v48 = vmul.f32 %v7977_v36, %v7992_v23  ;;  %v5569_v60 = vmul.f32 %v7979_v13, %v7992_v23  ;;  %v8459_v47 = vld [vmem:[#allocation26_spill] sm:$0xff]  ;;  %v8460_v36 = vld [vmem:[#allocation8_spill] sm:$0xff] }
 0x941   : > { %5644 = vst.msk [vmem:[%s8005_s30 + $0xd8] sm:$0x7f] %vm5617_vm4, %v5608_v53  ;;  %5646 = vst.msk [vmem:[%s8005_s30 + $0xe8] sm:$0x7f] %vm5617_vm4, %v5610_v57  ;;  %v5571_v25 = vmul.f32 %v7981_v8, %v7992_v23  ;;  %v5573_v4 = vmul.f32 %v7983_v34, %v7992_v23  ;;  %v5575_v5 = vmul.f32 %v7985_v11, %v7992_v23  ;;  %v8461_v8 = vld [vmem:[#allocation6_spill] sm:$0xff] }
 0x942   : > { %5648 = vst.msk [vmem:[%s8005_s30 + $0xf8] sm:$0x7f] %vm5617_vm4, %v5612_v21  ;;  %5650 = vst.msk [vmem:[%s8005_s30 + $0x108] sm:$0x7f] %vm5617_vm4, %v5614_v37  ;;  %v5577_v31 = vmul.f32 %v5541_v12, %v7992_v23  ;;  %v5579_v55 = vmul.f32 %v5545_v52, %v7992_v23  ;;  %v5581_v17 = vadd.f32 %v5547_v51, %v7898_v15  ;;  %v8462_v11 = vld [vmem:[#allocation10_spill] sm:$0xff] }
 0x943   : > { %v5583_v44 = vadd.f32 %v5549_v62, %v7902_v54  ;;  %v5585_v58 = vadd.f32 %v5551_v26, %v7905_v24  ;;  %v5587_v27 = vadd.f32 %v5553_v33, %v7908_v40  ;;  %v5589_v9 = vadd.f32 %v5555_v41, %v8453_v35  ;;  %v8458_v54 = vld [vmem:[#allocation19_spill] sm:$0xff] }
 0x944   : > { %v5591_v10 = vadd.f32 %v5557_v59, %v8454_v32  ;;  %v5593_v56 = vadd.f32 %v5559_v30, %v8455_v43  ;;  %v5595_v52 = vadd.f32 %v5561_v49, %v8456_v19  ;;  %v5597_v15 = vadd.f32 %v5563_v20, %v8457_v2  ;;  %5616 = vst.msk [vmem:[%s8005_s30] sm:$0xff] %vm5615_vm5, %v5581_v17 }
 0x945   : > { %v5599_v24 = vadd.f32 %v5565_v38, %v8458_v54  ;;  %v5601_v40 = vadd.f32 %v5567_v48, %v8459_v47  ;;  %v5603_v13 = vadd.f32 %v5569_v60, %v8460_v36  ;;  %v5605_v34 = vadd.f32 %v5571_v25, %v8461_v8  ;;  %5619 = vst.msk [vmem:[%s8005_s30 + $0x10] sm:$0xff] %vm5615_vm5, %v5583_v44 }
 0x946   : > { %5621 = vst.msk [vmem:[%s8005_s30 + $0x20] sm:$0xff] %vm5615_vm5, %v5585_v58  ;;  %5623 = vst.msk [vmem:[%s8005_s30 + $0x30] sm:$0xff] %vm5615_vm5, %v5587_v27  ;;  %v5607_v28 = vadd.f32 %v5573_v4, %v8462_v11  ;;  %v5609_v16 = vadd.f32 %v5575_v5, %v8463_v39  ;;  %v5611_v23 = vadd.f32 %v5577_v31, %v8464_v29 }
 0x947   : > { %5625 = vst.msk [vmem:[%s8005_s30 + $0x40] sm:$0xff] %vm5615_vm5, %v5589_v9  ;;  %v5613_v14 = vadd.f32 %v5579_v55, %v8465_v42  ;;  %5627 = vst.msk [vmem:[%s8005_s30 + $0x50] sm:$0xff] %vm5615_vm5, %v5591_v10 }
 0x948   : > { %5629 = vst.msk [vmem:[%s8005_s30 + $0x60] sm:$0xff] %vm5615_vm5, %v5593_v56  ;;  %5631 = vst.msk [vmem:[%s8005_s30 + $0x70] sm:$0xff] %vm5615_vm5, %v5595_v52 }
 0x949   : > { %5633 = vst.msk [vmem:[%s8005_s30 + $0x80] sm:$0xff] %vm5615_vm5, %v5597_v15  ;;  %5635 = vst.msk [vmem:[%s8005_s30 + $0x90] sm:$0xff] %vm5615_vm5, %v5599_v24 }
 0x94a   : > { %5637 = vst.msk [vmem:[%s8005_s30 + $0xa0] sm:$0xff] %vm5615_vm5, %v5601_v40  ;;  %5639 = vst.msk [vmem:[%s8005_s30 + $0xb0] sm:$0xff] %vm5615_vm5, %v5603_v13 }
 0x94b   : > { %5641 = vst.msk [vmem:[%s8005_s30 + $0xc0] sm:$0xff] %vm5615_vm5, %v5605_v34  ;;  %5643 = vst.msk [vmem:[%s8005_s30 + $0xd0] sm:$0xff] %vm5615_vm5, %v5607_v28 }
 0x94c   : > { %5645 = vst.msk [vmem:[%s8005_s30 + $0xe0] sm:$0xff] %vm5615_vm5, %v5609_v16  ;;  %5647 = vst.msk [vmem:[%s8005_s30 + $0xf0] sm:$0xff] %vm5615_vm5, %v5611_v23 }
 0x94d   : > { %5649 = vst.msk [vmem:[%s8005_s30 + $0x100] sm:$0xff] %vm5615_vm5, %v5613_v14 }
 0x94e PF: > { %s18_s24 = sadd.s32 1, %s6378_s24  }
 0x94f   : > { %p15_p1 = scmp.ge.s32.totalorder %s18_s24, 4  }
 0x951   :  { %17 = sbr.rel (!%p15_p1) target bundleno = 1 (0x1), region = 83 }
 0x958   :  { %5672 = vsyncpa [#allocation3], 1 }
 0x959   :  { %5674 = vsyncpa [#allocation3 + $0x1], 1 }

</bundles_post_ra>
